<compile_context>
chip_gen: v5e
topology: v5e:2x2
jax: 0.10.0
libtpu: 0.0.40
codegen_flags: <defaults>
</compile_context>

<pallas_src>
import jax
import jax.numpy as jnp
from jax.experimental import pallas as pl
from jax.experimental.pallas import tpu as pltpu

# Network sizes from the PyTorch module: nx = [n_features, 20, 10, 1]
N_FEATURES = 32          # stand-in for len(xtrain.columns)
NX = [N_FEATURES, 20, 10, 1]


def mlp_kernel(x_ref, w1_ref, b1_ref, w2_ref, b2_ref, w3_ref, b3_ref, o_ref):
    # x tile: (TILE_B, D0), batch on sublanes (natural HBM layout, no wrapper transpose).
    # Cast to the matmul dtype (bf16 by default) before the MXU.
    x = x_ref[...].astype(w1_ref.dtype)

    # Layer 1: contract the feature dim of both operands -> (D1, TILE_B).
    # This puts the batch on lanes for the rest of the kernel (lane-dense math + store), and
    # with M=D1 (tiny) / N=TILE_B (tall) it is also the cheap MXU orientation for these shapes.
    # TODO(synk): if the bundle dump shows a materialized relayout of the x tile here, it is the
    # residual cost of keeping batch-on-lanes; the bf16 cast above already halves it.
    h1 = jax.lax.dot_general(
        w1_ref[...], x, (((1,), (1,)), ((), ())),
        preferred_element_type=jnp.float32)                            # (D1, TILE_B) f32 acc
    h1 = jnp.maximum(h1 + b1_ref[...], 0.0)                            # bias (D1,1) lane-broadcast
    h1 = h1.astype(w2_ref.dtype)

    # Layer 2: canonical matmul, batch stays on lanes.
    h2 = jnp.dot(w2_ref[...], h1, preferred_element_type=jnp.float32)  # (D2, TILE_B) f32 acc
    h2 = jnp.maximum(h2 + b2_ref[...], 0.0)

    # Layer 3 (D2 -> 1): f32 VPU multiply + sublane reduction instead of a 1-wide MXU matmul.
    z3 = jnp.sum(w3_ref[...] * h2, axis=0, keepdims=True) + b3_ref[...]  # (1, TILE_B)

    o_ref[...] = jax.nn.sigmoid(z3)                                    # lane-dense store


def _round_up(n, m):
    return ((n + m - 1) // m) * m


def mlp_forward(x, params, *, tile_b=8192, min_steps=4, matmul_dtype=jnp.bfloat16, flat=False):
    """x: (B, D0) float32/bfloat16 (PyTorch layout). params in torch layout: w_i (out, in),
    b_i (out, 1). Returns (B, 1) float32 matching
    nn.Sequential(Linear, ReLU, Linear, ReLU, Linear, Sigmoid); flat=True returns (B,) and
    skips the trailing relayout."""
    w1, b1, w2, b2, w3, b3 = params
    B, D0 = x.shape
    D1, D2 = w1.shape[0], w2.shape[0]

    # MXU operands in bf16 (tiny, host-side cast is free); everything VPU-side stays f32.
    w1 = w1.astype(matmul_dtype)
    w2 = w2.astype(matmul_dtype)
    b1 = b1.astype(jnp.float32)
    b2 = b2.astype(jnp.float32)
    w3_col = jnp.transpose(w3).astype(jnp.float32)    # (D2, 1) column for the VPU reduction
    b3 = b3.astype(jnp.float32)

    # Batch tile: must be a multiple of 128 lanes (hard layout rule for the (1, tile_b) output
    # block), as large as practical to amortize per-step overhead, but keep >= min_steps grid
    # steps when the batch is big enough (v7x megacore sharding + DMA prefetch overlap).
    b_align = _round_up(B, 128)
    tile_b = _round_up(max(128, min(int(tile_b), b_align)), 128)
    if b_align >= min_steps * 128:
        tile_b = min(tile_b, _round_up(-(-b_align // min_steps), 128))
    b_pad = _round_up(B, tile_b)
    if b_pad != B:
        # Padded rows are zeros, computed independently per-row, and sliced off below.
        x = jnp.pad(x, ((0, b_pad - B), (0, 0)))

    out = pl.pallas_call(
        mlp_kernel,
        out_shape=jax.ShapeDtypeStruct((1, b_pad), jnp.float32),
        grid=(b_pad // tile_b,),
        in_specs=[
            pl.BlockSpec((tile_b, D0), lambda i: (i, 0)),   # x: streamed over the batch
            pl.BlockSpec((D1, D0), lambda i: (0, 0)),       # W1 (bf16): DMA'd once, VMEM-resident
            pl.BlockSpec((D1, 1), lambda i: (0, 0)),        # b1
            pl.BlockSpec((D2, D1), lambda i: (0, 0)),       # W2 (bf16)
            pl.BlockSpec((D2, 1), lambda i: (0, 0)),        # b2
            pl.BlockSpec((D2, 1), lambda i: (0, 0)),        # W3 column
            pl.BlockSpec((1, 1), lambda i: (0, 0)),         # b3
        ],
        out_specs=pl.BlockSpec((1, tile_b), lambda i: (0, i)),
        compiler_params=pltpu.CompilerParams(
            dimension_semantics=("parallel",),
            # Headroom for double-buffered lane-padded x tiles (tile_b*512 B/buffer in f32)
            # plus resident weights/intermediates; 48 MiB fits every generation incl. v7x.
            vmem_limit_bytes=48 * 1024 * 1024,
        ),
    )(x, w1, b1, w2, b2, w3_col, b3)

    if flat:
        return out[0, :B]                 # (B,): no extra relayout copy
    return out[:, :B].reshape(B, 1)       # match the nn.Module output shape (B, 1)


def init_params(key):
    # Deterministic init mimicking PyTorch's default Linear init:
    # U(-1/sqrt(fan_in), 1/sqrt(fan_in)), weights stored torch-style as (out, in),
    # biases as (out, 1) columns.
    params = []
    for i in range(3):
        fan_in, fan_out = NX[i], NX[i + 1]
        key, kw, kb = jax.random.split(key, 3)
        bound = 1.0 / (fan_in ** 0.5)
        w = jax.random.uniform(kw, (fan_out, fan_in), jnp.float32, -bound, bound)
        b = jax.random.uniform(kb, (fan_out, 1), jnp.float32, -bound, bound)
        params += [w, b]
    return tuple(params)


def reference_forward(x, params):
    w1, b1, w2, b2, w3, b3 = params
    h1 = jnp.maximum(x @ w1.T + b1.T, 0.0)
    h2 = jnp.maximum(h1 @ w2.T + b2.T, 0.0)
    return jax.nn.sigmoid(h2 @ w3.T + b3.T)


if __name__ == "__main__":
    key = jax.random.PRNGKey(0)
    key, kx = jax.random.split(key)
    params = init_params(key)

    # Main case: large streamed batch (4 grid steps of 4096 rows after the tile chooser).
    BATCH = 16384
    x = jax.random.normal(kx, (BATCH, N_FEATURES), jnp.float32)
    out = jax.block_until_ready(mlp_forward(x, params))
    ref = reference_forward(x, params)
    assert out.shape == (BATCH, NX[3])
    # bf16 MXU inputs with f32 accumulation: relax the exact-f32 tolerance.
    assert jnp.allclose(out, ref, atol=1e-2), float(jnp.max(jnp.abs(out - ref)))

    # Robustness case from the review: batch and requested tile_b not multiples of 128.
    key, kx2 = jax.random.split(key)
    x_small = jax.random.normal(kx2, (1000, N_FEATURES), jnp.float32)
    out_small = jax.block_until_ready(mlp_forward(x_small, params, tile_b=2000))
    ref_small = reference_forward(x_small, params)
    assert out_small.shape == (1000, NX[3])
    assert jnp.allclose(out_small, ref_small, atol=1e-2)

    print("KERNEL_OK")
</pallas_src>

<mosaic_0001>
module attributes {stable_mosaic.version = 11 : i64} {
  func.func @mlp_kernel(%arg0: i32, %arg1: memref<4096x32xf32, #tpu.memory_space<vmem>>, %arg2: memref<20x32xbf16, #tpu.memory_space<vmem>>, %arg3: memref<20x1xf32, #tpu.memory_space<vmem>>, %arg4: memref<10x20xbf16, #tpu.memory_space<vmem>>, %arg5: memref<10x1xf32, #tpu.memory_space<vmem>>, %arg6: memref<10x1xf32, #tpu.memory_space<vmem>>, %arg7: memref<1x1xf32, #tpu.memory_space<vmem>>, %arg8: memref<1x4096xf32, #tpu.memory_space<vmem>>) attributes {dimension_semantics = [#tpu.dimension_semantics<parallel>], iteration_bounds = array<i64: 4>, scalar_prefetch = 0 : i64, scratch_operands = 0 : i64, tpu.core_type = #tpu.core_type<tc>, window_params = [{transform_indices = @transform_0, window_bounds = array<i64: 4096, 32>}, {pipeline_mode = #tpu.pipeline_mode<synchronous>, transform_indices = @transform_1, window_bounds = array<i64: 20, 32>}, {pipeline_mode = #tpu.pipeline_mode<synchronous>, transform_indices = @transform_2, window_bounds = array<i64: 20, 1>}, {pipeline_mode = #tpu.pipeline_mode<synchronous>, transform_indices = @transform_3, window_bounds = array<i64: 10, 20>}, {pipeline_mode = #tpu.pipeline_mode<synchronous>, transform_indices = @transform_4, window_bounds = array<i64: 10, 1>}, {pipeline_mode = #tpu.pipeline_mode<synchronous>, transform_indices = @transform_5, window_bounds = array<i64: 10, 1>}, {pipeline_mode = #tpu.pipeline_mode<synchronous>, transform_indices = @transform_6, window_bounds = array<i64: 1, 1>}, {transform_indices = @transform_7, window_bounds = array<i64: 1, 4096>}]} {
    %c0 = arith.constant 0 : index
    %c0_0 = arith.constant 0 : index
    %0 = vector.load %arg1[%c0, %c0_0] : memref<4096x32xf32, #tpu.memory_space<vmem>>, vector<4096x32xf32>
    %1 = arith.truncf %0 : vector<4096x32xf32> to vector<4096x32xbf16>
    %c0_1 = arith.constant 0 : index
    %c0_2 = arith.constant 0 : index
    %2 = vector.load %arg2[%c0_1, %c0_2] : memref<20x32xbf16, #tpu.memory_space<vmem>>, vector<20x32xbf16>
    %cst = arith.constant dense<0.000000e+00> : vector<20x4096xf32>
    %3 = tpu.matmul %2, %1, %cst {dimension_numbers = #tpu.dot_dimension_numbers<[1], [1], [0], [0], [0, 0, 1, 0], [], []>} : vector<20x32xbf16>, vector<4096x32xbf16>, vector<20x4096xf32> -> vector<20x4096xf32>
    %c0_3 = arith.constant 0 : index
    %c0_4 = arith.constant 0 : index
    %4 = vector.load %arg3[%c0_3, %c0_4] : memref<20x1xf32, #tpu.memory_space<vmem>>, vector<20x1xf32>
    %5 = vector.broadcast %4 : vector<20x1xf32> to vector<20x4096xf32>
    %6 = arith.addf %3, %5 : vector<20x4096xf32>
    %cst_5 = arith.constant 0.000000e+00 : f32
    %7 = vector.broadcast %cst_5 : f32 to vector<20x4096xf32>
    %8 = arith.maximumf %6, %7 : vector<20x4096xf32>
    %9 = arith.truncf %8 : vector<20x4096xf32> to vector<20x4096xbf16>
    %c0_6 = arith.constant 0 : index
    %c0_7 = arith.constant 0 : index
    %10 = vector.load %arg4[%c0_6, %c0_7] : memref<10x20xbf16, #tpu.memory_space<vmem>>, vector<10x20xbf16>
    %cst_8 = arith.constant dense<0.000000e+00> : vector<10x4096xf32>
    %11 = tpu.matmul %10, %9, %cst_8 {dimension_numbers = #tpu.dot_dimension_numbers<[1], [0], [0], [1], [0, 0, 1, 1], [], []>} : vector<10x20xbf16>, vector<20x4096xbf16>, vector<10x4096xf32> -> vector<10x4096xf32>
    %c0_9 = arith.constant 0 : index
    %c0_10 = arith.constant 0 : index
    %12 = vector.load %arg5[%c0_9, %c0_10] : memref<10x1xf32, #tpu.memory_space<vmem>>, vector<10x1xf32>
    %13 = vector.broadcast %12 : vector<10x1xf32> to vector<10x4096xf32>
    %14 = arith.addf %11, %13 : vector<10x4096xf32>
    %cst_11 = arith.constant 0.000000e+00 : f32
    %15 = vector.broadcast %cst_11 : f32 to vector<10x4096xf32>
    %16 = arith.maximumf %14, %15 : vector<10x4096xf32>
    %c0_12 = arith.constant 0 : index
    %c0_13 = arith.constant 0 : index
    %17 = vector.load %arg6[%c0_12, %c0_13] : memref<10x1xf32, #tpu.memory_space<vmem>>, vector<10x1xf32>
    %18 = vector.broadcast %17 : vector<10x1xf32> to vector<10x4096xf32>
    %19 = arith.mulf %18, %16 : vector<10x4096xf32>
    %cst_14 = arith.constant dense<0.000000e+00> : vector<4096xf32>
    %20 = vector.multi_reduction <add>, %19, %cst_14 [0] : vector<10x4096xf32> to vector<4096xf32>
    %21 = vector.shape_cast %20 : vector<4096xf32> to vector<1x4096xf32>
    %c0_15 = arith.constant 0 : index
    %c0_16 = arith.constant 0 : index
    %22 = vector.load %arg7[%c0_15, %c0_16] : memref<1x1xf32, #tpu.memory_space<vmem>>, vector<1x1xf32>
    %23 = vector.broadcast %22 : vector<1x1xf32> to vector<1x4096xf32>
    %24 = arith.addf %21, %23 : vector<1x4096xf32>
    %25 = arith.negf %24 : vector<1x4096xf32>
    %26 = math.exp %25 : vector<1x4096xf32>
    %cst_17 = arith.constant 1.000000e+00 : f32
    %27 = vector.broadcast %cst_17 : f32 to vector<1x4096xf32>
    %28 = arith.addf %27, %26 : vector<1x4096xf32>
    %29 = arith.divf %27, %28 : vector<1x4096xf32>
    %c0_18 = arith.constant 0 : index
    %c0_19 = arith.constant 0 : index
    %30 = vector.load %arg8[%c0_18, %c0_19] : memref<1x4096xf32, #tpu.memory_space<vmem>>, vector<1x4096xf32>
    tpu.vector_store %arg8[%c0_18, %c0_19], %29 {strides = array<i32>} : memref<1x4096xf32, #tpu.memory_space<vmem>>, vector<1x4096xf32>,
    return
  }
  func.func @transform_0(%arg0: i32) -> (i32, i32) {
    %c0_i32 = arith.constant 0 : i32
    %c0_i32_0 = arith.constant 0 : i32
    return %arg0, %c0_i32 : i32, i32
  }
  func.func @transform_1(%arg0: i32) -> (i32, i32) {
    %c0_i32 = arith.constant 0 : i32
    %c0_i32_0 = arith.constant 0 : i32
    %c0_i32_1 = arith.constant 0 : i32
    return %c0_i32, %c0_i32_0 : i32, i32
  }
  func.func @transform_2(%arg0: i32) -> (i32, i32) {
    %c0_i32 = arith.constant 0 : i32
    %c0_i32_0 = arith.constant 0 : i32
    %c0_i32_1 = arith.constant 0 : i32
    return %c0_i32, %c0_i32_0 : i32, i32
  }
  func.func @transform_3(%arg0: i32) -> (i32, i32) {
    %c0_i32 = arith.constant 0 : i32
    %c0_i32_0 = arith.constant 0 : i32
    %c0_i32_1 = arith.constant 0 : i32
    return %c0_i32, %c0_i32_0 : i32, i32
  }
  func.func @transform_4(%arg0: i32) -> (i32, i32) {
    %c0_i32 = arith.constant 0 : i32
    %c0_i32_0 = arith.constant 0 : i32
    %c0_i32_1 = arith.constant 0 : i32
    return %c0_i32, %c0_i32_0 : i32, i32
  }
  func.func @transform_5(%arg0: i32) -> (i32, i32) {
    %c0_i32 = arith.constant 0 : i32
    %c0_i32_0 = arith.constant 0 : i32
    %c0_i32_1 = arith.constant 0 : i32
    return %c0_i32, %c0_i32_0 : i32, i32
  }
  func.func @transform_6(%arg0: i32) -> (i32, i32) {
    %c0_i32 = arith.constant 0 : i32
    %c0_i32_0 = arith.constant 0 : i32
    %c0_i32_1 = arith.constant 0 : i32
    return %c0_i32, %c0_i32_0 : i32, i32
  }
  func.func @transform_7(%arg0: i32) -> (i32, i32) {
    %c0_i32 = arith.constant 0 : i32
    %c0_i32_0 = arith.constant 0 : i32
    return %c0_i32, %arg0 : i32, i32
  }
}

</mosaic_0001>

<bundles_post_ra>
// kernel: tpu_custom_call.1
= control target key start
LH: loop header
LB: loop body
LE: loop exit
PB: predicated region body
PF: predicated region fallthrough
CT: control target
= control target key end

     0   :  { %s7253_s0 = inlined_call_operand.vmem [shape: f32[16384,32], index: 0, kind: input, shape index: {}]   ;;  %s7254_s1 = inlined_call_operand.vmem [shape: bf16[20,32], index: 1, kind: input, shape index: {}]   ;;  %s7255_s2 = inlined_call_operand.vmem [shape: f32[20,1], index: 2, kind: input, shape index: {}]   ;;  %s7256_s3 = inlined_call_operand.vmem [shape: bf16[10,20], index: 3, kind: input, shape index: {}]   ;;  %s7257_s4 = inlined_call_operand.vmem [shape: f32[10,1], index: 4, kind: input, shape index: {}]   ;;  %s7258_s5 = inlined_call_operand.vmem [shape: f32[10,1], index: 5, kind: input, shape index: {}]   ;;  %s7259_s6 = inlined_call_operand.<no memory space> [shape: f32[1,1], index: 6, kind: input, shape index: {}]   ;;  %s7260_s7 = inlined_call_operand.hbm [shape: f32[1,16384], index: 7, kind: output, shape index: {}]  }
   0x1   :  { %v12_v0 = vstv %s7259_s6 }
   0x2   :  { %13 = vst [vmem:[#allocation2] sm:$0x1] %v12_v0 }
   0x3   :  { %14 = vsyncpa [#allocation4], 0 }
   0x4   :  { %16 = vsyncpa [#allocation4 + $0x1], 0  ;;  %s4809_s26 = smov 0   ;;  %s4811_s27 = smov 0  }
   0x5   :  { %s4813_s28 = smov 0   ;;  %s4815_s29 = smov 0  }
   0x6 LB: > { %s4830_s6 = sadd.s32 4294967295, %s4763_s29   ;;  %s4379_s30 = sadd.s32 4294967294, %s4763_s29   ;;  %s4763_s29 = sphi %s4815_s29, %s7495_s29   ;;  %s4759_s28 = sphi %s4813_s28, %s7494_s28   ;;  %s4755_s27 = sphi %s4811_s27, %s7493_s27   ;;  %s4751_s26 = sphi %s4809_s26, %s7492_s26  }
   0x7   : > { %s4834_s8 = sadd.s32 1, %s4763_s29   ;;  %s181_s9 = sadd.s32 1, %s4759_s28 }
   0x8   : > { %s178_s10 = ssub.s32 %s4763_s29, %s4834_s8  ;;  %p191_p0 = scmp.ne.s32.totalorder %s4759_s28, %s4755_s27 }
   0x9   : > { %p179_p1 = scmp.eq.s32.totalorder %s178_s10, 0  ;;  %p192_p2 = scmp.eq.s32.totalorder %s4830_s6, 3 }
   0xa   : > { %p197_p3 = scmp.ne.s32.totalorder %s4755_s27, %s4751_s26  ;;  %p198_p4 = scmp.eq.s32.totalorder %s4379_s30, 3 }
   0xb   : > { %s4845_s11 = scalar_select %p179_p1, %s4759_s28, %s181_s9  }
   0xc   : > { %p4847_p5 = por %p192_p2, %p191_p0  ;;  %p4851_p6 = por %p198_p4, %p197_p3 }
   0xd   : > { %p4382_p7 = scmp.ge.s32.totalorder %s4763_s29, 1  ;;  %p243_p8 = scmp.lt.s32.totalorder %s4763_s29, 5 }
   0xf   : > { %p244_p9 = pnand %p4382_p7, %p243_p8 }
  0x11   : > { %247 = sbr.rel (%p244_p9) target bundleno = 983 (0x3d7), region = 48 }
  0x16   : > { %s4384_s14 = sshll.u32 %s4830_s6, 9  ;;  %vm1080_vm0 = vcmask 261120   ;;  %vm2614_vm1 = vcmask 1041408   ;;  %vm2610_vm2 = vcmask 162816   ;;  %s4523_s17 = sshll.u32 %s4830_s6, 5 }
  0x17   : > { %p276_p10 = scmp.lt.s32.totalorder %s4384_s14, 2047  ;;  %s7194_s20 = scalar_lea.hbm %s7260_s7, %s4523_s17 }
  0x18   : > { %s4319_s22 = sshll.u32 %s7194_s20, 4  ;;  %s4721_s10 = scalar_lea.hbm %s7260_s7, 128  ;;  %s4320_s22 = int_to_ptr.hbm [resolvable:$true] %s4319_s22 }
  0x19   : > { %s7497_s14 = smov (!%p276_p10, %s4384_s14), 2047  ;;  %s4715_s24 = sshra.s32 %s4320_s22, 4  ;;  %s4716_s24 = int_to_ptr.hbm [resolvable:$true] %s4715_s24 }
  0x1a   : > { %s4385_s15 = sshll.u32 %s7497_s14, 3  ;;  %s4717_s25 = scalar_lea.hbm %s4716_s24, 32 }
  0x1b   : > { %s4861_s18 = scalar_lea.vmem %s7253_s0, %s4385_s15  ;;  %s272_s15 = sand.u32 1, %s4755_s27  }
  0x1c   : > { %v297_v1 = vld [vmem:[%s4861_s18 + $0x70] sm:$0xff]  ;;  %v298_v2 = vld [vmem:[%s4861_s18 + $0x78] sm:$0xff]  ;;  %v295_v12 = vld [vmem:[%s4861_s18 + $0x60] sm:$0xff]  ;;  %s7178_s16 = sshll.u32 %s272_s15, 5  ;;  %s4305_s23 = scalar_lea.sflag [#allocation4], %s272_s15 }
  0x1d   : > { %v313_v3 = vld [vmem:[%s4861_s18 + $0xf0] sm:$0xff]  ;;  %v802_v4 = vpack.c.bf16 %v298_v2, %v297_v1  ;;  %v314_v5 = vld [vmem:[%s4861_s18 + $0xf8] sm:$0xff]  ;;  %v296_v15 = vld [vmem:[%s4861_s18 + $0x68] sm:$0xff]  ;;  %p4718_p11 = scmp.ne.s32.totalorder %s4716_s24, %s4717_s25  ;;  %p4722_p0 = scmp.lt.s32.totalorder %s4716_s24, %s7260_s7 }
  0x1e   : > { %v329_v6 = vld [vmem:[%s4861_s18 + $0x170] sm:$0xff]  ;;  %v330_v7 = vld [vmem:[%s4861_s18 + $0x178] sm:$0xff]  ;;  %v810_v8 = vpack.c.bf16 %v314_v5, %v313_v3  ;;  %v311_v16 = vld [vmem:[%s4861_s18 + $0xe0] sm:$0xff]  ;;  %v801_v24 = vpack.c.bf16 %v296_v15, %v295_v12  ;;  %p4723_p1 = scmp.lt.s32.totalorder %s4721_s10, %s4717_s25 }
  0x1f   : > { %v818_v9 = vpack.c.bf16 %v330_v7, %v329_v6  ;;  %v345_v10 = vld [vmem:[%s4861_s18 + $0x1f0] sm:$0xff]  ;;  %v346_v11 = vld [vmem:[%s4861_s18 + $0x1f8] sm:$0xff]  ;;  %v1109_v13 = vsel %vm1080_vm0, %v802_v4, 0  ;;  %v312_v17 = vld [vmem:[%s4861_s18 + $0xe8] sm:$0xff]  ;;  %p4719_p12 = pnand %p4718_p11, %p4847_p5 }
  0x20   : > { %v826_v14 = vpack.c.bf16 %v346_v11, %v345_v10  ;;  %1855 = vmatpush.bf16.xpose.msra.mxu0 %v1109_v13  ;;  %v1133_v18 = vsel %vm1080_vm0, %v810_v8, 0  ;;  %v327_v20 = vld [vmem:[%s4861_s18 + $0x160] sm:$0xff]  ;;  %v328_v21 = vld [vmem:[%s4861_s18 + $0x168] sm:$0xff]  ;;  %v809_v26 = vpack.c.bf16 %v312_v17, %v311_v16  ;;  %v1106_v29 = vsel %vm1080_vm0, %v801_v24, 0  ;;  %v293_v32 = vld [vmem:[%s4861_s18 + $0x50] sm:$0xff]  ;;  %p4724_p2 = por %p4723_p1, %p4722_p0 }
  0x21   : > { %v1157_v19 = vsel %vm1080_vm0, %v818_v9, 0  ;;  %v343_v22 = vld [vmem:[%s4861_s18 + $0x1e0] sm:$0xff]  ;;  %1873 = vmatpush.bf16.xpose.msra.mxu1 %v1133_v18  ;;  %v344_v25 = vld [vmem:[%s4861_s18 + $0x1e8] sm:$0xff]  ;;  %v817_v27 = vpack.c.bf16 %v328_v21, %v327_v20  ;;  %v294_v33 = vld [vmem:[%s4861_s18 + $0x58] sm:$0xff]  ;;  %p4720_p13 = pneg %p4719_p12 }
  0x22   : > { %1891 = vmatpush.bf16.xpose.msra.mxu2 %v1157_v19  ;;  %v1181_v23 = vsel %vm1080_vm0, %v826_v14, 0  ;;  %v825_v28 = vpack.c.bf16 %v344_v25, %v343_v22  ;;  %v1130_v30 = vsel %vm1080_vm0, %v809_v26, 0  ;;  %v309_v34 = vld [vmem:[%s4861_s18 + $0xd0] sm:$0xff]  ;;  %v310_v36 = vld [vmem:[%s4861_s18 + $0xd8] sm:$0xff]  ;;  %v800_v41 = vpack.c.bf16 %v294_v33, %v293_v32  ;;  %v291_v48 = vld [vmem:[%s4861_s18 + $0x40] sm:$0xff] }
  0x23   : > { %1909 = vmatpush.bf16.xpose.msra.mxu3 %v1181_v23  ;;  %v1154_v31 = vsel %vm1080_vm0, %v817_v27, 0  ;;  %v325_v37 = vld [vmem:[%s4861_s18 + $0x150] sm:$0xff]  ;;  %v326_v38 = vld [vmem:[%s4861_s18 + $0x158] sm:$0xff]  ;;  %v808_v42 = vpack.c.bf16 %v310_v36, %v309_v34  ;;  %v292_v49 = vld [vmem:[%s4861_s18 + $0x48] sm:$0xff]  ;;  %p4725_p3 = pnand %p4724_p2, %p4720_p13 }
  0x24   : > { %v1178_v35 = vsel %vm1080_vm0, %v825_v28, 0  ;;  %v341_v39 = vld [vmem:[%s4861_s18 + $0x1d0] sm:$0xff]  ;;  %v342_v40 = vld [vmem:[%s4861_s18 + $0x1d8] sm:$0xff]  ;;  %v816_v43 = vpack.c.bf16 %v326_v38, %v325_v37  ;;  %v1103_v45 = vsel %vm1080_vm0, %v800_v41, 0  ;;  %v307_v50 = vld [vmem:[%s4861_s18 + $0xc0] sm:$0xff]  ;;  %v799_v57 = vpack.c.bf16 %v292_v49, %v291_v48 }
  0x25   : > { %v824_v44 = vpack.c.bf16 %v342_v40, %v341_v39  ;;  %v1127_v46 = vsel %vm1080_vm0, %v808_v42, 0  ;;  %v308_v52 = vld [vmem:[%s4861_s18 + $0xc8] sm:$0xff]  ;;  %v323_v53 = vld [vmem:[%s4861_s18 + $0x140] sm:$0xff]  ;;  %v289_v0 = vld [vmem:[%s4861_s18 + $0x30] sm:$0xff] }
  0x26   : > { %v1151_v47 = vsel %vm1080_vm0, %v816_v43, 0  ;;  %v324_v54 = vld [vmem:[%s4861_s18 + $0x148] sm:$0xff]  ;;  %v339_v55 = vld [vmem:[%s4861_s18 + $0x1c0] sm:$0xff]  ;;  %v807_v58 = vpack.c.bf16 %v308_v52, %v307_v50  ;;  %v1100_v61 = vsel %vm1080_vm0, %v799_v57, 0  ;;  %v290_v1 = vld [vmem:[%s4861_s18 + $0x38] sm:$0xff] }
  0x27   : > { %v1175_v51 = vsel %vm1080_vm0, %v824_v44, 0  ;;  %v340_v56 = vld [vmem:[%s4861_s18 + $0x1c8] sm:$0xff]  ;;  %v815_v59 = vpack.c.bf16 %v324_v54, %v323_v53  ;;  %v305_v2 = vld [vmem:[%s4861_s18 + $0xb0] sm:$0xff]  ;;  %v306_v4 = vld [vmem:[%s4861_s18 + $0xb8] sm:$0xff]  ;;  %v798_v9 = vpack.c.bf16 %v290_v1, %v289_v0 }
  0x28   : > { %1856 = vmatpush.bf16.xpose.msra.mxu0 %v1106_v29  ;;  %v823_v60 = vpack.c.bf16 %v340_v56, %v339_v55  ;;  %v1124_v62 = vsel %vm1080_vm0, %v807_v58, 0  ;;  %v321_v5 = vld [vmem:[%s4861_s18 + $0x130] sm:$0xff]  ;;  %v322_v6 = vld [vmem:[%s4861_s18 + $0x138] sm:$0xff]  ;;  %v806_v10 = vpack.c.bf16 %v306_v4, %v305_v2  ;;  %v287_v16 = vld [vmem:[%s4861_s18 + $0x20] sm:$0xff] }
  0x29   : > { %1874 = vmatpush.bf16.xpose.msra.mxu1 %v1130_v30  ;;  %v1148_v63 = vsel %vm1080_vm0, %v815_v59, 0  ;;  %v337_v7 = vld [vmem:[%s4861_s18 + $0x1b0] sm:$0xff]  ;;  %v338_v8 = vld [vmem:[%s4861_s18 + $0x1b8] sm:$0xff]  ;;  %v814_v11 = vpack.c.bf16 %v322_v6, %v321_v5  ;;  %v1097_v13 = vsel %vm1080_vm0, %v798_v9, 0  ;;  %v288_v17 = vld [vmem:[%s4861_s18 + $0x28] sm:$0xff] }
  0x2a   : > { %1892 = vmatpush.bf16.xpose.msra.mxu2 %v1154_v31  ;;  %v1172_v3 = vsel %vm1080_vm0, %v823_v60, 0  ;;  %v822_v12 = vpack.c.bf16 %v338_v8, %v337_v7  ;;  %v1121_v14 = vsel %vm1080_vm0, %v806_v10, 0  ;;  %v303_v18 = vld [vmem:[%s4861_s18 + $0xa0] sm:$0xff]  ;;  %v304_v20 = vld [vmem:[%s4861_s18 + $0xa8] sm:$0xff]  ;;  %v797_v25 = vpack.c.bf16 %v288_v17, %v287_v16  ;;  %v285_v32 = vld [vmem:[%s4861_s18 + $0x10] sm:$0xff] }
  0x2b   : > { %1910 = vmatpush.bf16.xpose.msra.mxu3 %v1178_v35  ;;  %v1145_v15 = vsel %vm1080_vm0, %v814_v11, 0  ;;  %v319_v21 = vld [vmem:[%s4861_s18 + $0x120] sm:$0xff]  ;;  %v320_v22 = vld [vmem:[%s4861_s18 + $0x128] sm:$0xff]  ;;  %v805_v26 = vpack.c.bf16 %v304_v20, %v303_v18  ;;  %v286_v33 = vld [vmem:[%s4861_s18 + $0x18] sm:$0xff] }
  0x2c   : > { %v1169_v19 = vsel %vm1080_vm0, %v822_v12, 0  ;;  %v335_v23 = vld [vmem:[%s4861_s18 + $0x1a0] sm:$0xff]  ;;  %v336_v24 = vld [vmem:[%s4861_s18 + $0x1a8] sm:$0xff]  ;;  %v813_v27 = vpack.c.bf16 %v320_v22, %v319_v21  ;;  %v1094_v29 = vsel %vm1080_vm0, %v797_v25, 0  ;;  %v301_v34 = vld [vmem:[%s4861_s18 + $0x90] sm:$0xff]  ;;  %v796_v41 = vpack.c.bf16 %v286_v33, %v285_v32 }
  0x2d   : > { %v821_v28 = vpack.c.bf16 %v336_v24, %v335_v23  ;;  %v1118_v30 = vsel %vm1080_vm0, %v805_v26, 0  ;;  %v302_v36 = vld [vmem:[%s4861_s18 + $0x98] sm:$0xff]  ;;  %v317_v37 = vld [vmem:[%s4861_s18 + $0x110] sm:$0xff]  ;;  %v299_v50 = vld [vmem:[%s4861_s18 + $0x80] sm:$0xff] }
  0x2e   : > { %v1142_v31 = vsel %vm1080_vm0, %v813_v27, 0  ;;  %v318_v38 = vld [vmem:[%s4861_s18 + $0x118] sm:$0xff]  ;;  %v333_v39 = vld [vmem:[%s4861_s18 + $0x190] sm:$0xff]  ;;  %v804_v42 = vpack.c.bf16 %v302_v36, %v301_v34  ;;  %v315_v52 = vld [vmem:[%s4861_s18 + $0x100] sm:$0xff] }
  0x2f   : > { %v1166_v35 = vsel %vm1080_vm0, %v821_v28, 0  ;;  %v334_v40 = vld [vmem:[%s4861_s18 + $0x198] sm:$0xff]  ;;  %v812_v43 = vpack.c.bf16 %v318_v38, %v317_v37  ;;  %v316_v54 = vld [vmem:[%s4861_s18 + $0x108] sm:$0xff]  ;;  %v331_v55 = vld [vmem:[%s4861_s18 + $0x180] sm:$0xff] }
  0x30   : > { %1857 = vmatpush.bf16.xpose.msra.mxu0 %v1103_v45  ;;  %v820_v44 = vpack.c.bf16 %v334_v40, %v333_v39  ;;  %v1091_v45 = vsel %vm1080_vm0, %v796_v41, 0  ;;  %v1115_v48 = vsel %vm1080_vm0, %v804_v42, 0  ;;  %v332_v56 = vld [vmem:[%s4861_s18 + $0x188] sm:$0xff]  ;;  %v361_v57 = vld [vmem:[%s4861_s18 + $0x270] sm:$0xff]  ;;  %v362_v58 = vld [vmem:[%s4861_s18 + $0x278] sm:$0xff]  ;;  %v811_v1 = vpack.c.bf16 %v316_v54, %v315_v52 }
  0x31   : > { %1875 = vmatpush.bf16.xpose.msra.mxu1 %v1127_v46  ;;  %v283_v46 = vld [vmem:[%s4861_s18] sm:$0xff]  ;;  %v1139_v49 = vsel %vm1080_vm0, %v812_v43, 0  ;;  %v377_v59 = vld [vmem:[%s4861_s18 + $0x2f0] sm:$0xff]  ;;  %v819_v4 = vpack.c.bf16 %v332_v56, %v331_v55  ;;  %v834_v5 = vpack.c.bf16 %v362_v58, %v361_v57  ;;  %v360_v17 = vld [vmem:[%s4861_s18 + $0x268] sm:$0xff] }
  0x32   : > { %1893 = vmatpush.bf16.xpose.msra.mxu2 %v1151_v47  ;;  %v284_v47 = vld [vmem:[%s4861_s18 + $0x8] sm:$0xff]  ;;  %v1163_v53 = vsel %vm1080_vm0, %v820_v44, 0  ;;  %v409_v2 = vld [vmem:[%s4861_s18 + $0x3f0] sm:$0xff]  ;;  %v1136_v11 = vsel %vm1080_vm0, %v811_v1, 0  ;;  %v359_v16 = vld [vmem:[%s4861_s18 + $0x260] sm:$0xff] }
  0x33   : > { %1911 = vmatpush.bf16.xpose.msra.mxu3 %v1175_v51  ;;  %v300_v51 = vld [vmem:[%s4861_s18 + $0x88] sm:$0xff]  ;;  %v795_v60 = vpack.c.bf16 %v284_v47, %v283_v46  ;;  %v1160_v12 = vsel %vm1080_vm0, %v819_v4, 0  ;;  %v375_v18 = vld [vmem:[%s4861_s18 + $0x2e0] sm:$0xff]  ;;  %v833_v25 = vpack.c.bf16 %v360_v17, %v359_v16  ;;  %v357_v32 = vld [vmem:[%s4861_s18 + $0x250] sm:$0xff] }
  0x34   : > { %v803_v0 = vpack.c.bf16 %v300_v51, %v299_v50  ;;  %v376_v20 = vld [vmem:[%s4861_s18 + $0x2e8] sm:$0xff]  ;;  %v391_v21 = vld [vmem:[%s4861_s18 + $0x360] sm:$0xff]  ;;  %v358_v33 = vld [vmem:[%s4861_s18 + $0x258] sm:$0xff] }
  0x35   : > { %v1088_v8 = vsel %vm1080_vm0, %v795_v60, 0  ;;  %v392_v22 = vld [vmem:[%s4861_s18 + $0x368] sm:$0xff]  ;;  %v407_v23 = vld [vmem:[%s4861_s18 + $0x3e0] sm:$0xff]  ;;  %v841_v26 = vpack.c.bf16 %v376_v20, %v375_v18  ;;  %v373_v34 = vld [vmem:[%s4861_s18 + $0x2d0] sm:$0xff]  ;;  %v832_v41 = vpack.c.bf16 %v358_v33, %v357_v32 }
  0x36   : > { %v1112_v10 = vsel %vm1080_vm0, %v803_v0, 0  ;;  %v408_v24 = vld [vmem:[%s4861_s18 + $0x3e8] sm:$0xff]  ;;  %v849_v27 = vpack.c.bf16 %v392_v22, %v391_v21  ;;  %v374_v36 = vld [vmem:[%s4861_s18 + $0x2d8] sm:$0xff]  ;;  %v389_v37 = vld [vmem:[%s4861_s18 + $0x350] sm:$0xff] }
  0x37   : > { %v857_v28 = vpack.c.bf16 %v408_v24, %v407_v23  ;;  %v390_v38 = vld [vmem:[%s4861_s18 + $0x358] sm:$0xff]  ;;  %v405_v39 = vld [vmem:[%s4861_s18 + $0x3d0] sm:$0xff]  ;;  %v840_v42 = vpack.c.bf16 %v374_v36, %v373_v34  ;;  %v371_v50 = vld [vmem:[%s4861_s18 + $0x2c0] sm:$0xff] }
  0x38   : > { %1858 = vmatpush.bf16.xpose.msra.mxu0 %v1100_v61  ;;  %v378_v61 = vld [vmem:[%s4861_s18 + $0x2f8] sm:$0xff]  ;;  %v848_v43 = vpack.c.bf16 %v390_v38, %v389_v37  ;;  %v372_v52 = vld [vmem:[%s4861_s18 + $0x2c8] sm:$0xff]  ;;  %v403_v55 = vld [vmem:[%s4861_s18 + $0x3c0] sm:$0xff] }
  0x39   : > { %1876 = vmatpush.bf16.xpose.msra.mxu1 %v1124_v62  ;;  %v393_v62 = vld [vmem:[%s4861_s18 + $0x370] sm:$0xff]  ;;  %v842_v6 = vpack.c.bf16 %v378_v61, %v377_v59  ;;  %v406_v40 = vld [vmem:[%s4861_s18 + $0x3d8] sm:$0xff]  ;;  %v1223_v46 = vsel %vm1080_vm0, %v840_v42, 0  ;;  %v388_v54 = vld [vmem:[%s4861_s18 + $0x348] sm:$0xff]  ;;  %v839_v59 = vpack.c.bf16 %v372_v52, %v371_v50 }
  0x3a   : > { %1894 = vmatpush.bf16.xpose.msra.mxu2 %v1148_v63  ;;  %v394_v63 = vld [vmem:[%s4861_s18 + $0x378] sm:$0xff]  ;;  %v856_v44 = vpack.c.bf16 %v406_v40, %v405_v39  ;;  %v1247_v47 = vsel %vm1080_vm0, %v848_v43, 0  ;;  %v404_v56 = vld [vmem:[%s4861_s18 + $0x3c8] sm:$0xff]  ;;  %v5006_v58 = vld [vmem:[%s7254_s1] sm:$0xff] }
  0x3b   : > { %1912 = vmatpush.bf16.xpose.msra.mxu3 %v1172_v3  ;;  %v410_v3 = vld [vmem:[%s4861_s18 + $0x3f8] sm:$0xff]  ;;  %v850_v7 = vpack.c.bf16 %v394_v63, %v393_v62  ;;  %v855_v61 = vpack.c.bf16 %v404_v56, %v403_v55  ;;  %v1220_v63 = vsel %vm1080_vm0, %v839_v59, 0  ;;  %v353_v1 = vld [vmem:[%s4861_s18 + $0x230] sm:$0xff]  ;;  %v351_v18 = vld [vmem:[%s4861_s18 + $0x220] sm:$0xff] }
  0x3c   : > { %v858_v9 = vpack.c.bf16 %v410_v3, %v409_v2  ;;  %v1271_v51 = vsel %vm1080_vm0, %v856_v44, 0  ;;  %v354_v2 = vld [vmem:[%s4861_s18 + $0x238] sm:$0xff]  ;;  %v369_v3 = vld [vmem:[%s4861_s18 + $0x2b0] sm:$0xff]  ;;  %v367_v20 = vld [vmem:[%s4861_s18 + $0x2a0] sm:$0xff] }
  0x3d   : > { %v1268_v4 = vsel %vm1080_vm0, %v855_v61, 0  ;;  %v368_v22 = vld [vmem:[%s4861_s18 + $0x2a8] sm:$0xff]  ;;  %v383_v23 = vld [vmem:[%s4861_s18 + $0x320] sm:$0xff]  ;;  %v350_v36 = vld [vmem:[%s4861_s18 + $0x218] sm:$0xff] }
  0x3e   : > { %v384_v24 = vld [vmem:[%s4861_s18 + $0x328] sm:$0xff]  ;;  %v365_v37 = vld [vmem:[%s4861_s18 + $0x290] sm:$0xff]  ;;  %v366_v39 = vld [vmem:[%s4861_s18 + $0x298] sm:$0xff] }
  0x3f   : > { %v381_v40 = vld [vmem:[%s4861_s18 + $0x310] sm:$0xff]  ;;  %v398_v43 = vld [vmem:[%s4861_s18 + $0x398] sm:$0xff]  ;;  %v348_v52 = vld [vmem:[%s4861_s18 + $0x208] sm:$0xff] }
  0x40   : > { %1859 = vmatpush.bf16.xpose.msra.mxu0 %v1097_v13  ;;  %v1205_v13 = vsel %vm1080_vm0, %v834_v5, 0  ;;  %v370_v5 = vld [vmem:[%s4861_s18 + $0x2b8] sm:$0xff]  ;;  %v397_v42 = vld [vmem:[%s4861_s18 + $0x390] sm:$0xff]  ;;  %v363_v55 = vld [vmem:[%s4861_s18 + $0x280] sm:$0xff] }
  0x41   : > { %1877 = vmatpush.bf16.xpose.msra.mxu1 %v1121_v14  ;;  %v1229_v14 = vsel %vm1080_vm0, %v842_v6, 0  ;;  %v385_v6 = vld [vmem:[%s4861_s18 + $0x330] sm:$0xff]  ;;  %v364_v56 = vld [vmem:[%s4861_s18 + $0x288] sm:$0xff]  ;;  %v395_v61 = vld [vmem:[%s4861_s18 + $0x380] sm:$0xff] }
  0x42   : > { %1895 = vmatpush.bf16.xpose.msra.mxu2 %v1145_v15  ;;  %v1253_v15 = vsel %vm1080_vm0, %v850_v7, 0  ;;  %v386_v7 = vld [vmem:[%s4861_s18 + $0x338] sm:$0xff] }
  0x43   : > { %1913 = vmatpush.bf16.xpose.msra.mxu3 %v1169_v19  ;;  %v1277_v19 = vsel %vm1080_vm0, %v858_v9, 0  ;;  %v402_v9 = vld [vmem:[%s4861_s18 + $0x3b8] sm:$0xff] }
  0x48   : > { %1860 = vmatpush.bf16.xpose.msra.mxu0 %v1094_v29  ;;  %v1202_v29 = vsel %vm1080_vm0, %v833_v25, 0  ;;  %v399_v25 = vld [vmem:[%s4861_s18 + $0x3a0] sm:$0xff] }
  0x49   : > { %1878 = vmatpush.bf16.xpose.msra.mxu1 %v1118_v30  ;;  %v1226_v30 = vsel %vm1080_vm0, %v841_v26, 0  ;;  %v400_v26 = vld [vmem:[%s4861_s18 + $0x3a8] sm:$0xff] }
  0x4a   : > { %1896 = vmatpush.bf16.xpose.msra.mxu2 %v1142_v31  ;;  %v1250_v31 = vsel %vm1080_vm0, %v849_v27, 0 }
  0x4b   : > { %1914 = vmatpush.bf16.xpose.msra.mxu3 %v1166_v35  ;;  %v1274_v35 = vsel %vm1080_vm0, %v857_v28, 0  ;;  %v837_v28 = vpack.c.bf16 %v368_v22, %v367_v20  ;;  %v423_v22 = vld [vmem:[%s4861_s18 + $0x460] sm:$0xff] }
  0x4d   : > { %v1214_v33 = vsel %vm1080_vm0, %v837_v28, 0  ;;  %v456_v28 = vld [vmem:[%s4861_s18 + $0x568] sm:$0xff] }
  0x50   : > { %1861 = vmatpush.bf16.xpose.msra.mxu0 %v1091_v45  ;;  %v1199_v45 = vsel %vm1080_vm0, %v832_v41, 0  ;;  %v382_v41 = vld [vmem:[%s4861_s18 + $0x318] sm:$0xff] }
  0x51   : > { %1879 = vmatpush.bf16.xpose.msra.mxu1 %v1115_v48  ;;  %v355_v48 = vld [vmem:[%s4861_s18 + $0x240] sm:$0xff] }
  0x52   : > { %1897 = vmatpush.bf16.xpose.msra.mxu2 %v1139_v49  ;;  %v356_v49 = vld [vmem:[%s4861_s18 + $0x248] sm:$0xff] }
  0x53   : > { %1915 = vmatpush.bf16.xpose.msra.mxu3 %v1163_v53  ;;  %v387_v53 = vld [vmem:[%s4861_s18 + $0x340] sm:$0xff]  ;;  %v831_v57 = vpack.c.bf16 %v356_v49, %v355_v48  ;;  %v1055_v48 = vld [vmem:[%s7255_s2 + $0x8] sm:$0xff] }
  0x54   : > { %v847_v60 = vpack.c.bf16 %v388_v54, %v387_v53  ;;  %v1054_v49 = vld [vmem:[%s7255_s2] sm:$0xff] }
  0x55   : > { %v1196_v62 = vsel %vm1080_vm0, %v831_v57, 0  ;;  %v379_v57 = vld [vmem:[%s4861_s18 + $0x300] sm:$0xff] }
  0x56   : > { %v1244_v0 = vsel %vm1080_vm0, %v847_v60, 0  ;;  %v380_v60 = vld [vmem:[%s4861_s18 + $0x308] sm:$0xff] }
  0x58   : > { %1862 = vmatpush.bf16.xpose.msra.mxu0 %v1088_v8  ;;  %v401_v8 = vld [vmem:[%s4861_s18 + $0x3b0] sm:$0xff] }
  0x59   : > { %1880 = vmatpush.bf16.xpose.msra.mxu1 %v1112_v10  ;;  %v830_v10 = vpack.c.bf16 %v354_v2, %v353_v1  ;;  %v441_v1 = vld [vmem:[%s4861_s18 + $0x4f0] sm:$0xff] }
  0x5a   : > { %1898 = vmatpush.bf16.xpose.msra.mxu2 %v1136_v11  ;;  %v838_v11 = vpack.c.bf16 %v370_v5, %v369_v3  ;;  %v442_v3 = vld [vmem:[%s4861_s18 + $0x4f8] sm:$0xff] }
  0x5b   : > { %1916 = vmatpush.bf16.xpose.msra.mxu3 %v1160_v12  ;;  %v846_v12 = vpack.c.bf16 %v386_v7, %v385_v6  ;;  %v458_v5 = vld [vmem:[%s4861_s18 + $0x578] sm:$0xff]  ;;  %v835_v6 = vpack.c.bf16 %v364_v56, %v363_v55  ;;  %v843_v7 = vpack.c.bf16 %v380_v60, %v379_v57  ;;  %v419_v57 = vld [vmem:[%s4861_s18 + $0x440] sm:$0xff] }
  0x5c   : > { %v1217_v16 = vsel %vm1080_vm0, %v838_v11, 0  ;;  %v435_v60 = vld [vmem:[%s4861_s18 + $0x4c0] sm:$0xff] }
  0x5d   : > { %v1241_v17 = vsel %vm1080_vm0, %v846_v12, 0  ;;  %v874_v12 = vpack.c.bf16 %v442_v3, %v441_v1  ;;  %v467_v1 = vld [vmem:[%s4861_s18 + $0x5c0] sm:$0xff] }
  0x5f   : > { %4390 = vmatmul.msk.bf16.vlgmr.msra.gmra.mxu0 %vm1080_vm0, %v5006_v58  ;;  %v1325_v20 = vsel %vm1080_vm0, %v874_v12, 0  ;;  %v433_v12 = vld [vmem:[%s4861_s18 + $0x4b0] sm:$0xff] }
  0x60   : > { %1927 = vmatpush.bf16.xpose.msrb.mxu0 %v1205_v13  ;;  %4392 = vmatmul.msk.bf16.vlgmr.msra.gmra.mxu1 %vm1080_vm0, %v5006_v58  ;;  %v854_v13 = vpack.c.bf16 %v402_v9, %v401_v8  ;;  %v473_v8 = vld [vmem:[%s4861_s18 + $0x5f0] sm:$0xff]  ;;  %v474_v9 = vld [vmem:[%s4861_s18 + $0x5f8] sm:$0xff] }
  0x61   : > { %1945 = vmatpush.bf16.xpose.msrb.mxu1 %v1229_v14  ;;  %4394 = vmatmul.msk.bf16.vlgmr.msra.gmra.mxu2 %vm1080_vm0, %v5006_v58  ;;  %v1193_v14 = vsel %vm1080_vm0, %v830_v10, 0 }
  0x62   : > { %1963 = vmatpush.bf16.xpose.msrb.mxu2 %v1253_v15  ;;  %4396 = vmatmul.msk.bf16.vlgmr.msra.gmra.mxu3 %vm1080_vm0, %v5006_v58  ;;  %v4765_v15 = vmov 0   ;;  %v1265_v21 = vsel %vm1080_vm0, %v854_v13, 0 }
  0x63   : > { %1981 = vmatpush.bf16.xpose.msrb.mxu3 %v1277_v19  ;;  %4568 = vset.pattern.permute.xlu0 %v4765_v15  ;;  %v352_v19 = vld [vmem:[%s4861_s18 + $0x228] sm:$0xff] }
  0x64   : > { %4569 = vset.pattern.permute.xlu1 %v4765_v15  ;;  %4570 = vset.pattern.permute.xlu2 %v4765_v15  ;;  %v829_v27 = vpack.c.bf16 %v352_v19, %v351_v18  ;;  %v890_v15 = vpack.c.bf16 %v474_v9, %v473_v8 }
  0x65   : > { %1064 = vperm.xlu1 %4569, %v1055_v48   ;;  %v469_v48 = vld [vmem:[%s4861_s18 + $0x5d0] sm:$0xff] }
  0x66   : > { %v1190_v32 = vsel %vm1080_vm0, %v829_v27, 0  ;;  %v455_v27 = vld [vmem:[%s4861_s18 + $0x560] sm:$0xff] }
  0x68   : > { %1928 = vmatpush.bf16.xpose.msrb.mxu0 %v1202_v29  ;;  %v845_v29 = vpack.c.bf16 %v384_v24, %v383_v23  ;;  %v424_v23 = vld [vmem:[%s4861_s18 + $0x468] sm:$0xff]  ;;  %v439_v24 = vld [vmem:[%s4861_s18 + $0x4e0] sm:$0xff] }
  0x69   : > { %1946 = vmatpush.bf16.xpose.msrb.mxu1 %v1226_v30  ;;  %v853_v30 = vpack.c.bf16 %v400_v26, %v399_v25  ;;  %v1373_v25 = vsel %vm1080_vm0, %v890_v15, 0  ;;  %v440_v26 = vld [vmem:[%s4861_s18 + $0x4e8] sm:$0xff]  ;;  %v449_v15 = vld [vmem:[%s4861_s18 + $0x530] sm:$0xff] }
  0x6a   : > { %1964 = vmatpush.bf16.xpose.msrb.mxu2 %v1250_v31  ;;  %v1056_v31 = vld [vmem:[%s7255_s2 + $0x10] sm:$0xf]  ;;  %v1238_v34 = vsel %vm1080_vm0, %v845_v29, 0  ;;  %v471_v29 = vld [vmem:[%s4861_s18 + $0x5e0] sm:$0xff] }
  0x6b   : > { %1982 = vmatpush.bf16.xpose.msrb.mxu3 %v1274_v35  ;;  %1069 = vperm.xlu0 %4568, %v1056_v31   ;;  %v349_v35 = vld [vmem:[%s4861_s18 + $0x210] sm:$0xff]  ;;  %v1262_v38 = vsel %vm1080_vm0, %v853_v30, 0  ;;  %v472_v30 = vld [vmem:[%s4861_s18 + $0x5e8] sm:$0xff] }
  0x6c   : > { %v828_v44 = vpack.c.bf16 %v350_v36, %v349_v35  ;;  %v1053_v31 = vld [vmem:[%s7254_s1 + $0x8] sm:$0x3]  ;;  %v881_v35 = vpack.c.bf16 %v456_v28, %v455_v27  ;;  %v889_v36 = vpack.c.bf16 %v472_v30, %v471_v29  ;;  %v431_v28 = vld [vmem:[%s4861_s18 + $0x4a0] sm:$0xff] }
  0x6d   : > { %v416_v27 = vld [vmem:[%s4861_s18 + $0x428] sm:$0xff] }
  0x6e   : > { %v1187_v50 = vsel %vm1080_vm0, %v828_v44, 0  ;;  %v1370_v44 = vsel %vm1080_vm0, %v889_v36, 0  ;;  %v432_v30 = vld [vmem:[%s4861_s18 + $0x4a8] sm:$0xff] }
  0x6f   : > { %v869_v36 = vpack.c.bf16 %v432_v30, %v431_v28  ;;  %v487_v28 = vld [vmem:[%s4861_s18 + $0x660] sm:$0xff] }
  0x70   : > { %1929 = vmatpush.bf16.xpose.msrb.mxu0 %v1199_v45  ;;  %v836_v45 = vpack.c.bf16 %v366_v39, %v365_v37  ;;  %v503_v30 = vld [vmem:[%s4861_s18 + $0x6e0] sm:$0xff] }
  0x71   : > { %1947 = vmatpush.bf16.xpose.msrb.mxu1 %v1223_v46  ;;  %v844_v46 = vpack.c.bf16 %v382_v41, %v381_v40  ;;  %v1346_v40 = vsel %vm1080_vm0, %v881_v35, 0  ;;  %v421_v41 = vld [vmem:[%s4861_s18 + $0x450] sm:$0xff] }
  0x72   : > { %1965 = vmatpush.bf16.xpose.msrb.mxu2 %v1247_v47  ;;  %v852_v47 = vpack.c.bf16 %v398_v43, %v397_v42  ;;  %v1211_v53 = vsel %vm1080_vm0, %v836_v45, 0  ;;  %v422_v42 = vld [vmem:[%s4861_s18 + $0x458] sm:$0xff]  ;;  %v437_v43 = vld [vmem:[%s4861_s18 + $0x4d0] sm:$0xff] }
  0x73   : > { %1983 = vmatpush.bf16.xpose.msrb.mxu3 %v1271_v51  ;;  %v347_v51 = vld [vmem:[%s4861_s18 + $0x200] sm:$0xff]  ;;  %1059 = vperm.xlu0 %4568, %v1054_v49   ;;  %v1235_v54 = vsel %vm1080_vm0, %v844_v46, 0  ;;  %v438_v45 = vld [vmem:[%s4861_s18 + $0x4d8] sm:$0xff]  ;;  %v453_v46 = vld [vmem:[%s4861_s18 + $0x550] sm:$0xff] }
  0x74   : > { %v1259_v59 = vsel %vm1080_vm0, %v852_v47, 0  ;;  %v827_v2 = vpack.c.bf16 %v348_v52, %v347_v51  ;;  %v454_v47 = vld [vmem:[%s4861_s18 + $0x558] sm:$0xff]  ;;  %v872_v51 = vpack.c.bf16 %v438_v45, %v437_v43  ;;  %v413_v43 = vld [vmem:[%s4861_s18 + $0x410] sm:$0xff] }
  0x75   : > { %v470_v49 = vld [vmem:[%s4861_s18 + $0x5d8] sm:$0xff]  ;;  %v880_v52 = vpack.c.bf16 %v454_v47, %v453_v46  ;;  %v429_v45 = vld [vmem:[%s4861_s18 + $0x490] sm:$0xff] }
  0x76   : > { %v1319_v55 = vsel %vm1080_vm0, %v872_v51, 0  ;;  %v430_v47 = vld [vmem:[%s4861_s18 + $0x498] sm:$0xff] }
  0x77   : > { %v1343_v56 = vsel %vm1080_vm0, %v880_v52, 0  ;;  %v462_v51 = vld [vmem:[%s4861_s18 + $0x598] sm:$0xff] }
  0x78   : > { %1930 = vmatpush.bf16.xpose.msrb.mxu0 %v1196_v62  ;;  %v396_v62 = vld [vmem:[%s4861_s18 + $0x388] sm:$0xff] }
  0x79   : > { %1948 = vmatpush.bf16.xpose.msrb.mxu1 %v1220_v63  ;;  %v425_v63 = vld [vmem:[%s4861_s18 + $0x470] sm:$0xff]  ;;  %v851_v10 = vpack.c.bf16 %v396_v62, %v395_v61  ;;  %v436_v62 = vld [vmem:[%s4861_s18 + $0x4c8] sm:$0xff] }
  0x7a   : > { %1966 = vmatpush.bf16.xpose.msrb.mxu2 %v1244_v0  ;;  %v426_v0 = vld [vmem:[%s4861_s18 + $0x478] sm:$0xff] }
  0x7b   : > { %1984 = vmatpush.bf16.xpose.msrb.mxu3 %v1268_v4  ;;  %v457_v4 = vld [vmem:[%s4861_s18 + $0x570] sm:$0xff]  ;;  %v866_v11 = vpack.c.bf16 %v426_v0, %v425_v63  ;;  %v1256_v18 = vsel %vm1080_vm0, %v851_v10, 0  ;;  %v451_v63 = vld [vmem:[%s4861_s18 + $0x540] sm:$0xff]  ;;  %v452_v0 = vld [vmem:[%s4861_s18 + $0x548] sm:$0xff] }
  0x7c   : > { %v882_v13 = vpack.c.bf16 %v458_v5, %v457_v4  ;;  %v871_v4 = vpack.c.bf16 %v436_v62, %v435_v60  ;;  %v879_v5 = vpack.c.bf16 %v452_v0, %v451_v63  ;;  %v417_v10 = vld [vmem:[%s4861_s18 + $0x430] sm:$0xff]  ;;  %v427_v62 = vld [vmem:[%s4861_s18 + $0x480] sm:$0xff]  ;;  %v428_v63 = vld [vmem:[%s4861_s18 + $0x488] sm:$0xff] }
  0x7d   : > { %v1301_v19 = vsel %vm1080_vm0, %v866_v11, 0  ;;  %v418_v11 = vld [vmem:[%s4861_s18 + $0x438] sm:$0xff]  ;;  %v443_v0 = vld [vmem:[%s4861_s18 + $0x500] sm:$0xff] }
  0x7e   : > { %v1316_v8 = vsel %vm1080_vm0, %v871_v4, 0  ;;  %v1340_v9 = vsel %vm1080_vm0, %v879_v5, 0  ;;  %v460_v4 = vld [vmem:[%s4861_s18 + $0x588] sm:$0xff]  ;;  %v489_v5 = vld [vmem:[%s4861_s18 + $0x670] sm:$0xff] }
  0x80   : > { %1931 = vmatpush.bf16.xpose.msrb.mxu0 %v1193_v14  ;;  %v1184_v14 = vsel %vm1080_vm0, %v827_v2, 0  ;;  %v468_v2 = vld [vmem:[%s4861_s18 + $0x5c8] sm:$0xff] }
  0x81   : > { %1949 = vmatpush.bf16.xpose.msrb.mxu1 %v1217_v16  ;;  %v1208_v16 = vsel %vm1080_vm0, %v835_v6, 0  ;;  %v887_v6 = vpack.c.bf16 %v468_v2, %v467_v1  ;;  %v444_v2 = vld [vmem:[%s4861_s18 + $0x508] sm:$0xff] }
  0x82   : > { %1967 = vmatpush.bf16.xpose.msrb.mxu2 %v1241_v17  ;;  %v1232_v17 = vsel %vm1080_vm0, %v843_v7, 0 }
  0x83   : > { %1985 = vmatpush.bf16.xpose.msrb.mxu3 %v1265_v21  ;;  %v1349_v21 = vsel %vm1080_vm0, %v882_v13, 0  ;;  %v1364_v13 = vsel %vm1080_vm0, %v887_v6, 0  ;;  %v490_v6 = vld [vmem:[%s4861_s18 + $0x678] sm:$0xff] }
  0x88   : > { %1932 = vmatpush.bf16.xpose.msrb.mxu0 %v1190_v32  ;;  %v865_v32 = vpack.c.bf16 %v424_v23, %v423_v22 }
  0x89   : > { %1950 = vmatpush.bf16.xpose.msrb.mxu1 %v1214_v33  ;;  %v1077_v33 = vunpack.c.l.b16 %v1053_v31  ;;  %v447_v31 = vld [vmem:[%s4861_s18 + $0x520] sm:$0xff] }
  0x8a   : > { %1968 = vmatpush.bf16.xpose.msrb.mxu2 %v1238_v34  ;;  %v873_v34 = vpack.c.bf16 %v440_v26, %v439_v24  ;;  %v415_v26 = vld [vmem:[%s4861_s18 + $0x420] sm:$0xff] }
  0x8b   : > { %1986 = vmatpush.bf16.xpose.msrb.mxu3 %v1262_v38  ;;  %v5100_v37 = vpack.c.b16 %v1077_v33, %v1077_v33  ;;  %v1298_v38 = vsel %vm1080_vm0, %v865_v32, 0  ;;  %v448_v32 = vld [vmem:[%s4861_s18 + $0x528] sm:$0xff]  ;;  %v463_v33 = vld [vmem:[%s4861_s18 + $0x5a0] sm:$0xff]  ;;  %v861_v35 = vpack.c.bf16 %v416_v27, %v415_v26 }
  0x8c   : > { %v1322_v39 = vsel %vm1080_vm0, %v873_v34, 0  ;;  %v464_v34 = vld [vmem:[%s4861_s18 + $0x5a8] sm:$0xff] }
  0x8d   : > { %4395 = vmatmul.msk.bf16.gmra.mxu2 %vm1080_vm0, %v5100_v37  ;;  %4397 = vmatmul.msk.bf16.gmra.mxu3 %vm1080_vm0, %v5100_v37 }
  0x8e   : > { %4391 = vmatmul.msk.bf16.gmra.mxu0 %vm1080_vm0, %v5100_v37  ;;  %4393 = vmatmul.msk.bf16.gmra.mxu1 %vm1080_vm0, %v5100_v37 }
  0x90   : > { %1933 = vmatpush.bf16.xpose.msrb.mxu0 %v1187_v50  ;;  %v864_v50 = vpack.c.bf16 %v422_v42, %v421_v41  ;;  %v1310_v41 = vsel %vm1080_vm0, %v869_v36, 0  ;;  %v536_v36 = vld [vmem:[%s4861_s18 + $0x7e8] sm:$0xff] }
  0x91   : > { %1951 = vmatpush.bf16.xpose.msrb.mxu1 %v1211_v53  ;;  %v888_v53 = vpack.c.bf16 %v470_v49, %v469_v48  ;;  %v445_v48 = vld [vmem:[%s4861_s18 + $0x510] sm:$0xff]  ;;  %v446_v49 = vld [vmem:[%s4861_s18 + $0x518] sm:$0xff] }
  0x92   : > { %1969 = vmatpush.bf16.xpose.msrb.mxu2 %v1235_v54  ;;  %v1295_v54 = vsel %vm1080_vm0, %v864_v50, 0  ;;  %v461_v50 = vld [vmem:[%s4861_s18 + $0x590] sm:$0xff] }
  0x93   : > { %1987 = vmatpush.bf16.xpose.msrb.mxu3 %v1259_v59  ;;  %v420_v59 = vld [vmem:[%s4861_s18 + $0x448] sm:$0xff]  ;;  %v1367_v61 = vsel %vm1080_vm0, %v888_v53, 0  ;;  %v868_v53 = vpack.c.bf16 %v430_v47, %v429_v45  ;;  %v485_v45 = vld [vmem:[%s4861_s18 + $0x650] sm:$0xff] }
  0x94   : > { %v863_v3 = vpack.c.bf16 %v420_v59, %v419_v57  ;;  %v411_v57 = vld [vmem:[%s4861_s18 + $0x400] sm:$0xff]  ;;  %v412_v59 = vld [vmem:[%s4861_s18 + $0x408] sm:$0xff]  ;;  %v501_v47 = vld [vmem:[%s4861_s18 + $0x6d0] sm:$0xff] }
  0x95   : > { %v1307_v60 = vsel %vm1080_vm0, %v868_v53, 0  ;;  %v534_v53 = vld [vmem:[%s4861_s18 + $0x7d8] sm:$0xff] }
  0x96   : > { %v1292_v7 = vsel %vm1080_vm0, %v863_v3, 0  ;;  %v459_v3 = vld [vmem:[%s4861_s18 + $0x580] sm:$0xff] }
  0x98   : > { %1934 = vmatpush.bf16.xpose.msrb.mxu0 %v1184_v14  ;;  %v434_v14 = vld [vmem:[%s4861_s18 + $0x4b8] sm:$0xff] }
  0x99   : > { %1952 = vmatpush.bf16.xpose.msrb.mxu1 %v1208_v16  ;;  %v450_v16 = vld [vmem:[%s4861_s18 + $0x538] sm:$0xff] }
  0x9a   : > { %1970 = vmatpush.bf16.xpose.msrb.mxu2 %v1232_v17  ;;  %v465_v17 = vld [vmem:[%s4861_s18 + $0x5b0] sm:$0xff] }
  0x9b   : > { %1988 = vmatpush.bf16.xpose.msrb.mxu3 %v1256_v18  ;;  %v466_v18 = vld [vmem:[%s4861_s18 + $0x5b8] sm:$0xff] }
  0x9c   : > { %v886_v22 = vpack.c.bf16 %v466_v18, %v465_v17  ;;  %v898_v17 = vpack.c.bf16 %v490_v6, %v489_v5  ;;  %v531_v5 = vld [vmem:[%s4861_s18 + $0x7c0] sm:$0xff]  ;;  %v532_v6 = vld [vmem:[%s4861_s18 + $0x7c8] sm:$0xff] }
  0x9e   : > { %v1361_v29 = vsel %vm1080_vm0, %v886_v22, 0 }
  0x9f   : > { %4398 = vmatmul.msk.bf16.vlgmr.msrb.gmra.mxu0 %vm1080_vm0, %v5006_v58 }
  0xa0   : > { %1999 = vmatpush.bf16.xpose.msra.mxu0 %v1301_v19  ;;  %4400 = vmatmul.msk.bf16.vlgmr.msrb.gmra.mxu1 %vm1080_vm0, %v5006_v58  ;;  %v862_v19 = vpack.c.bf16 %v418_v11, %v417_v10  ;;  %v521_v10 = vld [vmem:[%s4861_s18 + $0x770] sm:$0xff]  ;;  %v522_v11 = vld [vmem:[%s4861_s18 + $0x778] sm:$0xff] }
  0xa1   : > { %2017 = vmatpush.bf16.xpose.msra.mxu1 %v1325_v20  ;;  %4402 = vmatmul.msk.bf16.vlgmr.msrb.gmra.mxu2 %vm1080_vm0, %v5006_v58  ;;  %v870_v20 = vpack.c.bf16 %v434_v14, %v433_v12  ;;  %v867_v12 = vpack.c.bf16 %v428_v63, %v427_v62  ;;  %v537_v14 = vld [vmem:[%s4861_s18 + $0x7f0] sm:$0xff]  ;;  %v483_v62 = vld [vmem:[%s4861_s18 + $0x640] sm:$0xff]  ;;  %v484_v63 = vld [vmem:[%s4861_s18 + $0x648] sm:$0xff] }
  0xa2   : > { %2035 = vmatpush.bf16.xpose.msra.mxu2 %v1349_v21  ;;  %4404 = vmatmul.msk.bf16.vlgmr.msrb.gmra.mxu3 %vm1080_vm0, %v5006_v58  ;;  %v878_v21 = vpack.c.bf16 %v450_v16, %v449_v15  ;;  %v1289_v23 = vsel %vm1080_vm0, %v862_v19, 0  ;;  %v538_v15 = vld [vmem:[%s4861_s18 + $0x7f8] sm:$0xff]  ;;  %v883_v16 = vpack.c.bf16 %v460_v4, %v459_v3  ;;  %v914_v19 = vpack.c.bf16 %v522_v11, %v521_v10  ;;  %v515_v3 = vld [vmem:[%s4861_s18 + $0x740] sm:$0xff]  ;;  %v516_v4 = vld [vmem:[%s4861_s18 + $0x748] sm:$0xff] }
  0xa3   : > { %2053 = vmatpush.bf16.xpose.msra.mxu3 %v1373_v25  ;;  %v1313_v24 = vsel %vm1080_vm0, %v870_v20, 0  ;;  %v1304_v22 = vsel %vm1080_vm0, %v867_v12, 0  ;;  %v919_v10 = vpack.c.bf16 %v532_v6, %v531_v5  ;;  %v508_v6 = vld [vmem:[%s4861_s18 + $0x708] sm:$0xff] }
  0xa4   : > { %v1337_v25 = vsel %vm1080_vm0, %v878_v21, 0  ;;  %v922_v21 = vpack.c.bf16 %v538_v15, %v537_v14  ;;  %v1445_v27 = vsel %vm1080_vm0, %v914_v19, 0  ;;  %v481_v14 = vld [vmem:[%s4861_s18 + $0x630] sm:$0xff]  ;;  %v482_v15 = vld [vmem:[%s4861_s18 + $0x638] sm:$0xff] }
  0xa5   : > { %v513_v19 = vld [vmem:[%s4861_s18 + $0x730] sm:$0xff] }
  0xa8   : > { %2000 = vmatpush.bf16.xpose.msra.mxu0 %v1298_v38  ;;  %v877_v38 = vpack.c.bf16 %v448_v32, %v447_v31  ;;  %v1469_v31 = vsel %vm1080_vm0, %v922_v21, 0  ;;  %v504_v32 = vld [vmem:[%s4861_s18 + $0x6e8] sm:$0xff]  ;;  %v529_v21 = vld [vmem:[%s4861_s18 + $0x7b0] sm:$0xff] }
  0xa9   : > { %2018 = vmatpush.bf16.xpose.msra.mxu1 %v1322_v39  ;;  %v885_v39 = vpack.c.bf16 %v464_v34, %v463_v33  ;;  %v519_v33 = vld [vmem:[%s4861_s18 + $0x760] sm:$0xff]  ;;  %v520_v34 = vld [vmem:[%s4861_s18 + $0x768] sm:$0xff] }
  0xaa   : > { %2036 = vmatpush.bf16.xpose.msra.mxu2 %v1346_v40  ;;  %v1286_v40 = vsel %vm1080_vm0, %v861_v35, 0  ;;  %v1334_v42 = vsel %vm1080_vm0, %v877_v38, 0  ;;  %v535_v35 = vld [vmem:[%s4861_s18 + $0x7e0] sm:$0xff] }
  0xab   : > { %2054 = vmatpush.bf16.xpose.msra.mxu3 %v1370_v44  ;;  %v414_v44 = vld [vmem:[%s4861_s18 + $0x418] sm:$0xff]  ;;  %v1358_v46 = vsel %vm1080_vm0, %v885_v39, 0  ;;  %v905_v39 = vpack.c.bf16 %v504_v32, %v503_v30  ;;  %v479_v30 = vld [vmem:[%s4861_s18 + $0x620] sm:$0xff] }
  0xac   : > { %v860_v52 = vpack.c.bf16 %v414_v44, %v413_v43  ;;  %v495_v32 = vld [vmem:[%s4861_s18 + $0x6a0] sm:$0xff] }
  0xad   : > { %v1418_v43 = vsel %vm1080_vm0, %v905_v39, 0  ;;  %v528_v39 = vld [vmem:[%s4861_s18 + $0x7a8] sm:$0xff] }
  0xaf   : > { %4399 = vmatmul.msk.bf16.gmra.mxu0 %vm1080_vm0, %v5100_v37 }
  0xb0   : > { %2001 = vmatpush.bf16.xpose.msra.mxu0 %v1295_v54  ;;  %4401 = vmatmul.msk.bf16.gmra.mxu1 %vm1080_vm0, %v5100_v37  ;;  %v876_v54 = vpack.c.bf16 %v446_v49, %v445_v48  ;;  %v502_v49 = vld [vmem:[%s4861_s18 + $0x6d8] sm:$0xff] }
  0xb1   : > { %2019 = vmatpush.bf16.xpose.msra.mxu1 %v1319_v55  ;;  %4403 = vmatmul.msk.bf16.gmra.mxu2 %vm1080_vm0, %v5100_v37  ;;  %v884_v55 = vpack.c.bf16 %v462_v51, %v461_v50  ;;  %v517_v50 = vld [vmem:[%s4861_s18 + $0x750] sm:$0xff]  ;;  %v518_v51 = vld [vmem:[%s4861_s18 + $0x758] sm:$0xff] }
  0xb2   : > { %2037 = vmatpush.bf16.xpose.msra.mxu2 %v1343_v56  ;;  %4405 = vmatmul.msk.bf16.gmra.mxu3 %vm1080_vm0, %v5100_v37  ;;  %v1283_v56 = vsel %vm1080_vm0, %v860_v52, 0  ;;  %v533_v52 = vld [vmem:[%s4861_s18 + $0x7d0] sm:$0xff] }
  0xb3   : > { %2055 = vmatpush.bf16.xpose.msra.mxu3 %v1367_v61  ;;  %v1331_v61 = vsel %vm1080_vm0, %v876_v54, 0  ;;  %v1355_v1 = vsel %vm1080_vm0, %v884_v55, 0  ;;  %v904_v55 = vpack.c.bf16 %v502_v49, %v501_v47  ;;  %v477_v47 = vld [vmem:[%s4861_s18 + $0x610] sm:$0xff] }
  0xb4   : > { %v493_v49 = vld [vmem:[%s4861_s18 + $0x690] sm:$0xff] }
  0xb8   : > { %2002 = vmatpush.bf16.xpose.msra.mxu0 %v1292_v7  ;;  %v505_v7 = vld [vmem:[%s4861_s18 + $0x6f0] sm:$0xff] }
  0xb9   : > { %2020 = vmatpush.bf16.xpose.msra.mxu1 %v1316_v8  ;;  %v859_v8 = vpack.c.bf16 %v412_v59, %v411_v57  ;;  %v920_v57 = vpack.c.bf16 %v534_v53, %v533_v52  ;;  %v509_v52 = vld [vmem:[%s4861_s18 + $0x710] sm:$0xff]  ;;  %v510_v53 = vld [vmem:[%s4861_s18 + $0x718] sm:$0xff] }
  0xba   : > { %2038 = vmatpush.bf16.xpose.msra.mxu2 %v1340_v9  ;;  %v506_v9 = vld [vmem:[%s4861_s18 + $0x6f8] sm:$0xff] }
  0xbb   : > { %2056 = vmatpush.bf16.xpose.msra.mxu3 %v1364_v13  ;;  %v875_v13 = vpack.c.bf16 %v444_v2, %v443_v0  ;;  %v906_v18 = vpack.c.bf16 %v506_v9, %v505_v7  ;;  %v1280_v20 = vsel %vm1080_vm0, %v859_v8, 0  ;;  %v499_v0 = vld [vmem:[%s4861_s18 + $0x6c0] sm:$0xff]  ;;  %v500_v2 = vld [vmem:[%s4861_s18 + $0x6c8] sm:$0xff]  ;;  %v895_v7 = vpack.c.bf16 %v484_v63, %v483_v62 }
  0xbc   : > { %v903_v8 = vpack.c.bf16 %v500_v2, %v499_v0  ;;  %v911_v9 = vpack.c.bf16 %v516_v4, %v515_v3  ;;  %v475_v62 = vld [vmem:[%s4861_s18 + $0x600] sm:$0xff]  ;;  %v476_v63 = vld [vmem:[%s4861_s18 + $0x608] sm:$0xff] }
  0xbd   : > { %v1421_v26 = vsel %vm1080_vm0, %v906_v18, 0  ;;  %v1388_v11 = vsel %vm1080_vm0, %v895_v7, 0  ;;  %v498_v18 = vld [vmem:[%s4861_s18 + $0x6b8] sm:$0xff]  ;;  %v491_v2 = vld [vmem:[%s4861_s18 + $0x680] sm:$0xff]  ;;  %v492_v3 = vld [vmem:[%s4861_s18 + $0x688] sm:$0xff] }
  0xbe   : > { %v1412_v12 = vsel %vm1080_vm0, %v903_v8, 0  ;;  %v507_v4 = vld [vmem:[%s4861_s18 + $0x700] sm:$0xff]  ;;  %v524_v8 = vld [vmem:[%s4861_s18 + $0x788] sm:$0xff] }
  0xbf   : > { %v523_v7 = vld [vmem:[%s4861_s18 + $0x780] sm:$0xff] }
  0xc0   : > { %2003 = vmatpush.bf16.xpose.msra.mxu0 %v1289_v23  ;;  %v1328_v23 = vsel %vm1080_vm0, %v875_v13, 0  ;;  %v1436_v13 = vsel %vm1080_vm0, %v911_v9, 0  ;;  %v553_v9 = vld [vmem:[%s4861_s18 + $0x870] sm:$0xff] }
  0xc1   : > { %2021 = vmatpush.bf16.xpose.msra.mxu1 %v1313_v24  ;;  %v1352_v24 = vsel %vm1080_vm0, %v883_v16, 0  ;;  %v497_v16 = vld [vmem:[%s4861_s18 + $0x6b0] sm:$0xff] }
  0xc2   : > { %2039 = vmatpush.bf16.xpose.msra.mxu2 %v1337_v25  ;;  %v1397_v25 = vsel %vm1080_vm0, %v898_v17, 0  ;;  %v1460_v17 = vsel %vm1080_vm0, %v919_v10, 0  ;;  %v554_v10 = vld [vmem:[%s4861_s18 + $0x878] sm:$0xff] }
  0xc3   : > { %2057 = vmatpush.bf16.xpose.msra.mxu3 %v1361_v29  ;;  %v488_v29 = vld [vmem:[%s4861_s18 + $0x668] sm:$0xff] }
  0xc4   : > { %v897_v38 = vpack.c.bf16 %v488_v29, %v487_v28 }
  0xc8   : > { %2004 = vmatpush.bf16.xpose.msra.mxu0 %v1286_v40  ;;  %v913_v40 = vpack.c.bf16 %v520_v34, %v519_v33  ;;  %v496_v34 = vld [vmem:[%s4861_s18 + $0x6a8] sm:$0xff] }
  0xc9   : > { %2022 = vmatpush.bf16.xpose.msra.mxu1 %v1310_v41  ;;  %v921_v41 = vpack.c.bf16 %v536_v36, %v535_v35  ;;  %v511_v35 = vld [vmem:[%s4861_s18 + $0x720] sm:$0xff]  ;;  %v512_v36 = vld [vmem:[%s4861_s18 + $0x728] sm:$0xff] }
  0xca   : > { %2040 = vmatpush.bf16.xpose.msra.mxu2 %v1334_v42  ;;  %v1394_v42 = vsel %vm1080_vm0, %v897_v38, 0  ;;  %v1442_v44 = vsel %vm1080_vm0, %v913_v40, 0  ;;  %v527_v38 = vld [vmem:[%s4861_s18 + $0x7a0] sm:$0xff] }
  0xcb   : > { %2058 = vmatpush.bf16.xpose.msra.mxu3 %v1358_v46  ;;  %v486_v46 = vld [vmem:[%s4861_s18 + $0x658] sm:$0xff]  ;;  %v1466_v48 = vsel %vm1080_vm0, %v921_v41, 0  ;;  %v901_v41 = vpack.c.bf16 %v496_v34, %v495_v32  ;;  %v551_v32 = vld [vmem:[%s4861_s18 + $0x860] sm:$0xff] }
  0xcc   : > { %v896_v54 = vpack.c.bf16 %v486_v46, %v485_v45  ;;  %v567_v34 = vld [vmem:[%s4861_s18 + $0x8e0] sm:$0xff] }
  0xcd   : > { %v1406_v45 = vsel %vm1080_vm0, %v901_v41, 0  ;;  %v600_v41 = vld [vmem:[%s4861_s18 + $0x9e8] sm:$0xff] }
  0xce   : > { %v1391_v59 = vsel %vm1080_vm0, %v896_v54, 0  ;;  %v525_v54 = vld [vmem:[%s4861_s18 + $0x790] sm:$0xff] }
  0xd0   : > { %2005 = vmatpush.bf16.xpose.msra.mxu0 %v1283_v56  ;;  %v912_v56 = vpack.c.bf16 %v518_v51, %v517_v50  ;;  %v494_v51 = vld [vmem:[%s4861_s18 + $0x698] sm:$0xff] }
  0xd1   : > { %2023 = vmatpush.bf16.xpose.msra.mxu1 %v1307_v60  ;;  %v1415_v60 = vsel %vm1080_vm0, %v904_v55, 0  ;;  %v526_v55 = vld [vmem:[%s4861_s18 + $0x798] sm:$0xff] }
  0xd2   : > { %2041 = vmatpush.bf16.xpose.msra.mxu2 %v1331_v61  ;;  %v1439_v61 = vsel %vm1080_vm0, %v912_v56, 0 }
  0xd3   : > { %2059 = vmatpush.bf16.xpose.msra.mxu3 %v1355_v1  ;;  %v1463_v1 = vsel %vm1080_vm0, %v920_v57, 0  ;;  %v900_v57 = vpack.c.bf16 %v494_v51, %v493_v49 }
  0xd5   : > { %v1403_v0 = vsel %vm1080_vm0, %v900_v57, 0  ;;  %v566_v57 = vld [vmem:[%s4861_s18 + $0x8d8] sm:$0xff] }
  0xd8   : > { %2006 = vmatpush.bf16.xpose.msra.mxu0 %v1280_v20  ;;  %v514_v20 = vld [vmem:[%s4861_s18 + $0x738] sm:$0xff] }
  0xd9   : > { %2024 = vmatpush.bf16.xpose.msra.mxu1 %v1304_v22  ;;  %v530_v22 = vld [vmem:[%s4861_s18 + $0x7b8] sm:$0xff] }
  0xda   : > { %2042 = vmatpush.bf16.xpose.msra.mxu2 %v1328_v23  ;;  %v894_v23 = vpack.c.bf16 %v482_v15, %v481_v14  ;;  %v585_v14 = vld [vmem:[%s4861_s18 + $0x970] sm:$0xff]  ;;  %v586_v15 = vld [vmem:[%s4861_s18 + $0x978] sm:$0xff] }
  0xdb   : > { %2060 = vmatpush.bf16.xpose.msra.mxu3 %v1352_v24  ;;  %v902_v24 = vpack.c.bf16 %v498_v18, %v497_v16  ;;  %v899_v16 = vpack.c.bf16 %v492_v3, %v491_v2  ;;  %v601_v18 = vld [vmem:[%s4861_s18 + $0x9f0] sm:$0xff] }
  0xdd   : > { %v1409_v28 = vsel %vm1080_vm0, %v902_v24, 0 }
  0xdf   : > { %4406 = vmatmul.msk.bf16.vlgmr.msra.gmra.mxu0 %vm1080_vm0, %v5006_v58 }
  0xe0   : > { %2071 = vmatpush.bf16.xpose.msrb.mxu0 %v1397_v25  ;;  %4408 = vmatmul.msk.bf16.vlgmr.msra.gmra.mxu1 %vm1080_vm0, %v5006_v58  ;;  %v910_v25 = vpack.c.bf16 %v514_v20, %v513_v19  ;;  %v602_v19 = vld [vmem:[%s4861_s18 + $0x9f8] sm:$0xff]  ;;  %v915_v20 = vpack.c.bf16 %v524_v8, %v523_v7 }
  0xe1   : > { %2089 = vmatpush.bf16.xpose.msrb.mxu1 %v1421_v26  ;;  %4410 = vmatmul.msk.bf16.vlgmr.msra.gmra.mxu2 %vm1080_vm0, %v5006_v58  ;;  %v918_v26 = vpack.c.bf16 %v530_v22, %v529_v21  ;;  %v930_v21 = vpack.c.bf16 %v554_v10, %v553_v9  ;;  %v547_v9 = vld [vmem:[%s4861_s18 + $0x840] sm:$0xff]  ;;  %v548_v10 = vld [vmem:[%s4861_s18 + $0x848] sm:$0xff] }
  0xe2   : > { %2107 = vmatpush.bf16.xpose.msrb.mxu2 %v1445_v27  ;;  %4412 = vmatmul.msk.bf16.vlgmr.msra.gmra.mxu3 %vm1080_vm0, %v5006_v58  ;;  %v1385_v27 = vsel %vm1080_vm0, %v894_v23, 0  ;;  %v1433_v29 = vsel %vm1080_vm0, %v910_v25, 0  ;;  %v946_v23 = vpack.c.bf16 %v586_v15, %v585_v14  ;;  %v954_v25 = vpack.c.bf16 %v602_v19, %v601_v18  ;;  %v579_v14 = vld [vmem:[%s4861_s18 + $0x940] sm:$0xff]  ;;  %v580_v15 = vld [vmem:[%s4861_s18 + $0x948] sm:$0xff] }
  0xe3   : > { %2125 = vmatpush.bf16.xpose.msrb.mxu3 %v1469_v31  ;;  %v480_v31 = vld [vmem:[%s4861_s18 + $0x628] sm:$0xff]  ;;  %v1457_v33 = vsel %vm1080_vm0, %v918_v26, 0  ;;  %v1400_v26 = vsel %vm1080_vm0, %v899_v16, 0  ;;  %v595_v16 = vld [vmem:[%s4861_s18 + $0x9c0] sm:$0xff]  ;;  %v927_v18 = vpack.c.bf16 %v548_v10, %v547_v9  ;;  %v541_v10 = vld [vmem:[%s4861_s18 + $0x810] sm:$0xff] }
  0xe4   : > { %v893_v40 = vpack.c.bf16 %v480_v31, %v479_v30  ;;  %v1541_v31 = vsel %vm1080_vm0, %v946_v23, 0 }
  0xe8   : > { %2072 = vmatpush.bf16.xpose.msrb.mxu0 %v1394_v42  ;;  %v909_v42 = vpack.c.bf16 %v512_v36, %v511_v35  ;;  %v1565_v35 = vsel %vm1080_vm0, %v954_v25, 0  ;;  %v568_v36 = vld [vmem:[%s4861_s18 + $0x8e8] sm:$0xff] }
  0xe9   : > { %2090 = vmatpush.bf16.xpose.msrb.mxu1 %v1418_v43  ;;  %v917_v43 = vpack.c.bf16 %v528_v39, %v527_v38  ;;  %v583_v38 = vld [vmem:[%s4861_s18 + $0x960] sm:$0xff]  ;;  %v584_v39 = vld [vmem:[%s4861_s18 + $0x968] sm:$0xff] }
  0xea   : > { %2108 = vmatpush.bf16.xpose.msrb.mxu2 %v1442_v44  ;;  %v1382_v44 = vsel %vm1080_vm0, %v893_v40, 0  ;;  %v1430_v46 = vsel %vm1080_vm0, %v909_v42, 0  ;;  %v599_v40 = vld [vmem:[%s4861_s18 + $0x9e0] sm:$0xff]  ;;  %v5334_v42 = vpop.f32.mrf.mxu0 }
  0xeb   : > { %2126 = vmatpush.bf16.xpose.msrb.mxu3 %v1466_v48  ;;  %v478_v48 = vld [vmem:[%s4861_s18 + $0x618] sm:$0xff]  ;;  %v1454_v50 = vsel %vm1080_vm0, %v917_v43, 0  ;;  %v5336_v43 = vpop.f32.mrf.mxu1  ;;  %v953_v49 = vpack.c.bf16 %v600_v41, %v599_v40 }
  0xec   : > { %v892_v56 = vpack.c.bf16 %v478_v48, %v477_v47  ;;  %v5338_v47 = vpop.f32.mrf.mxu2  ;;  %v5340_v48 = vpop.f32.mrf.mxu3 }
  0xef   : > { %4407 = vmatmul.msk.bf16.gmra.mxu0 %vm1080_vm0, %v5100_v37 }
  0xf0   : > { %2073 = vmatpush.bf16.xpose.msrb.mxu0 %v1391_v59  ;;  %4409 = vmatmul.msk.bf16.gmra.mxu1 %vm1080_vm0, %v5100_v37  ;;  %v908_v59 = vpack.c.bf16 %v510_v53, %v509_v52  ;;  %v549_v53 = vld [vmem:[%s4861_s18 + $0x850] sm:$0xff] }
  0xf1   : > { %2091 = vmatpush.bf16.xpose.msrb.mxu1 %v1415_v60  ;;  %4411 = vmatmul.msk.bf16.gmra.mxu2 %vm1080_vm0, %v5100_v37  ;;  %v916_v60 = vpack.c.bf16 %v526_v55, %v525_v54  ;;  %v550_v54 = vld [vmem:[%s4861_s18 + $0x858] sm:$0xff]  ;;  %v565_v55 = vld [vmem:[%s4861_s18 + $0x8d0] sm:$0xff] }
  0xf2   : > { %2109 = vmatpush.bf16.xpose.msrb.mxu2 %v1439_v61  ;;  %4413 = vmatmul.msk.bf16.gmra.mxu3 %vm1080_vm0, %v5100_v37  ;;  %v1379_v61 = vsel %vm1080_vm0, %v892_v56, 0  ;;  %v1562_v56 = vsel %vm1080_vm0, %v953_v49, 0  ;;  %v5362_v2 = vpop.f32.mrf.mxu0 }
  0xf3   : > { %2127 = vmatpush.bf16.xpose.msrb.mxu3 %v1463_v1  ;;  %v1427_v1 = vsel %vm1080_vm0, %v908_v59, 0  ;;  %v1451_v5 = vsel %vm1080_vm0, %v916_v60, 0  ;;  %v581_v59 = vld [vmem:[%s4861_s18 + $0x950] sm:$0xff]  ;;  %v582_v60 = vld [vmem:[%s4861_s18 + $0x958] sm:$0xff]  ;;  %v5364_v3 = vpop.f32.mrf.mxu1 }
  0xf8   : > { %2074 = vmatpush.bf16.xpose.msrb.mxu0 %v1388_v11  ;;  %v569_v11 = vld [vmem:[%s4861_s18 + $0x8f0] sm:$0xff] }
  0xf9   : > { %2092 = vmatpush.bf16.xpose.msrb.mxu1 %v1412_v12  ;;  %v891_v12 = vpack.c.bf16 %v476_v63, %v475_v62  ;;  %v598_v62 = vld [vmem:[%s4861_s18 + $0x9d8] sm:$0xff]  ;;  %v928_v63 = vpack.c.bf16 %v550_v54, %v549_v53  ;;  %v543_v54 = vld [vmem:[%s4861_s18 + $0x820] sm:$0xff] }
  0xfa   : > { %2110 = vmatpush.bf16.xpose.msrb.mxu2 %v1436_v13  ;;  %v570_v13 = vld [vmem:[%s4861_s18 + $0x8f8] sm:$0xff] }
  0xfb   : > { %2128 = vmatpush.bf16.xpose.msrb.mxu3 %v1460_v17  ;;  %v907_v17 = vpack.c.bf16 %v508_v6, %v507_v4  ;;  %v938_v22 = vpack.c.bf16 %v570_v13, %v569_v11  ;;  %v1376_v24 = vsel %vm1080_vm0, %v891_v12, 0  ;;  %v5366_v4 = vpop.f32.mrf.mxu2  ;;  %v1487_v6 = vsel %vm1080_vm0, %v928_v63, 0  ;;  %v563_v11 = vld [vmem:[%s4861_s18 + $0x8c0] sm:$0xff]  ;;  %v564_v13 = vld [vmem:[%s4861_s18 + $0x8c8] sm:$0xff] }
  0xfc   : > { %v935_v19 = vpack.c.bf16 %v564_v13, %v563_v11  ;;  %v592_v63 = vld [vmem:[%s4861_s18 + $0x9a8] sm:$0xff]  ;;  %v542_v11 = vld [vmem:[%s4861_s18 + $0x818] sm:$0xff] }
  0xfd   : > { %v1517_v30 = vsel %vm1080_vm0, %v938_v22, 0 }
 0x100   : > { %2075 = vmatpush.bf16.xpose.msrb.mxu0 %v1385_v27  ;;  %v1424_v27 = vsel %vm1080_vm0, %v907_v17, 0  ;;  %v596_v17 = vld [vmem:[%s4861_s18 + $0x9c8] sm:$0xff] }
 0x101   : > { %2093 = vmatpush.bf16.xpose.msrb.mxu1 %v1409_v28  ;;  %v1448_v28 = vsel %vm1080_vm0, %v915_v20, 0  ;;  %v943_v20 = vpack.c.bf16 %v580_v15, %v579_v14  ;;  %v951_v23 = vpack.c.bf16 %v596_v17, %v595_v16  ;;  %v558_v14 = vld [vmem:[%s4861_s18 + $0x898] sm:$0xff]  ;;  %v573_v15 = vld [vmem:[%s4861_s18 + $0x910] sm:$0xff] }
 0x102   : > { %2111 = vmatpush.bf16.xpose.msrb.mxu2 %v1433_v29  ;;  %v1493_v29 = vsel %vm1080_vm0, %v930_v21, 0  ;;  %v574_v16 = vld [vmem:[%s4861_s18 + $0x918] sm:$0xff]  ;;  %v589_v17 = vld [vmem:[%s4861_s18 + $0x990] sm:$0xff] }
 0x103   : > { %2129 = vmatpush.bf16.xpose.msrb.mxu3 %v1457_v33  ;;  %v552_v33 = vld [vmem:[%s4861_s18 + $0x868] sm:$0xff] }
 0x108   : > { %2076 = vmatpush.bf16.xpose.msrb.mxu0 %v1382_v44  ;;  %v929_v44 = vpack.c.bf16 %v552_v33, %v551_v32  ;;  %v1556_v32 = vsel %vm1080_vm0, %v951_v23, 0  ;;  %v562_v33 = vld [vmem:[%s4861_s18 + $0x8b8] sm:$0xff]  ;;  %v940_v23 = vpack.c.bf16 %v574_v16, %v573_v15  ;;  %v664_v15 = vld [vmem:[%s4861_s18 + $0xbe8] sm:$0xff] }
 0x109   : > { %2094 = vmatpush.bf16.xpose.msrb.mxu1 %v1406_v45  ;;  %v937_v45 = vpack.c.bf16 %v568_v36, %v567_v34  ;;  %v577_v34 = vld [vmem:[%s4861_s18 + $0x930] sm:$0xff] }
 0x10a   : > { %2112 = vmatpush.bf16.xpose.msrb.mxu2 %v1430_v46  ;;  %v945_v46 = vpack.c.bf16 %v584_v39, %v583_v38  ;;  %v593_v36 = vld [vmem:[%s4861_s18 + $0x9b0] sm:$0xff]  ;;  %v594_v38 = vld [vmem:[%s4861_s18 + $0x9b8] sm:$0xff] }
 0x10b   : > { %2130 = vmatpush.bf16.xpose.msrb.mxu3 %v1454_v50  ;;  %v1490_v50 = vsel %vm1080_vm0, %v929_v44, 0  ;;  %v1514_v51 = vsel %vm1080_vm0, %v937_v45, 0  ;;  %v5382_v21 = vpop.f32.mrf.mxu0  ;;  %v5384_v22 = vpop.f32.mrf.mxu1 }
 0x10c   : > { %v1538_v52 = vsel %vm1080_vm0, %v945_v46, 0  ;;  %v950_v46 = vpack.c.bf16 %v594_v38, %v593_v36  ;;  %v572_v36 = vld [vmem:[%s4861_s18 + $0x908] sm:$0xff]  ;;  %v587_v38 = vld [vmem:[%s4861_s18 + $0x980] sm:$0xff] }
 0x110   : > { %2077 = vmatpush.bf16.xpose.msrb.mxu0 %v1379_v61  ;;  %v597_v61 = vld [vmem:[%s4861_s18 + $0x9d0] sm:$0xff] }
 0x111   : > { %2095 = vmatpush.bf16.xpose.msrb.mxu1 %v1403_v0  ;;  %v936_v0 = vpack.c.bf16 %v566_v57, %v565_v55  ;;  %v544_v55 = vld [vmem:[%s4861_s18 + $0x828] sm:$0xff]  ;;  %v1553_v57 = vsel %vm1080_vm0, %v950_v46, 0  ;;  %v634_v46 = vld [vmem:[%s4861_s18 + $0xaf8] sm:$0xff] }
 0x112   : > { %2113 = vmatpush.bf16.xpose.msrb.mxu2 %v1427_v1  ;;  %v944_v1 = vpack.c.bf16 %v582_v60, %v581_v59  ;;  %v560_v59 = vld [vmem:[%s4861_s18 + $0x8a8] sm:$0xff]  ;;  %v575_v60 = vld [vmem:[%s4861_s18 + $0x920] sm:$0xff] }
 0x113   : > { %2131 = vmatpush.bf16.xpose.msrb.mxu3 %v1451_v5  ;;  %v5368_v5 = vpop.f32.mrf.mxu3  ;;  %v1511_v7 = vsel %vm1080_vm0, %v936_v0, 0  ;;  %v1871_v44 = vpop.f32.mrf.mxu0  ;;  %v925_v0 = vpack.c.bf16 %v544_v55, %v543_v54  ;;  %v666_v54 = vld [vmem:[%s4861_s18 + $0xbf8] sm:$0xff] }
 0x114   : > { %v1535_v8 = vsel %vm1080_vm0, %v944_v1, 0  ;;  %v1889_v45 = vpop.f32.mrf.mxu1  ;;  %v633_v44 = vld [vmem:[%s4861_s18 + $0xaf0] sm:$0xff] }
 0x118   : > { %2078 = vmatpush.bf16.xpose.msrb.mxu0 %v1376_v24  ;;  %v5386_v24 = vpop.f32.mrf.mxu2 }
 0x119   : > { %2096 = vmatpush.bf16.xpose.msrb.mxu1 %v1400_v26  ;;  %v1484_v26 = vsel %vm1080_vm0, %v927_v18, 0  ;;  %v590_v18 = vld [vmem:[%s4861_s18 + $0x998] sm:$0xff] }
 0x11a   : > { %2114 = vmatpush.bf16.xpose.msrb.mxu2 %v1424_v27  ;;  %v1508_v27 = vsel %vm1080_vm0, %v935_v19, 0  ;;  %v924_v19 = vpack.c.bf16 %v542_v11, %v541_v10  ;;  %v632_v11 = vld [vmem:[%s4861_s18 + $0xae8] sm:$0xff] }
 0x11b   : > { %2132 = vmatpush.bf16.xpose.msrb.mxu3 %v1448_v28  ;;  %v5388_v25 = vpop.f32.mrf.mxu3  ;;  %v1532_v28 = vsel %vm1080_vm0, %v943_v20, 0 }
 0x11f   : > { %4414 = vmatmul.msk.bf16.vlgmr.msrb.gmra.mxu0 %vm1080_vm0, %v5006_v58 }
 0x120   : > { %2143 = vmatpush.bf16.xpose.msra.mxu0 %v1493_v29  ;;  %4416 = vmatmul.msk.bf16.vlgmr.msrb.gmra.mxu1 %vm1080_vm0, %v5006_v58  ;;  %v545_v29 = vld [vmem:[%s4861_s18 + $0x830] sm:$0xff]  ;;  %v1907_v49 = vpop.f32.mrf.mxu2 }
 0x121   : > { %2161 = vmatpush.bf16.xpose.msra.mxu1 %v1517_v30  ;;  %4418 = vmatmul.msk.bf16.vlgmr.msrb.gmra.mxu2 %vm1080_vm0, %v5006_v58  ;;  %v546_v30 = vld [vmem:[%s4861_s18 + $0x838] sm:$0xff]  ;;  %v649_v49 = vld [vmem:[%s4861_s18 + $0xb70] sm:$0xff] }
 0x122   : > { %2179 = vmatpush.bf16.xpose.msra.mxu2 %v1541_v31  ;;  %4420 = vmatmul.msk.bf16.vlgmr.msrb.gmra.mxu3 %vm1080_vm0, %v5006_v58  ;;  %v952_v58 = vpack.c.bf16 %v598_v62, %v597_v61  ;;  %v561_v31 = vld [vmem:[%s4861_s18 + $0x8b0] sm:$0xff]  ;;  %v926_v39 = vpack.c.bf16 %v546_v30, %v545_v29  ;;  %v576_v61 = vld [vmem:[%s4861_s18 + $0x928] sm:$0xff]  ;;  %v591_v62 = vld [vmem:[%s4861_s18 + $0x9a0] sm:$0xff] }
 0x123   : > { %2197 = vmatpush.bf16.xpose.msra.mxu3 %v1565_v35  ;;  %v578_v35 = vld [vmem:[%s4861_s18 + $0x938] sm:$0xff]  ;;  %v934_v40 = vpack.c.bf16 %v562_v33, %v561_v31  ;;  %v540_v29 = vld [vmem:[%s4861_s18 + $0x808] sm:$0xff]  ;;  %v1523_v31 = vsel %vm1080_vm0, %v940_v23, 0 }
 0x124   : > { %v1559_v12 = vsel %vm1080_vm0, %v952_v58, 0  ;;  %v942_v41 = vpack.c.bf16 %v578_v35, %v577_v34  ;;  %v941_v58 = vpack.c.bf16 %v576_v61, %v575_v60  ;;  %v556_v33 = vld [vmem:[%s4861_s18 + $0x888] sm:$0xff]  ;;  %v571_v34 = vld [vmem:[%s4861_s18 + $0x900] sm:$0xff] }
 0x126   : > { %v1529_v53 = vsel %vm1080_vm0, %v942_v41, 0  ;;  %v1526_v9 = vsel %vm1080_vm0, %v941_v58, 0  ;;  %v618_v41 = vld [vmem:[%s4861_s18 + $0xa78] sm:$0xff] }
 0x128   : > { %2144 = vmatpush.bf16.xpose.msra.mxu0 %v1490_v50  ;;  %v1925_v50 = vpop.f32.mrf.mxu3  ;;  %v5470_v16 = vpop.f32.mrf.mxu2 }
 0x129   : > { %2162 = vmatpush.bf16.xpose.msra.mxu1 %v1514_v51  ;;  %v1481_v51 = vsel %vm1080_vm0, %v926_v39, 0  ;;  %v588_v39 = vld [vmem:[%s4861_s18 + $0x988] sm:$0xff]  ;;  %v650_v50 = vld [vmem:[%s4861_s18 + $0xb78] sm:$0xff] }
 0x12a   : > { %2180 = vmatpush.bf16.xpose.msra.mxu2 %v1538_v52  ;;  %v1505_v52 = vsel %vm1080_vm0, %v934_v40, 0  ;;  %v617_v40 = vld [vmem:[%s4861_s18 + $0xa70] sm:$0xff]  ;;  %v947_v55 = vpack.c.bf16 %v588_v39, %v587_v38  ;;  %v646_v39 = vld [vmem:[%s4861_s18 + $0xb58] sm:$0xff] }
 0x12b   : > { %2198 = vmatpush.bf16.xpose.msra.mxu3 %v1562_v56  ;;  %v559_v56 = vld [vmem:[%s4861_s18 + $0x8a0] sm:$0xff]  ;;  %v645_v38 = vld [vmem:[%s4861_s18 + $0xb50] sm:$0xff] }
 0x12c   : > { %v933_v1 = vpack.c.bf16 %v560_v59, %v559_v56  ;;  %v962_v56 = vpack.c.bf16 %v618_v41, %v617_v40  ;;  %v978_v59 = vpack.c.bf16 %v650_v50, %v649_v49  ;;  %v661_v40 = vld [vmem:[%s4861_s18 + $0xbd0] sm:$0xff]  ;;  %v662_v41 = vld [vmem:[%s4861_s18 + $0xbd8] sm:$0xff] }
 0x12f   : > { %4415 = vmatmul.msk.bf16.gmra.mxu0 %vm1080_vm0, %v5100_v37 }
 0x130   : > { %2145 = vmatpush.bf16.xpose.msra.mxu0 %v1487_v6  ;;  %4417 = vmatmul.msk.bf16.gmra.mxu1 %vm1080_vm0, %v5100_v37  ;;  %v949_v6 = vpack.c.bf16 %v592_v63, %v591_v62  ;;  %v5503_v49 = vpop.f32.mrf.mxu2 }
 0x131   : > { %2163 = vmatpush.bf16.xpose.msra.mxu1 %v1511_v7  ;;  %4419 = vmatmul.msk.bf16.gmra.mxu2 %vm1080_vm0, %v5100_v37  ;;  %v1478_v7 = vsel %vm1080_vm0, %v925_v0, 0  ;;  %v1544_v0 = vsel %vm1080_vm0, %v947_v55, 0 }
 0x132   : > { %2181 = vmatpush.bf16.xpose.msra.mxu2 %v1535_v8  ;;  %4421 = vmatmul.msk.bf16.gmra.mxu3 %vm1080_vm0, %v5100_v37  ;;  %v1502_v8 = vsel %vm1080_vm0, %v933_v1, 0  ;;  %v1550_v13 = vsel %vm1080_vm0, %v949_v6, 0  ;;  %v1589_v1 = vsel %vm1080_vm0, %v962_v56, 0  ;;  %v1637_v6 = vsel %vm1080_vm0, %v978_v59, 0  ;;  %v612_v59 = vld [vmem:[%s4861_s18 + $0xa48] sm:$0xff] }
 0x133   : > { %2199 = vmatpush.bf16.xpose.msra.mxu3 %v1559_v12  ;;  %v557_v12 = vld [vmem:[%s4861_s18 + $0x890] sm:$0xff] }
 0x134   : > { %v932_v20 = vpack.c.bf16 %v558_v14, %v557_v12  ;;  %v647_v12 = vld [vmem:[%s4861_s18 + $0xb60] sm:$0xff] }
 0x135   : > { %v663_v14 = vld [vmem:[%s4861_s18 + $0xbe0] sm:$0xff] }
 0x136   : > { %v1499_v30 = vsel %vm1080_vm0, %v932_v20, 0  ;;  %v5476_v20 = vpop.f32.mrf.mxu1 }
 0x138   : > { %2146 = vmatpush.bf16.xpose.msra.mxu0 %v1484_v26  ;;  %v948_v26 = vpack.c.bf16 %v590_v18, %v589_v17  ;;  %v5472_v17 = vpop.f32.mrf.mxu3 }
 0x139   : > { %2164 = vmatpush.bf16.xpose.msra.mxu1 %v1508_v27  ;;  %v1475_v27 = vsel %vm1080_vm0, %v924_v19, 0  ;;  %v5474_v19 = vpop.f32.mrf.mxu0 }
 0x13a   : > { %2182 = vmatpush.bf16.xpose.msra.mxu2 %v1532_v28  ;;  %v539_v28 = vld [vmem:[%s4861_s18 + $0x800] sm:$0xff]  ;;  %v1547_v35 = vsel %vm1080_vm0, %v948_v26, 0 }
 0x13b   : > { %2200 = vmatpush.bf16.xpose.msra.mxu3 %v1556_v32  ;;  %v555_v32 = vld [vmem:[%s4861_s18 + $0x880] sm:$0xff]  ;;  %v923_v45 = vpack.c.bf16 %v540_v29, %v539_v28 }
 0x13c   : > { %v5482_v29 = vld [vmem:[%s7254_s1] sm:$0xff] }
 0x13d   : > { %v1472_v60 = vsel %vm1080_vm0, %v923_v45, 0 }
 0x140   : > { %2147 = vmatpush.bf16.xpose.msra.mxu0 %v1481_v51  ;;  %v931_v51 = vpack.c.bf16 %v556_v33, %v555_v32  ;;  %v613_v32 = vld [vmem:[%s4861_s18 + $0xa50] sm:$0xff]  ;;  %v614_v33 = vld [vmem:[%s4861_s18 + $0xa58] sm:$0xff]  ;;  %v5505_v50 = vpop.f32.mrf.mxu3 }
 0x141   : > { %2165 = vmatpush.bf16.xpose.msra.mxu1 %v1505_v52  ;;  %v939_v52 = vpack.c.bf16 %v572_v36, %v571_v34  ;;  %v629_v34 = vld [vmem:[%s4861_s18 + $0xad0] sm:$0xff]  ;;  %v630_v36 = vld [vmem:[%s4861_s18 + $0xad8] sm:$0xff] }
 0x142   : > { %2183 = vmatpush.bf16.xpose.msra.mxu2 %v1529_v53  ;;  %v665_v53 = vld [vmem:[%s4861_s18 + $0xbf0] sm:$0xff]  ;;  %v1496_v62 = vsel %vm1080_vm0, %v931_v51, 0  ;;  %v968_v45 = vpack.c.bf16 %v630_v36, %v629_v34  ;;  %v984_v51 = vpack.c.bf16 %v662_v41, %v661_v40  ;;  %v658_v34 = vld [vmem:[%s4861_s18 + $0xbb8] sm:$0xff] }
 0x143   : > { %2201 = vmatpush.bf16.xpose.msra.mxu3 %v1553_v57  ;;  %v970_v57 = vpack.c.bf16 %v634_v46, %v633_v44  ;;  %v986_v61 = vpack.c.bf16 %v666_v54, %v665_v53  ;;  %v1520_v63 = vsel %vm1080_vm0, %v939_v52, 0  ;;  %v960_v44 = vpack.c.bf16 %v614_v33, %v613_v32  ;;  %v5507_v52 = vpop.f32.mrf.mxu0  ;;  %v5509_v53 = vpop.f32.mrf.mxu1  ;;  %v642_v32 = vld [vmem:[%s4861_s18 + $0xb38] sm:$0xff]  ;;  %v657_v33 = vld [vmem:[%s4861_s18 + $0xbb0] sm:$0xff] }
 0x144   : > { %v976_v46 = vpack.c.bf16 %v646_v39, %v645_v38  ;;  %v1607_v55 = vsel %vm1080_vm0, %v968_v45, 0  ;;  %v982_v41 = vpack.c.bf16 %v658_v34, %v657_v33 }
 0x145   : > { %v1613_v58 = vsel %vm1080_vm0, %v970_v57, 0  ;;  %v1661_v10 = vsel %vm1080_vm0, %v986_v61, 0  ;;  %v1583_v54 = vsel %vm1080_vm0, %v960_v44, 0  ;;  %v611_v57 = vld [vmem:[%s4861_s18 + $0xa40] sm:$0xff]  ;;  %v1655_v61 = vsel %vm1080_vm0, %v984_v51, 0 }
 0x146   : > { %v1631_v56 = vsel %vm1080_vm0, %v976_v46, 0 }
 0x148   : > { %2148 = vmatpush.bf16.xpose.msra.mxu0 %v1478_v7  ;;  %v615_v7 = vld [vmem:[%s4861_s18 + $0xa60] sm:$0xff] }
 0x149   : > { %2166 = vmatpush.bf16.xpose.msra.mxu1 %v1502_v8  ;;  %v616_v8 = vld [vmem:[%s4861_s18 + $0xa68] sm:$0xff] }
 0x14a   : > { %2184 = vmatpush.bf16.xpose.msra.mxu2 %v1526_v9  ;;  %v631_v9 = vld [vmem:[%s4861_s18 + $0xae0] sm:$0xff]  ;;  %v961_v18 = vpack.c.bf16 %v616_v8, %v615_v7 }
 0x14b   : > { %2202 = vmatpush.bf16.xpose.msra.mxu3 %v1550_v13  ;;  %v648_v13 = vld [vmem:[%s4861_s18 + $0xb68] sm:$0xff]  ;;  %v969_v23 = vpack.c.bf16 %v632_v11, %v631_v9  ;;  %v5523_v9 = vpop.f32.mrf.mxu2 }
 0x14c   : > { %v977_v26 = vpack.c.bf16 %v648_v13, %v647_v12  ;;  %v1586_v28 = vsel %vm1080_vm0, %v961_v18, 0  ;;  %v5527_v12 = vpop.f32.mrf.mxu0  ;;  %v5529_v13 = vpop.f32.mrf.mxu1 }
 0x150   : > { %2149 = vmatpush.bf16.xpose.msra.mxu0 %v1475_v27  ;;  %v985_v27 = vpack.c.bf16 %v664_v15, %v663_v14 }
 0x151   : > { %2167 = vmatpush.bf16.xpose.msra.mxu1 %v1499_v30  ;;  %v1610_v30 = vsel %vm1080_vm0, %v969_v23, 0  ;;  %v609_v23 = vld [vmem:[%s4861_s18 + $0xa30] sm:$0xff] }
 0x152   : > { %2185 = vmatpush.bf16.xpose.msra.mxu2 %v1523_v31  ;;  %v1634_v31 = vsel %vm1080_vm0, %v977_v26, 0  ;;  %v610_v26 = vld [vmem:[%s4861_s18 + $0xa38] sm:$0xff] }
 0x153   : > { %2203 = vmatpush.bf16.xpose.msra.mxu3 %v1547_v35  ;;  %v1658_v35 = vsel %vm1080_vm0, %v985_v27, 0  ;;  %v625_v27 = vld [vmem:[%s4861_s18 + $0xab0] sm:$0xff]  ;;  %v1979_v39 = vpop.f32.mrf.mxu2 }
 0x154   : > { %v1943_v44 = vpop.f32.mrf.mxu0  ;;  %v1961_v45 = vpop.f32.mrf.mxu1  ;;  %v603_v39 = vld [vmem:[%s4861_s18 + $0xa00] sm:$0xff] }
 0x155   : > { %v619_v45 = vld [vmem:[%s4861_s18 + $0xa80] sm:$0xff] }
 0x158   : > { %2150 = vmatpush.bf16.xpose.msra.mxu0 %v1472_v60  ;;  %v627_v60 = vld [vmem:[%s4861_s18 + $0xac0] sm:$0xff] }
 0x159   : > { %2168 = vmatpush.bf16.xpose.msra.mxu1 %v1496_v62  ;;  %v628_v62 = vld [vmem:[%s4861_s18 + $0xac8] sm:$0xff] }
 0x15a   : > { %2186 = vmatpush.bf16.xpose.msra.mxu2 %v1520_v63  ;;  %v643_v63 = vld [vmem:[%s4861_s18 + $0xb40] sm:$0xff]  ;;  %v967_v7 = vpack.c.bf16 %v628_v62, %v627_v60  ;;  %v624_v60 = vld [vmem:[%s4861_s18 + $0xaa8] sm:$0xff] }
 0x15b   : > { %2204 = vmatpush.bf16.xpose.msra.mxu3 %v1544_v0  ;;  %v644_v0 = vld [vmem:[%s4861_s18 + $0xb48] sm:$0xff] }
 0x15c   : > { %v975_v8 = vpack.c.bf16 %v644_v0, %v643_v63  ;;  %v1604_v15 = vsel %vm1080_vm0, %v967_v7, 0  ;;  %v640_v62 = vld [vmem:[%s4861_s18 + $0xb28] sm:$0xff]  ;;  %v655_v63 = vld [vmem:[%s4861_s18 + $0xba0] sm:$0xff] }
 0x15d   : > { %v656_v0 = vld [vmem:[%s4861_s18 + $0xba8] sm:$0xff] }
 0x15e   : > { %v1628_v18 = vsel %vm1080_vm0, %v975_v8, 0  ;;  %v981_v7 = vpack.c.bf16 %v656_v0, %v655_v63  ;;  %v698_v63 = vld [vmem:[%s4861_s18 + $0xcf8] sm:$0xff]  ;;  %v713_v0 = vld [vmem:[%s4861_s18 + $0xd70] sm:$0xff] }
 0x15f   : > { %4422 = vmatmul.msk.bf16.vlgmr.msra.gmra.mxu0 %vm1080_vm0, %v5482_v29 }
 0x160   : > { %2215 = vmatpush.bf16.xpose.msrb.mxu0 %v1589_v1  ;;  %4424 = vmatmul.msk.bf16.vlgmr.msra.gmra.mxu1 %vm1080_vm0, %v5482_v29  ;;  %v659_v1 = vld [vmem:[%s4861_s18 + $0xbc0] sm:$0xff] }
 0x161   : > { %2233 = vmatpush.bf16.xpose.msrb.mxu1 %v1613_v58  ;;  %4426 = vmatmul.msk.bf16.vlgmr.msra.gmra.mxu2 %vm1080_vm0, %v5482_v29  ;;  %v660_v58 = vld [vmem:[%s4861_s18 + $0xbc8] sm:$0xff] }
 0x162   : > { %2251 = vmatpush.bf16.xpose.msrb.mxu2 %v1637_v6  ;;  %4428 = vmatmul.msk.bf16.vlgmr.msra.gmra.mxu3 %vm1080_vm0, %v5482_v29  ;;  %v959_v6 = vpack.c.bf16 %v612_v59, %v611_v57  ;;  %v983_v11 = vpack.c.bf16 %v660_v58, %v659_v1  ;;  %v623_v57 = vld [vmem:[%s4861_s18 + $0xaa0] sm:$0xff]  ;;  %v1649_v59 = vsel %vm1080_vm0, %v982_v41, 0 }
 0x163   : > { %2269 = vmatpush.bf16.xpose.msrb.mxu3 %v1661_v10  ;;  %v5525_v10 = vpop.f32.mrf.mxu3  ;;  %v965_v58 = vpack.c.bf16 %v624_v60, %v623_v57  ;;  %v652_v57 = vld [vmem:[%s4861_s18 + $0xb88] sm:$0xff]  ;;  %v682_v60 = vld [vmem:[%s4861_s18 + $0xc78] sm:$0xff] }
 0x164   : > { %v1580_v14 = vsel %vm1080_vm0, %v959_v6, 0 }
 0x168   : > { %2216 = vmatpush.bf16.xpose.msrb.mxu0 %v1586_v28  ;;  %v1652_v28 = vsel %vm1080_vm0, %v983_v11, 0  ;;  %v1598_v11 = vsel %vm1080_vm0, %v965_v58, 0 }
 0x169   : > { %2234 = vmatpush.bf16.xpose.msrb.mxu1 %v1610_v30  ;;  %v626_v30 = vld [vmem:[%s4861_s18 + $0xab8] sm:$0xff] }
 0x16a   : > { %2252 = vmatpush.bf16.xpose.msrb.mxu2 %v1634_v31  ;;  %v641_v31 = vld [vmem:[%s4861_s18 + $0xb30] sm:$0xff]  ;;  %v966_v36 = vpack.c.bf16 %v626_v30, %v625_v27  ;;  %v622_v27 = vld [vmem:[%s4861_s18 + $0xa98] sm:$0xff] }
 0x16b   : > { %2270 = vmatpush.bf16.xpose.msrb.mxu3 %v1658_v35  ;;  %v958_v35 = vpack.c.bf16 %v610_v26, %v609_v23  ;;  %v974_v38 = vpack.c.bf16 %v642_v32, %v641_v31  ;;  %v1997_v40 = vpop.f32.mrf.mxu3  ;;  %v621_v23 = vld [vmem:[%s4861_s18 + $0xa90] sm:$0xff]  ;;  %v1646_v26 = vsel %vm1080_vm0, %v981_v7, 0  ;;  %v638_v30 = vld [vmem:[%s4861_s18 + $0xb18] sm:$0xff] }
 0x16c   : > { %v1601_v51 = vsel %vm1080_vm0, %v966_v36, 0  ;;  %v653_v31 = vld [vmem:[%s4861_s18 + $0xb90] sm:$0xff]  ;;  %v654_v32 = vld [vmem:[%s4861_s18 + $0xb98] sm:$0xff]  ;;  %v964_v34 = vpack.c.bf16 %v622_v27, %v621_v23  ;;  %v604_v40 = vld [vmem:[%s4861_s18 + $0xa08] sm:$0xff] }
 0x16d   : > { %v1577_v46 = vsel %vm1080_vm0, %v958_v35, 0  ;;  %v980_v36 = vpack.c.bf16 %v654_v32, %v653_v31  ;;  %v729_v7 = vld [vmem:[%s4861_s18 + $0xdf0] sm:$0xff]  ;;  %v3223_v23 = vld [vmem:[%s7258_s5] sm:$0xff] }
 0x16e   : > { %v1595_v41 = vsel %vm1080_vm0, %v964_v34, 0  ;;  %3227 = vperm.xlu0 %4568, %v3223_v23   ;;  %v726_v23 = vld [vmem:[%s4861_s18 + $0xdd8] sm:$0xff] }
 0x16f   : > { %4423 = vmatmul.msk.bf16.gmra.mxu0 %vm1080_vm0, %v5100_v37 }
 0x170   : > { %2217 = vmatpush.bf16.xpose.msrb.mxu0 %v1583_v54  ;;  %4425 = vmatmul.msk.bf16.gmra.mxu1 %vm1080_vm0, %v5100_v37  ;;  %v1625_v54 = vsel %vm1080_vm0, %v974_v38, 0 }
 0x171   : > { %2235 = vmatpush.bf16.xpose.msrb.mxu1 %v1607_v55  ;;  %4427 = vmatmul.msk.bf16.gmra.mxu2 %vm1080_vm0, %v5100_v37  ;;  %v607_v55 = vld [vmem:[%s4861_s18 + $0xa20] sm:$0xff] }
 0x172   : > { %2253 = vmatpush.bf16.xpose.msrb.mxu2 %v1631_v56  ;;  %4429 = vmatmul.msk.bf16.gmra.mxu3 %vm1080_vm0, %v5100_v37  ;;  %v608_v56 = vld [vmem:[%s4861_s18 + $0xa28] sm:$0xff] }
 0x173   : > { %2271 = vmatpush.bf16.xpose.msrb.mxu3 %v1655_v61  ;;  %v639_v61 = vld [vmem:[%s4861_s18 + $0xb20] sm:$0xff]  ;;  %v957_v1 = vpack.c.bf16 %v608_v56, %v607_v55  ;;  %v636_v55 = vld [vmem:[%s4861_s18 + $0xb08] sm:$0xff] }
 0x174   : > { %v973_v6 = vpack.c.bf16 %v640_v62, %v639_v61  ;;  %v651_v56 = vld [vmem:[%s4861_s18 + $0xb80] sm:$0xff]  ;;  %v697_v61 = vld [vmem:[%s4861_s18 + $0xcf0] sm:$0xff]  ;;  %v955_v62 = vpack.c.bf16 %v604_v40, %v603_v39  ;;  %v696_v40 = vld [vmem:[%s4861_s18 + $0xce8] sm:$0xff] }
 0x175   : > { %v1574_v8 = vsel %vm1080_vm0, %v957_v1, 0  ;;  %v714_v1 = vld [vmem:[%s4861_s18 + $0xd78] sm:$0xff] }
 0x178   : > { %2218 = vmatpush.bf16.xpose.msrb.mxu0 %v1580_v14  ;;  %v1622_v14 = vsel %vm1080_vm0, %v973_v6, 0 }
 0x179   : > { %2236 = vmatpush.bf16.xpose.msrb.mxu1 %v1604_v15  ;;  %v605_v15 = vld [vmem:[%s4861_s18 + $0xa10] sm:$0xff] }
 0x17a   : > { %2254 = vmatpush.bf16.xpose.msrb.mxu2 %v1628_v18  ;;  %v606_v18 = vld [vmem:[%s4861_s18 + $0xa18] sm:$0xff] }
 0x17b   : > { %2272 = vmatpush.bf16.xpose.msrb.mxu3 %v1652_v28  ;;  %v637_v28 = vld [vmem:[%s4861_s18 + $0xb10] sm:$0xff]  ;;  %v956_v33 = vpack.c.bf16 %v606_v18, %v605_v15  ;;  %v1002_v15 = vpack.c.bf16 %v698_v63, %v697_v61  ;;  %v1010_v18 = vpack.c.bf16 %v714_v1, %v713_v0  ;;  %v2594_v61 = vld [vmem:[%s7257_s4 + $0x8] sm:$0x3] }
 0x17c   : > { %v972_v35 = vpack.c.bf16 %v638_v30, %v637_v28  ;;  %2602 = vperm.xlu1 %4569, %v2594_v61   ;;  %v724_v61 = vld [vmem:[%s4861_s18 + $0xdc8] sm:$0xff] }
 0x17d   : > { %v1571_v38 = vsel %vm1080_vm0, %v956_v33, 0  ;;  %v1709_v33 = vsel %vm1080_vm0, %v1002_v15, 0  ;;  %v1733_v34 = vsel %vm1080_vm0, %v1010_v18, 0  ;;  %v710_v15 = vld [vmem:[%s4861_s18 + $0xd58] sm:$0xff]  ;;  %v725_v18 = vld [vmem:[%s4861_s18 + $0xdd0] sm:$0xff] }
 0x17e   : > { %v1619_v44 = vsel %vm1080_vm0, %v972_v35, 0  ;;  %v679_v35 = vld [vmem:[%s4861_s18 + $0xc60] sm:$0xff] }
 0x180   : > { %2219 = vmatpush.bf16.xpose.msrb.mxu0 %v1577_v46  ;;  %v620_v46 = vld [vmem:[%s4861_s18 + $0xa88] sm:$0xff] }
 0x181   : > { %2237 = vmatpush.bf16.xpose.msrb.mxu1 %v1601_v51  ;;  %v635_v51 = vld [vmem:[%s4861_s18 + $0xb00] sm:$0xff]  ;;  %v963_v58 = vpack.c.bf16 %v620_v46, %v619_v45  ;;  %v728_v46 = vld [vmem:[%s4861_s18 + $0xde8] sm:$0xff] }
 0x182   : > { %2255 = vmatpush.bf16.xpose.msrb.mxu2 %v1625_v54  ;;  %v1643_v54 = vsel %vm1080_vm0, %v980_v36, 0  ;;  %v971_v6 = vpack.c.bf16 %v636_v55, %v635_v51  ;;  %v680_v36 = vld [vmem:[%s4861_s18 + $0xc68] sm:$0xff]  ;;  %v727_v45 = vld [vmem:[%s4861_s18 + $0xde0] sm:$0xff]  ;;  %v5614_v51 = vpop.f32.mrf.mxu2 }
 0x183   : > { %2273 = vmatpush.bf16.xpose.msrb.mxu3 %v1649_v59  ;;  %v681_v59 = vld [vmem:[%s4861_s18 + $0xc70] sm:$0xff]  ;;  %v1592_v28 = vsel %vm1080_vm0, %v963_v58, 0  ;;  %v993_v55 = vpack.c.bf16 %v680_v36, %v679_v35 }
 0x184   : > { %v1616_v30 = vsel %vm1080_vm0, %v971_v6, 0  ;;  %v677_v58 = vld [vmem:[%s4861_s18 + $0xc50] sm:$0xff]  ;;  %v678_v6 = vld [vmem:[%s4861_s18 + $0xc58] sm:$0xff] }
 0x185   : > { %v1682_v63 = vsel %vm1080_vm0, %v993_v55, 0  ;;  %v707_v55 = vld [vmem:[%s4861_s18 + $0xd40] sm:$0xff] }
 0x188   : > { %2220 = vmatpush.bf16.xpose.msrb.mxu0 %v1574_v8  ;;  %v730_v8 = vld [vmem:[%s4861_s18 + $0xdf8] sm:$0xff] }
 0x189   : > { %2238 = vmatpush.bf16.xpose.msrb.mxu1 %v1598_v11  ;;  %v979_v11 = vpack.c.bf16 %v652_v57, %v651_v56  ;;  %v1018_v27 = vpack.c.bf16 %v730_v8, %v729_v7  ;;  %v5618_v56 = vpop.f32.mrf.mxu0  ;;  %v5620_v57 = vpop.f32.mrf.mxu1  ;;  %v693_v7 = vld [vmem:[%s4861_s18 + $0xcd0] sm:$0xff] }
 0x18a   : > { %2256 = vmatpush.bf16.xpose.msrb.mxu2 %v1622_v14  ;;  %v994_v14 = vpack.c.bf16 %v682_v60, %v681_v59 }
 0x18b   : > { %2274 = vmatpush.bf16.xpose.msrb.mxu3 %v1646_v26  ;;  %v1568_v26 = vsel %vm1080_vm0, %v955_v62, 0  ;;  %v1640_v31 = vsel %vm1080_vm0, %v979_v11, 0  ;;  %v1757_v39 = vsel %vm1080_vm0, %v1018_v27, 0  ;;  %v1017_v62 = vpack.c.bf16 %v728_v46, %v727_v45  ;;  %v694_v11 = vld [vmem:[%s4861_s18 + $0xcd8] sm:$0xff]  ;;  %v692_v46 = vld [vmem:[%s4861_s18 + $0xcc8] sm:$0xff] }
 0x18c   : > { %v1685_v32 = vsel %vm1080_vm0, %v994_v14, 0  ;;  %v709_v14 = vld [vmem:[%s4861_s18 + $0xd50] sm:$0xff]  ;;  %v1000_v27 = vpack.c.bf16 %v694_v11, %v693_v7 }
 0x18d   : > { %v1754_v8 = vsel %vm1080_vm0, %v1017_v62, 0 }
 0x190   : > { %2221 = vmatpush.bf16.xpose.msrb.mxu0 %v1571_v38  ;;  %v695_v38 = vld [vmem:[%s4861_s18 + $0xce0] sm:$0xff] }
 0x191   : > { %2239 = vmatpush.bf16.xpose.msrb.mxu1 %v1595_v41  ;;  %v711_v41 = vld [vmem:[%s4861_s18 + $0xd60] sm:$0xff]  ;;  %v1001_v59 = vpack.c.bf16 %v696_v40, %v695_v38  ;;  %v5651_v35 = vpop.f32.mrf.mxu1  ;;  %v1703_v38 = vsel %vm1080_vm0, %v1000_v27, 0 }
 0x192   : > { %2257 = vmatpush.bf16.xpose.msrb.mxu2 %v1619_v44  ;;  %v712_v44 = vld [vmem:[%s4861_s18 + $0xd68] sm:$0xff]  ;;  %v675_v40 = vld [vmem:[%s4861_s18 + $0xc40] sm:$0xff] }
 0x193   : > { %2275 = vmatpush.bf16.xpose.msrb.mxu3 %v1643_v54  ;;  %v5616_v54 = vpop.f32.mrf.mxu3  ;;  %v1009_v60 = vpack.c.bf16 %v712_v44, %v711_v41  ;;  %v1706_v0 = vsel %vm1080_vm0, %v1001_v59, 0  ;;  %v676_v41 = vld [vmem:[%s4861_s18 + $0xc48] sm:$0xff]  ;;  %v691_v44 = vld [vmem:[%s4861_s18 + $0xcc0] sm:$0xff] }
 0x194   : > { %v708_v59 = vld [vmem:[%s4861_s18 + $0xd48] sm:$0xff]  ;;  %v991_v62 = vpack.c.bf16 %v676_v41, %v675_v40 }
 0x195   : > { %v1730_v1 = vsel %vm1080_vm0, %v1009_v60, 0  ;;  %v723_v60 = vld [vmem:[%s4861_s18 + $0xdc0] sm:$0xff] }
 0x196   : > { %v1676_v11 = vsel %vm1080_vm0, %v991_v62, 0 }
 0x198   : > { %2222 = vmatpush.bf16.xpose.msrb.mxu0 %v1568_v26  ;;  %v992_v26 = vpack.c.bf16 %v678_v6, %v677_v58  ;;  %v1015_v6 = vpack.c.bf16 %v724_v61, %v723_v60 }
 0x199   : > { %2240 = vmatpush.bf16.xpose.msrb.mxu1 %v1592_v28  ;;  %v1008_v28 = vpack.c.bf16 %v710_v15, %v709_v14 }
 0x19a   : > { %2258 = vmatpush.bf16.xpose.msrb.mxu2 %v1616_v30  ;;  %v5645_v30 = vpop.f32.mrf.mxu2  ;;  %v1679_v36 = vsel %vm1080_vm0, %v992_v26, 0  ;;  %v689_v26 = vld [vmem:[%s4861_s18 + $0xcb0] sm:$0xff]  ;;  %v1748_v27 = vsel %vm1080_vm0, %v1015_v6, 0  ;;  %v687_v6 = vld [vmem:[%s4861_s18 + $0xca0] sm:$0xff] }
 0x19b   : > { %2276 = vmatpush.bf16.xpose.msrb.mxu3 %v1640_v31  ;;  %v5647_v31 = vpop.f32.mrf.mxu3 }
 0x19c   : > { %7326 = vst [vmem:[#allocation6_spill] sm:$0xff] %v5647_v31 }
 0x19f   : > { %4430 = vmatmul.msk.bf16.vlgmr.msrb.gmra.mxu0 %vm1080_vm0, %v5482_v29 }
 0x1a0   : > { %2287 = vmatpush.bf16.xpose.msra.mxu0 %v1685_v32  ;;  %4432 = vmatmul.msk.bf16.vlgmr.msrb.gmra.mxu1 %vm1080_vm0, %v5482_v29  ;;  %v3555_v32 = vld [vmem:[#allocation2] sm:$0x1] }
 0x1a1   : > { %2305 = vmatpush.bf16.xpose.msra.mxu1 %v1709_v33  ;;  %4434 = vmatmul.msk.bf16.vlgmr.msrb.gmra.mxu2 %vm1080_vm0, %v5482_v29  ;;  %v1016_v33 = vpack.c.bf16 %v726_v23, %v725_v18  ;;  %v673_v18 = vld [vmem:[%s4861_s18 + $0xc30] sm:$0xff]  ;;  %v674_v23 = vld [vmem:[%s4861_s18 + $0xc38] sm:$0xff] }
 0x1a2   : > { %2323 = vmatpush.bf16.xpose.msra.mxu2 %v1733_v34  ;;  %4436 = vmatmul.msk.bf16.vlgmr.msrb.gmra.mxu3 %vm1080_vm0, %v5482_v29  ;;  %v5649_v34 = vpop.f32.mrf.mxu0 }
 0x1a3   : > { %2341 = vmatpush.bf16.xpose.msra.mxu3 %v1757_v39  ;;  %3558 = vperm.xlu1 %4569, %v3555_v32   ;;  %v1727_v39 = vsel %vm1080_vm0, %v1008_v28, 0  ;;  %v1751_v45 = vsel %vm1080_vm0, %v1016_v33, 0  ;;  %v5667_v58 = vpop.f32.mrf.mxu3  ;;  %v690_v28 = vld [vmem:[%s4861_s18 + $0xcb8] sm:$0xff]  ;;  %v705_v32 = vld [vmem:[%s4861_s18 + $0xd30] sm:$0xff] }
 0x1a4   : > { %v706_v33 = vld [vmem:[%s4861_s18 + $0xd38] sm:$0xff]  ;;  %v998_v40 = vpack.c.bf16 %v690_v28, %v689_v26  ;;  %v720_v26 = vld [vmem:[%s4861_s18 + $0xda8] sm:$0xff] }
 0x1a5   : > { %v1006_v41 = vpack.c.bf16 %v706_v33, %v705_v32 }
 0x1a6   : > { %v1697_v61 = vsel %vm1080_vm0, %v998_v40, 0 }
 0x1a7   : > { %v1721_v62 = vsel %vm1080_vm0, %v1006_v41, 0 }
 0x1a8   : > { %2288 = vmatpush.bf16.xpose.msra.mxu0 %v1682_v63  ;;  %v999_v63 = vpack.c.bf16 %v692_v46, %v691_v44 }
 0x1a9   : > { %2306 = vmatpush.bf16.xpose.msra.mxu1 %v1706_v0  ;;  %v1007_v0 = vpack.c.bf16 %v708_v59, %v707_v55 }
 0x1aa   : > { %2324 = vmatpush.bf16.xpose.msra.mxu2 %v1730_v1  ;;  %v5665_v1 = vpop.f32.mrf.mxu2  ;;  %v5669_v7 = vpop.f32.mrf.mxu0  ;;  %v1700_v14 = vsel %vm1080_vm0, %v999_v63, 0  ;;  %v671_v63 = vld [vmem:[%s4861_s18 + $0xc20] sm:$0xff] }
 0x1ab   : > { %2342 = vmatpush.bf16.xpose.msra.mxu3 %v1754_v8  ;;  %v5671_v8 = vpop.f32.mrf.mxu1  ;;  %v1724_v15 = vsel %vm1080_vm0, %v1007_v0, 0  ;;  %v672_v0 = vld [vmem:[%s4861_s18 + $0xc28] sm:$0xff] }
 0x1af   : > { %4431 = vmatmul.msk.bf16.gmra.mxu0 %vm1080_vm0, %v5100_v37 }
 0x1b0   : > { %2289 = vmatpush.bf16.xpose.msra.mxu0 %v1679_v36  ;;  %4433 = vmatmul.msk.bf16.gmra.mxu1 %vm1080_vm0, %v5100_v37  ;;  %v721_v36 = vld [vmem:[%s4861_s18 + $0xdb0] sm:$0xff] }
 0x1b1   : > { %2307 = vmatpush.bf16.xpose.msra.mxu1 %v1703_v38  ;;  %4435 = vmatmul.msk.bf16.gmra.mxu2 %vm1080_vm0, %v5100_v37  ;;  %v722_v38 = vld [vmem:[%s4861_s18 + $0xdb8] sm:$0xff] }
 0x1b2   : > { %2325 = vmatpush.bf16.xpose.msra.mxu2 %v1727_v39  ;;  %4437 = vmatmul.msk.bf16.gmra.mxu3 %vm1080_vm0, %v5100_v37  ;;  %v990_v39 = vpack.c.bf16 %v674_v23, %v673_v18  ;;  %v2051_v44 = vpop.f32.mrf.mxu2  ;;  %v1014_v46 = vpack.c.bf16 %v722_v38, %v721_v36  ;;  %v2015_v55 = vpop.f32.mrf.mxu0  ;;  %v704_v18 = vld [vmem:[%s4861_s18 + $0xd28] sm:$0xff]  ;;  %v719_v23 = vld [vmem:[%s4861_s18 + $0xda0] sm:$0xff] }
 0x1b3   : > { %2343 = vmatpush.bf16.xpose.msra.mxu3 %v1751_v45  ;;  %v2069_v45 = vpop.f32.mrf.mxu3  ;;  %v2033_v59 = vpop.f32.mrf.mxu1  ;;  %v1013_v33 = vpack.c.bf16 %v720_v26, %v719_v23  ;;  %v670_v55 = vld [vmem:[%s4861_s18 + $0xc18] sm:$0xff] }
 0x1b4   : > { %v1673_v60 = vsel %vm1080_vm0, %v990_v39, 0  ;;  %v685_v59 = vld [vmem:[%s4861_s18 + $0xc90] sm:$0xff] }
 0x1b8   : > { %2290 = vmatpush.bf16.xpose.msra.mxu0 %v1676_v11  ;;  %v1745_v11 = vsel %vm1080_vm0, %v1014_v46, 0  ;;  %v669_v46 = vld [vmem:[%s4861_s18 + $0xc10] sm:$0xff] }
 0x1b9   : > { %2308 = vmatpush.bf16.xpose.msra.mxu1 %v1700_v14  ;;  %v688_v14 = vld [vmem:[%s4861_s18 + $0xca8] sm:$0xff] }
 0x1ba   : > { %2326 = vmatpush.bf16.xpose.msra.mxu2 %v1724_v15  ;;  %v703_v15 = vld [vmem:[%s4861_s18 + $0xd20] sm:$0xff]  ;;  %v997_v28 = vpack.c.bf16 %v688_v14, %v687_v6  ;;  %v5705_v36 = vpop.f32.mrf.mxu2  ;;  %v5710_v40 = vpop.f32.mrf.mxu0  ;;  %v718_v6 = vld [vmem:[%s4861_s18 + $0xd98] sm:$0xff] }
 0x1bb   : > { %2344 = vmatpush.bf16.xpose.msra.mxu3 %v1748_v27  ;;  %v989_v27 = vpack.c.bf16 %v672_v0, %v671_v63  ;;  %v1005_v32 = vpack.c.bf16 %v704_v18, %v703_v15  ;;  %7327 = vst [vmem:[#allocation7_spill] sm:$0xff] %v5705_v36  ;;  %v5707_v38 = vpop.f32.mrf.mxu3  ;;  %v5712_v41 = vpop.f32.mrf.mxu1  ;;  %v702_v63 = vld [vmem:[%s4861_s18 + $0xd18] sm:$0xff]  ;;  %v717_v0 = vld [vmem:[%s4861_s18 + $0xd90] sm:$0xff] }
 0x1bc   : > { %7328 = vst [vmem:[#allocation8_spill] sm:$0xff] %v5707_v38  ;;  %v1694_v44 = vsel %vm1080_vm0, %v997_v28, 0  ;;  %v1012_v18 = vpack.c.bf16 %v718_v6, %v717_v0  ;;  %v667_v28 = vld [vmem:[%s4861_s18 + $0xc00] sm:$0xff]  ;;  %v745_v0 = vld [vmem:[%s4861_s18 + $0xe70] sm:$0xff]  ;;  %v746_v6 = vld [vmem:[%s4861_s18 + $0xe78] sm:$0xff] }
 0x1bd   : > { %v1670_v39 = vsel %vm1080_vm0, %v989_v27, 0  ;;  %7329 = vst [vmem:[#allocation9_spill] sm:$0xff] %v5710_v40  ;;  %v1718_v45 = vsel %vm1080_vm0, %v1005_v32, 0  ;;  %v668_v32 = vld [vmem:[%s4861_s18 + $0xc08] sm:$0xff]  ;;  %v778_v38 = vld [vmem:[%s4861_s18 + $0xf78] sm:$0xff]  ;;  %v1026_v40 = vpack.c.bf16 %v746_v6, %v745_v0 }
 0x1be   : > { %7330 = vst [vmem:[#allocation10_spill] sm:$0xff] %v5712_v41  ;;  %v793_v41 = vld [vmem:[%s4861_s18 + $0xff0] sm:$0xff]  ;;  %v760_v0 = vld [vmem:[%s4861_s18 + $0xee8] sm:$0xff] }
 0x1bf   : > { %v776_v6 = vld [vmem:[%s4861_s18 + $0xf68] sm:$0xff] }
 0x1c0   : > { %2291 = vmatpush.bf16.xpose.msra.mxu0 %v1673_v60  ;;  %v1742_v60 = vsel %vm1080_vm0, %v1013_v33, 0 }
 0x1c1   : > { %2309 = vmatpush.bf16.xpose.msra.mxu1 %v1697_v61  ;;  %v686_v61 = vld [vmem:[%s4861_s18 + $0xc98] sm:$0xff] }
 0x1c2   : > { %2327 = vmatpush.bf16.xpose.msra.mxu2 %v1721_v62  ;;  %v701_v62 = vld [vmem:[%s4861_s18 + $0xd10] sm:$0xff]  ;;  %v996_v14 = vpack.c.bf16 %v686_v61, %v685_v59  ;;  %v5725_v23 = vpop.f32.mrf.mxu2  ;;  %v5732_v33 = vpop.f32.mrf.mxu0  ;;  %v699_v59 = vld [vmem:[%s4861_s18 + $0xd00] sm:$0xff]  ;;  %v700_v61 = vld [vmem:[%s4861_s18 + $0xd08] sm:$0xff] }
 0x1c3   : > { %2345 = vmatpush.bf16.xpose.msra.mxu3 %v1745_v11  ;;  %v988_v11 = vpack.c.bf16 %v670_v55, %v669_v46  ;;  %v1004_v15 = vpack.c.bf16 %v702_v63, %v701_v62  ;;  %7331 = vst [vmem:[#allocation11_spill] sm:$0xff] %v5725_v23  ;;  %v5727_v26 = vpop.f32.mrf.mxu3  ;;  %v683_v46 = vld [vmem:[%s4861_s18 + $0xc80] sm:$0xff]  ;;  %v684_v55 = vld [vmem:[%s4861_s18 + $0xc88] sm:$0xff]  ;;  %v1003_v23 = vpack.c.bf16 %v700_v61, %v699_v59 }
 0x1c4   : > { %7332 = vst [vmem:[#allocation12_spill] sm:$0xff] %v5727_v26  ;;  %v715_v62 = vld [vmem:[%s4861_s18 + $0xd80] sm:$0xff]  ;;  %v716_v63 = vld [vmem:[%s4861_s18 + $0xd88] sm:$0xff]  ;;  %v777_v26 = vld [vmem:[%s4861_s18 + $0xf70] sm:$0xff] }
 0x1c5   : > { %v1667_v27 = vsel %vm1080_vm0, %v988_v11, 0  ;;  %7333 = vst [vmem:[#allocation13_spill] sm:$0xff] %v5732_v33  ;;  %v761_v11 = vld [vmem:[%s4861_s18 + $0xef0] sm:$0xff]  ;;  %v1011_v33 = vpack.c.bf16 %v716_v63, %v715_v62  ;;  %v1712_v59 = vsel %vm1080_vm0, %v1003_v23, 0  ;;  %v743_v61 = vld [vmem:[%s4861_s18 + $0xe60] sm:$0xff]  ;;  %v744_v62 = vld [vmem:[%s4861_s18 + $0xe68] sm:$0xff] }
 0x1c6   : > { %v759_v63 = vld [vmem:[%s4861_s18 + $0xee0] sm:$0xff] }
 0x1c7   : > { %v775_v23 = vld [vmem:[%s4861_s18 + $0xf60] sm:$0xff] }
 0x1c8   : > { %2292 = vmatpush.bf16.xpose.msra.mxu0 %v1670_v39  ;;  %v5734_v39 = vpop.f32.mrf.mxu1 }
 0x1c9   : > { %2310 = vmatpush.bf16.xpose.msra.mxu1 %v1694_v44  ;;  %7334 = vst [vmem:[#allocation14_spill] sm:$0xff] %v5734_v39  ;;  %v1691_v44 = vsel %vm1080_vm0, %v996_v14, 0  ;;  %v987_v14 = vpack.c.bf16 %v668_v32, %v667_v28  ;;  %v995_v39 = vpack.c.bf16 %v684_v55, %v683_v46 }
 0x1ca   : > { %2328 = vmatpush.bf16.xpose.msra.mxu2 %v1718_v45  ;;  %v1715_v45 = vsel %vm1080_vm0, %v1004_v15, 0  ;;  %v762_v15 = vld [vmem:[%s4861_s18 + $0xef8] sm:$0xff]  ;;  %v5753_v31 = vpop.f32.mrf.mxu2 }
 0x1cb   : > { %2346 = vmatpush.bf16.xpose.msra.mxu3 %v1742_v60  ;;  %v1739_v60 = vsel %vm1080_vm0, %v1012_v18, 0  ;;  %v794_v18 = vld [vmem:[%s4861_s18 + $0xff8] sm:$0xff]  ;;  %v1034_v36 = vpack.c.bf16 %v762_v15, %v761_v11  ;;  %7335 = vst [vmem:[#allocation15_spill] sm:$0xff] %v5753_v31  ;;  %v1664_v28 = vsel %vm1080_vm0, %v987_v14, 0  ;;  %v1688_v55 = vsel %vm1080_vm0, %v995_v39, 0 }
 0x1cc   : > { %v1050_v32 = vpack.c.bf16 %v794_v18, %v793_v41  ;;  %v1033_v11 = vpack.c.bf16 %v760_v0, %v759_v63  ;;  %v1041_v14 = vpack.c.bf16 %v776_v6, %v775_v23  ;;  %v773_v63 = vld [vmem:[%s4861_s18 + $0xf50] sm:$0xff]  ;;  %v790_v23 = vld [vmem:[%s4861_s18 + $0xfd8] sm:$0xff] }
 0x1cd   : > { %v1805_v41 = vsel %vm1080_vm0, %v1034_v36, 0  ;;  %v1025_v36 = vpack.c.bf16 %v744_v62, %v743_v61  ;;  %v758_v62 = vld [vmem:[%s4861_s18 + $0xed8] sm:$0xff]  ;;  %v789_v0 = vld [vmem:[%s4861_s18 + $0xfd0] sm:$0xff] }
 0x1ce   : > { %v1853_v39 = vsel %vm1080_vm0, %v1050_v32, 0 }
 0x1d0   : > { %2293 = vmatpush.bf16.xpose.msra.mxu0 %v1667_v27  ;;  %v1042_v27 = vpack.c.bf16 %v778_v38, %v777_v26  ;;  %v5760_v46 = vpop.f32.mrf.mxu1  ;;  %v1736_v38 = vsel %vm1080_vm0, %v1011_v33, 0  ;;  %v1781_v26 = vsel %vm1080_vm0, %v1026_v40, 0  ;;  %v791_v33 = vld [vmem:[%s4861_s18 + $0xfe0] sm:$0xff]  ;;  %v792_v40 = vld [vmem:[%s4861_s18 + $0xfe8] sm:$0xff] }
 0x1d1   : > { %2311 = vmatpush.bf16.xpose.msra.mxu1 %v1691_v44  ;;  %v5755_v44 = vpop.f32.mrf.mxu3  ;;  %7338 = vst [vmem:[#allocation18_spill] sm:$0xff] %v5760_v46 }
 0x1d2   : > { %2329 = vmatpush.bf16.xpose.msra.mxu2 %v1715_v45  ;;  %7336 = vst [vmem:[#allocation16_spill] sm:$0xff] %v5755_v44  ;;  %v5758_v45 = vpop.f32.mrf.mxu0  ;;  %v2123_v15 = vpop.f32.mrf.mxu2 }
 0x1d3   : > { %2347 = vmatpush.bf16.xpose.msra.mxu3 %v1739_v60  ;;  %7337 = vst [vmem:[#allocation17_spill] sm:$0xff] %v5758_v45  ;;  %v1829_v60 = vsel %vm1080_vm0, %v1042_v27, 0  ;;  %v1049_v27 = vpack.c.bf16 %v792_v40, %v791_v33  ;;  %v1048_v40 = vpack.c.bf16 %v790_v23, %v789_v0  ;;  %v739_v15 = vld [vmem:[%s4861_s18 + $0xe40] sm:$0xff] }
 0x1d5   : > { %v1850_v61 = vsel %vm1080_vm0, %v1049_v27, 0  ;;  %v755_v27 = vld [vmem:[%s4861_s18 + $0xec0] sm:$0xff] }
 0x1d8   : > { %2294 = vmatpush.bf16.xpose.msra.mxu0 %v1664_v28  ;;  %v2105_v32 = vpop.f32.mrf.mxu1 }
 0x1d9   : > { %2312 = vmatpush.bf16.xpose.msra.mxu1 %v1688_v55  ;;  %v2141_v18 = vpop.f32.mrf.mxu3  ;;  %v1778_v55 = vsel %vm1080_vm0, %v1025_v36, 0  ;;  %v1847_v32 = vsel %vm1080_vm0, %v1048_v40, 0  ;;  %v738_v40 = vld [vmem:[%s4861_s18 + $0xe38] sm:$0xff] }
 0x1da   : > { %2330 = vmatpush.bf16.xpose.msra.mxu2 %v1712_v59  ;;  %v2087_v28 = vpop.f32.mrf.mxu0  ;;  %v1802_v59 = vsel %vm1080_vm0, %v1033_v11, 0  ;;  %v740_v18 = vld [vmem:[%s4861_s18 + $0xe48] sm:$0xff] }
 0x1db   : > { %2348 = vmatpush.bf16.xpose.msra.mxu3 %v1736_v38  ;;  %v1826_v38 = vsel %vm1080_vm0, %v1041_v14, 0 }
 0x1df   : > { %4438 = vmatmul.msk.bf16.vlgmr.msra.gmra.mxu0 %vm1080_vm0, %v5482_v29 }
 0x1e0   : > { %2359 = vmatpush.bf16.xpose.msrb.mxu0 %v1781_v26  ;;  %4440 = vmatmul.msk.bf16.vlgmr.msra.gmra.mxu1 %vm1080_vm0, %v5482_v29  ;;  %v741_v26 = vld [vmem:[%s4861_s18 + $0xe50] sm:$0xff] }
 0x1e1   : > { %2377 = vmatpush.bf16.xpose.msrb.mxu1 %v1805_v41  ;;  %4442 = vmatmul.msk.bf16.vlgmr.msra.gmra.mxu2 %vm1080_vm0, %v5482_v29  ;;  %v742_v41 = vld [vmem:[%s4861_s18 + $0xe58] sm:$0xff] }
 0x1e2   : > { %2395 = vmatpush.bf16.xpose.msrb.mxu2 %v1829_v60  ;;  %v757_v60 = vld [vmem:[%s4861_s18 + $0xed0] sm:$0xff]  ;;  %4444 = vmatmul.msk.bf16.vlgmr.msra.gmra.mxu3 %vm1080_vm0, %v5482_v29  ;;  %v1024_v6 = vpack.c.bf16 %v742_v41, %v741_v26  ;;  %v5803_v28 = vpop.f32.mrf.mxu0  ;;  %v5809_v26 = vpop.f32.mrf.mxu1  ;;  %v787_v41 = vld [vmem:[%s4861_s18 + $0xfc0] sm:$0xff] }
 0x1e3   : > { %2413 = vmatpush.bf16.xpose.msrb.mxu3 %v1853_v39  ;;  %v774_v39 = vld [vmem:[%s4861_s18 + $0xf58] sm:$0xff]  ;;  %v1032_v33 = vpack.c.bf16 %v758_v62, %v757_v60  ;;  %7339 = vst [vmem:[#allocation19_spill] sm:$0xff] %v5803_v28  ;;  %v788_v60 = vld [vmem:[%s4861_s18 + $0xfc8] sm:$0xff]  ;;  %v5879_v28 = vpop.permute.xlu1 %1064 }
 0x1e4   : > { %v1040_v29 = vpack.c.bf16 %v774_v39, %v773_v63  ;;  %v1775_v36 = vsel %vm1080_vm0, %v1024_v6, 0  ;;  %7340 = vst [vmem:[#allocation20_spill] sm:$0xff] %v5809_v26  ;;  %v1047_v39 = vpack.c.bf16 %v788_v60, %v787_v41  ;;  %v5816_v23 = vpop.f32.mrf.mxu2 }
 0x1e5   : > { %v1799_v11 = vsel %vm1080_vm0, %v1032_v33, 0  ;;  %7341 = vst [vmem:[#allocation21_spill] sm:$0xff] %v5816_v23 }
 0x1e6   : > { %v1823_v14 = vsel %vm1080_vm0, %v1040_v29, 0  ;;  %v737_v29 = vld [vmem:[%s4861_s18 + $0xe30] sm:$0xff] }
 0x1e7   : > { %v1022_v41 = vpack.c.bf16 %v738_v40, %v737_v29 }
 0x1e8   : > { %2360 = vmatpush.bf16.xpose.msrb.mxu0 %v1778_v55  ;;  %v756_v55 = vld [vmem:[%s4861_s18 + $0xec8] sm:$0xff] }
 0x1e9   : > { %2378 = vmatpush.bf16.xpose.msrb.mxu1 %v1802_v59  ;;  %v771_v59 = vld [vmem:[%s4861_s18 + $0xf40] sm:$0xff]  ;;  %v1031_v62 = vpack.c.bf16 %v756_v55, %v755_v27  ;;  %v769_v27 = vld [vmem:[%s4861_s18 + $0xf30] sm:$0xff] }
 0x1ea   : > { %2396 = vmatpush.bf16.xpose.msrb.mxu2 %v1826_v38  ;;  %v772_v38 = vld [vmem:[%s4861_s18 + $0xf48] sm:$0xff]  ;;  %v5837_v55 = vpop.f32.mrf.mxu1 }
 0x1eb   : > { %2414 = vmatpush.bf16.xpose.msrb.mxu3 %v1850_v61  ;;  %v1023_v61 = vpack.c.bf16 %v740_v18, %v739_v15  ;;  %v1039_v63 = vpack.c.bf16 %v772_v38, %v771_v59  ;;  %v1796_v6 = vsel %vm1080_vm0, %v1031_v62, 0  ;;  %v1844_v15 = vsel %vm1080_vm0, %v1047_v39, 0  ;;  %v754_v18 = vld [vmem:[%s4861_s18 + $0xeb8] sm:$0xff]  ;;  %7344 = vst [vmem:[#allocation24_spill] sm:$0xff] %v5837_v55  ;;  %v785_v59 = vld [vmem:[%s4861_s18 + $0xfb0] sm:$0xff]  ;;  %v751_v55 = vld [vmem:[%s4861_s18 + $0xea0] sm:$0xff] }
 0x1ec   : > { %v786_v38 = vld [vmem:[%s4861_s18 + $0xfb8] sm:$0xff]  ;;  %v5842_v39 = vpop.f32.mrf.mxu2 }
 0x1ed   : > { %v1772_v0 = vsel %vm1080_vm0, %v1023_v61, 0  ;;  %v1820_v33 = vsel %vm1080_vm0, %v1039_v63, 0  ;;  %v1046_v62 = vpack.c.bf16 %v786_v38, %v785_v59  ;;  %v1769_v63 = vsel %vm1080_vm0, %v1022_v41, 0  ;;  %7345 = vst [vmem:[#allocation25_spill] sm:$0xff] %v5842_v39  ;;  %v783_v59 = vld [vmem:[%s4861_s18 + $0xfa0] sm:$0xff]  ;;  %v784_v38 = vld [vmem:[%s4861_s18 + $0xfa8] sm:$0xff] }
 0x1ef   : > { %4439 = vmatmul.msk.bf16.gmra.mxu0 %vm1080_vm0, %v5100_v37 }
 0x1f0   : > { %2361 = vmatpush.bf16.xpose.msrb.mxu0 %v1775_v36  ;;  %4441 = vmatmul.msk.bf16.gmra.mxu1 %vm1080_vm0, %v5100_v37  ;;  %v753_v36 = vld [vmem:[%s4861_s18 + $0xeb0] sm:$0xff] }
 0x1f1   : > { %2379 = vmatpush.bf16.xpose.msrb.mxu1 %v1799_v11  ;;  %4443 = vmatmul.msk.bf16.gmra.mxu2 %vm1080_vm0, %v5100_v37  ;;  %v5827_v11 = vpop.f32.mrf.mxu3  ;;  %v1030_v60 = vpack.c.bf16 %v754_v18, %v753_v36  ;;  %v1841_v36 = vsel %vm1080_vm0, %v1046_v62, 0  ;;  %v767_v18 = vld [vmem:[%s4861_s18 + $0xf20] sm:$0xff] }
 0x1f2   : > { %2397 = vmatpush.bf16.xpose.msrb.mxu2 %v1823_v14  ;;  %7342 = vst [vmem:[#allocation22_spill] sm:$0xff] %v5827_v11  ;;  %v5829_v14 = vpop.f32.mrf.mxu0  ;;  %4445 = vmatmul.msk.bf16.gmra.mxu3 %vm1080_vm0, %v5100_v37 }
 0x1f3   : > { %2415 = vmatpush.bf16.xpose.msrb.mxu3 %v1847_v32  ;;  %7343 = vst [vmem:[#allocation23_spill] sm:$0xff] %v5829_v14  ;;  %v770_v32 = vld [vmem:[%s4861_s18 + $0xf38] sm:$0xff] }
 0x1f4   : > { %v1038_v61 = vpack.c.bf16 %v770_v32, %v769_v27  ;;  %v768_v27 = vld [vmem:[%s4861_s18 + $0xf28] sm:$0xff]  ;;  %v5857_v32 = vpop.f32.mrf.mxu1 }
 0x1f5   : > { %7348 = vst [vmem:[#allocation28_spill] sm:$0xff] %v5857_v32  ;;  %v1037_v62 = vpack.c.bf16 %v768_v27, %v767_v18  ;;  %v765_v18 = vld [vmem:[%s4861_s18 + $0xf10] sm:$0xff]  ;;  %v766_v27 = vld [vmem:[%s4861_s18 + $0xf18] sm:$0xff] }
 0x1f6   : > { %v1817_v11 = vsel %vm1080_vm0, %v1038_v61, 0  ;;  %v1036_v26 = vpack.c.bf16 %v766_v27, %v765_v18  ;;  %v5903_v27 = vadd.f32 %v5362_v2, %v5879_v28 }
 0x1f8   : > { %2362 = vmatpush.bf16.xpose.msrb.mxu0 %v1772_v0  ;;  %v1793_v0 = vsel %vm1080_vm0, %v1030_v60, 0  ;;  %v5861_v60 = vpop.permute.xlu0 %1069  ;;  %v2463_v44 = vmax.f32 %v5903_v27, 0.0 }
 0x1f9   : > { %2380 = vmatpush.bf16.xpose.msrb.mxu1 %v1796_v6  ;;  %v735_v6 = vld [vmem:[%s4861_s18 + $0xe20] sm:$0xff]  ;;  %v5849_v29 = vpop.f32.mrf.mxu3 }
 0x1fa   : > { %2398 = vmatpush.bf16.xpose.msrb.mxu2 %v1820_v33  ;;  %v736_v33 = vld [vmem:[%s4861_s18 + $0xe28] sm:$0xff]  ;;  %7346 = vst [vmem:[#allocation26_spill] sm:$0xff] %v5849_v29  ;;  %v5851_v40 = vpop.f32.mrf.mxu0  ;;  %v1045_v29 = vpack.c.bf16 %v784_v38, %v783_v59  ;;  %v781_v38 = vld [vmem:[%s4861_s18 + $0xf90] sm:$0xff] }
 0x1fb   : > { %2416 = vmatpush.bf16.xpose.msrb.mxu3 %v1844_v15  ;;  %7347 = vst [vmem:[#allocation27_spill] sm:$0xff] %v5851_v40  ;;  %v752_v15 = vld [vmem:[%s4861_s18 + $0xea8] sm:$0xff]  ;;  %v1021_v41 = vpack.c.bf16 %v736_v33, %v735_v6  ;;  %v734_v6 = vld [vmem:[%s4861_s18 + $0xe18] sm:$0xff]  ;;  %v749_v33 = vld [vmem:[%s4861_s18 + $0xe90] sm:$0xff] }
 0x1fc   : > { %v1029_v61 = vpack.c.bf16 %v752_v15, %v751_v55  ;;  %v1838_v55 = vsel %vm1080_vm0, %v1045_v29, 0  ;;  %v750_v15 = vld [vmem:[%s4861_s18 + $0xe98] sm:$0xff]  ;;  %v2177_v59 = vpop.f32.mrf.mxu1 }
 0x1fd   : > { %v1766_v39 = vsel %vm1080_vm0, %v1021_v41, 0  ;;  %v782_v41 = vld [vmem:[%s4861_s18 + $0xf98] sm:$0xff]  ;;  %v1870_v59 = vadd.f32 %v5382_v21, %v5861_v60 }
 0x1fe   : > { %v1790_v23 = vsel %vm1080_vm0, %v1029_v61, 0 }
 0x200   : > { %2363 = vmatpush.bf16.xpose.msrb.mxu0 %v1769_v63  ;;  %v5864_v63 = vpop.f32.mrf.mxu2  ;;  %v5881_v29 = vpop.permute.xlu0 %1059 }
 0x201   : > { %2381 = vmatpush.bf16.xpose.msrb.mxu1 %v1793_v0  ;;  %7349 = vst [vmem:[#allocation29_spill] sm:$0xff] %v5864_v63  ;;  %v733_v0 = vld [vmem:[%s4861_s18 + $0xe10] sm:$0xff]  ;;  %v5871_v14 = vpop.f32.mrf.mxu3  ;;  %v1919_v2 = vadd.f32 %v5340_v48, %v5881_v29 }
 0x202   : > { %2399 = vmatpush.bf16.xpose.msrb.mxu2 %v1817_v11  ;;  %v1814_v11 = vsel %vm1080_vm0, %v1037_v62, 0  ;;  %7350 = vst [vmem:[#allocation30_spill] sm:$0xff] %v5871_v14  ;;  %v1020_v61 = vpack.c.bf16 %v734_v6, %v733_v0  ;;  %v1028_v62 = vpack.c.bf16 %v750_v15, %v749_v33  ;;  %v1903_v6 = vadd.f32 %v5366_v4, %v5879_v28  ;;  %v732_v15 = vld [vmem:[%s4861_s18 + $0xe08] sm:$0xff] }
 0x203   : > { %2417 = vmatpush.bf16.xpose.msrb.mxu3 %v1841_v36  ;;  %v2159_v36 = vpop.f32.mrf.mxu0  ;;  %v5894_v33 = vadd.f32 %v5368_v5, %v5879_v28  ;;  %v1924_v4 = vadd.f32 %v5388_v25, %v5861_v60  ;;  %v780_v14 = vld [vmem:[%s4861_s18 + $0xf88] sm:$0xff]  ;;  %v1885_v25 = vadd.f32 %v5364_v3, %v5879_v28  ;;  %v1883_v3 = vadd.f32 %v5336_v43, %v5881_v29 }
 0x204   : > { %v1044_v36 = vpack.c.bf16 %v782_v41, %v781_v38  ;;  %v1787_v21 = vsel %vm1080_vm0, %v1028_v62, 0  ;;  %v748_v38 = vld [vmem:[%s4861_s18 + $0xe88] sm:$0xff]  ;;  %v763_v41 = vld [vmem:[%s4861_s18 + $0xf00] sm:$0xff]  ;;  %v1901_v62 = vadd.f32 %v5338_v47, %v5881_v29  ;;  %v2465_v40 = vmax.f32 %v1903_v6, 0.0 }
 0x205   : > { %v2466_v47 = vmax.f32 %v5894_v33, 0.0  ;;  %v1942_v6 = vadd.f32 %v5527_v12, %v5861_v60  ;;  %v1996_v43 = vadd.f32 %v5525_v10, %v5861_v60  ;;  %v2464_v12 = vmax.f32 %v1885_v25, 0.0 }
 0x206   : > { %v1835_v5 = vsel %vm1080_vm0, %v1044_v36, 0  ;;  %v2433_v46 = vmax.f32 %v1901_v62, 0.0 }
 0x207   : > { %v2499_v27 = vmax.f32 %v1942_v6, 0.0 }
 0x208   : > { %2364 = vmatpush.bf16.xpose.msrb.mxu0 %v1766_v39  ;;  %v1888_v39 = vadd.f32 %v5384_v22, %v5861_v60  ;;  %v2195_v0 = vpop.f32.mrf.mxu2  ;;  %v747_v22 = vld [vmem:[%s4861_s18 + $0xe80] sm:$0xff] }
 0x209   : > { %2382 = vmatpush.bf16.xpose.msrb.mxu1 %v1790_v23  ;;  %v1906_v23 = vadd.f32 %v5386_v24, %v5861_v60  ;;  %v1811_v24 = vsel %vm1080_vm0, %v1036_v26, 0  ;;  %v2213_v18 = vpop.f32.mrf.mxu3  ;;  %v2495_v26 = vmax.f32 %v1870_v59, 0.0  ;;  %v779_v0 = vld [vmem:[%s4861_s18 + $0xf80] sm:$0xff]  ;;  %v1027_v59 = vpack.c.bf16 %v748_v38, %v747_v22 }
 0x20a   : > { %2400 = vmatpush.bf16.xpose.msrb.mxu2 %v1814_v11  ;;  %v1763_v11 = vsel %vm1080_vm0, %v1020_v61, 0  ;;  %v764_v61 = vld [vmem:[%s4861_s18 + $0xf08] sm:$0xff]  ;;  %v1865_v18 = vadd.f32 %v5334_v42, %v5881_v29  ;;  %v2496_v63 = vmax.f32 %v1888_v39, 0.0  ;;  %v2498_v42 = vmax.f32 %v1924_v4, 0.0 }
 0x20b   : > { %2418 = vmatpush.bf16.xpose.msrb.mxu3 %v1838_v55  ;;  %v731_v55 = vld [vmem:[%s4861_s18 + $0xe00] sm:$0xff]  ;;  %v2497_v36 = vmax.f32 %v1906_v23, 0.0  ;;  %v1043_v31 = vpack.c.bf16 %v780_v14, %v779_v0  ;;  %v2559_v48 = vpack.c.bf16 %v2495_v26, %v2495_v26  ;;  %v2434_v23 = vmax.f32 %v1919_v2, 0.0  ;;  %s274_s18 = scalar_lea.vmem [#allocation3], %s7178_s16 }
 0x20c   : > { %v1019_v32 = vpack.c.bf16 %v732_v15, %v731_v55  ;;  %v2431_v45 = vmax.f32 %v1865_v18, 0.0  ;;  %v1960_v14 = vadd.f32 %v5529_v13, %v5861_v60  ;;  %v1784_v55 = vsel %vm1080_vm0, %v1027_v59, 0  ;;  %s4317_s21 = sshll.u32 %s274_s18, 4  ;;  %s4318_s21 = int_to_ptr.vmem [resolvable:$true] %s4317_s21 }
 0x20d   : > { %v2561_v39 = vpack.c.bf16 %v2497_v36, %v2497_v36  ;;  %v2562_v22 = vpack.c.bf16 %v2498_v42, %v2498_v42  ;;  %v2529_v13 = vpack.c.bf16 %v2465_v40, %v2433_v46  ;;  %v2530_v62 = vpack.c.bf16 %v2466_v47, %v2434_v23 }
 0x20e   : > { %v1760_v33 = vsel %vm1080_vm0, %v1019_v32, 0  ;;  %v2432_v32 = vmax.f32 %v1883_v3, 0.0  ;;  %v1973_v26 = vadd.f32 %v5470_v16, %v5881_v29  ;;  %v1937_v46 = vadd.f32 %v5474_v19, %v5881_v29 }
 0x20f   : > { %v2622_v10 = vsel %vm2614_vm1, %v2561_v39, 0  ;;  %v1939_v40 = vadd.f32 %v5507_v52, %v5879_v28  ;;  %v1955_v18 = vadd.f32 %v5476_v20, %v5881_v29  ;;  %v1975_v2 = vadd.f32 %v5503_v49, %v5879_v28  ;;  %v4700_v49 = vld [vmem:[%s7254_s1] sm:$0xff] }
 0x210   : > { %2365 = vmatpush.bf16.xpose.msrb.mxu0 %v1763_v11  ;;  %v1035_v11 = vpack.c.bf16 %v764_v61, %v763_v41  ;;  %v2502_v41 = vmax.f32 %v1996_v43, 0.0  ;;  %v2527_v61 = vpack.c.bf16 %v2463_v44, %v2431_v45  ;;  %v2528_v0 = vpack.c.bf16 %v2464_v12, %v2432_v32 }
 0x211   : > { %2383 = vmatpush.bf16.xpose.msrb.mxu1 %v1787_v21  ;;  %v2560_v21 = vpack.c.bf16 %v2496_v63, %v2496_v63  ;;  %v1832_v63 = vsel %vm1080_vm0, %v1043_v31, 0  ;;  %v2625_v31 = vsel %vm2614_vm1, %v2562_v22, 0  ;;  %v1957_v44 = vadd.f32 %v5509_v53, %v5879_v28 }
 0x212   : > { %2401 = vmatpush.bf16.xpose.msrb.mxu2 %v1811_v24  ;;  %v1978_v24 = vadd.f32 %v5523_v9, %v5861_v60  ;;  %v1808_v15 = vsel %vm1080_vm0, %v1035_v11, 0  ;;  %v2616_v9 = vsel %vm2614_vm1, %v2559_v48, 0  ;;  %v2563_v45 = vpack.c.bf16 %v2499_v27, %v2499_v27 }
 0x213   : > { %2419 = vmatpush.bf16.xpose.msrb.mxu3 %v1835_v5  ;;  %v2500_v5 = vmax.f32 %v1960_v14, 0.0  ;;  %v2619_v38 = vsel %vm2614_vm1, %v2560_v21, 0  ;;  %v1991_v16 = vadd.f32 %v5472_v17, %v5881_v29  ;;  %v1993_v19 = vadd.f32 %v5505_v50, %v5879_v28 }
 0x214   : > { %v2501_v4 = vmax.f32 %v1978_v24, 0.0  ;;  %v2566_v36 = vpack.c.bf16 %v2502_v41, %v2502_v41  ;;  %v2437_v20 = vmax.f32 %v1973_v26, 0.0  ;;  %v2435_v47 = vmax.f32 %v1937_v46, 0.0 }
 0x215   : > { %v2564_v52 = vpack.c.bf16 %v2500_v5, %v2500_v5  ;;  %v2467_v59 = vmax.f32 %v1939_v40, 0.0  ;;  %v2436_v17 = vmax.f32 %v1955_v18, 0.0  ;;  %v2469_v53 = vmax.f32 %v1975_v2, 0.0 }
 0x216   : > { %v2565_v25 = vpack.c.bf16 %v2501_v4, %v2501_v4  ;;  %v2468_v11 = vmax.f32 %v1957_v44, 0.0  ;;  %v2628_v50 = vsel %vm2614_vm1, %v2563_v45, 0  ;;  %v2438_v42 = vmax.f32 %v1991_v16, 0.0 }
 0x217   : > { %v2470_v48 = vmax.f32 %v1993_v19, 0.0  ;;  %v2631_v3 = vsel %vm2614_vm1, %v2564_v52, 0  ;;  %v2637_v39 = vsel %vm2614_vm1, %v2566_v36, 0  ;;  %v2531_v21 = vpack.c.bf16 %v2467_v59, %v2435_v47 }
 0x218   : > { %2366 = vmatpush.bf16.xpose.msrb.mxu0 %v1760_v33  ;;  %v2634_v23 = vsel %vm2614_vm1, %v2565_v25, 0  ;;  %v2532_v6 = vpack.c.bf16 %v2468_v11, %v2436_v17  ;;  %v2533_v33 = vpack.c.bf16 %v2469_v53, %v2437_v20  ;;  %v2014_v12 = vadd.f32 %v5669_v7, %v5861_v60  ;;  %v4456_v7 = vld [vmem:[%s7256_s3] sm:$0xf] }
 0x219   : > { %2384 = vmatpush.bf16.xpose.msrb.mxu1 %v1784_v55  ;;  %v2534_v24 = vpack.c.bf16 %v2470_v48, %v2438_v42  ;;  %v2050_v32 = vadd.f32 %v5665_v1, %v5861_v60  ;;  %v2032_v27 = vadd.f32 %v5671_v8, %v5861_v60  ;;  %v4527_v1 = vld [vmem:[%s7256_s3] sm:$0x10]  ;;  %v2047_v46 = vadd.f32 %v5645_v30, %v5879_v28  ;;  %v7352_v42 = vld [vmem:[#allocation17_spill] sm:$0xff] }
 0x21a   : > { %2402 = vmatpush.bf16.xpose.msrb.mxu2 %v1808_v15  ;;  %v6018_v26 = vor.u32 %v4527_v1, %v4456_v7  ;;  %v2029_v40 = vadd.f32 %v5651_v35, %v5879_v28  ;;  %v2086_v48 = vadd.f32 %v7352_v42, %v5861_v60 }
 0x21b   : > { %2420 = vmatpush.bf16.xpose.msrb.mxu3 %v1832_v63  ;;  %v2505_v8 = vmax.f32 %v2050_v32, 0.0  ;;  %v2473_v52 = vmax.f32 %v2047_v46, 0.0  ;;  %v7359_v46 = vld [vmem:[#allocation10_spill] sm:$0xff] }
 0x21c   : > { %v5968_v14 = vpop.f32.mrf.mxu0 }
 0x21d   : > { %v5970_v55 = vpop.f32.mrf.mxu1 }
 0x21f   : > { %4446 = vmatmul.msk.bf16.vlgmr.msrb.gmra.mxu0 %vm1080_vm0, %v4700_v49 }
 0x220   : > { %2717 = vmatpush.bf16.msra.mxu0 %v2616_v9  ;;  %4448 = vmatmul.msk.bf16.vlgmr.msrb.gmra.mxu1 %vm1080_vm0, %v4700_v49  ;;  %v2068_v9 = vadd.f32 %v5667_v58, %v5861_v60  ;;  %v2045_v58 = vadd.f32 %v5614_v51, %v5881_v29  ;;  %v2063_v51 = vadd.f32 %v5616_v54, %v5881_v29  ;;  %v2472_v54 = vmax.f32 %v2029_v40, 0.0 }
 0x221   : > { %2731 = vmatpush.bf16.msra.mxu1 %v2619_v38  ;;  %4450 = vmatmul.msk.bf16.vlgmr.msrb.gmra.mxu2 %vm1080_vm0, %v4700_v49  ;;  %v2503_v38 = vmax.f32 %v2014_v12, 0.0  ;;  %v7355_v12 = vld [vmem:[#allocation16_spill] sm:$0xff]  ;;  %v2099_v40 = vadd.f32 %v7359_v46, %v5881_v29 }
 0x222   : > { %2745 = vmatpush.bf16.msra.mxu2 %v2622_v10  ;;  %4452 = vmatmul.msk.bf16.vlgmr.msrb.gmra.mxu3 %vm1080_vm0, %v4700_v49  ;;  %v2504_v10 = vmax.f32 %v2032_v27, 0.0  ;;  %v2506_v41 = vmax.f32 %v2068_v9, 0.0  ;;  %v2441_v45 = vmax.f32 %v2045_v58, 0.0  ;;  %v2442_v47 = vmax.f32 %v2063_v51, 0.0 }
 0x223   : > { %2759 = vmatpush.bf16.msra.mxu3 %v2625_v31  ;;  %v2009_v31 = vadd.f32 %v5618_v56, %v5881_v29  ;;  %v7351_v56 = vld [vmem:[#allocation6_spill] sm:$0xff]  ;;  %v2140_v32 = vadd.f32 %v7355_v12, %v5861_v60  ;;  %v7366_v12 = vld [vmem:[#allocation29_spill] sm:$0xff] }
 0x224   : > { %2718 = vmatpush.bf16.msra.mxu0 %v2527_v61  ;;  %v5972_v15 = vpop.f32.mrf.mxu2  ;;  %v5978_v43 = vpop.f32.mrf.mxu0  ;;  %v2027_v61 = vadd.f32 %v5620_v57, %v5881_v29  ;;  %v2065_v18 = vadd.f32 %v7351_v56, %v5879_v28  ;;  %v2569_v57 = vpack.c.bf16 %v2505_v8, %v2505_v8  ;;  %v2568_v2 = vpack.c.bf16 %v2504_v10, %v2504_v10  ;;  %v7356_v10 = vld [vmem:[#allocation7_spill] sm:$0xff]  ;;  %v7361_v56 = vld [vmem:[#allocation14_spill] sm:$0xff] }
 0x225   : > { %2732 = vmatpush.bf16.msra.mxu1 %v2528_v0  ;;  %v5976_v22 = vpop.f32.mrf.mxu3  ;;  %v5984_v63 = vpop.f32.mrf.mxu1  ;;  %v2567_v0 = vpack.c.bf16 %v2503_v38, %v2503_v38  ;;  %v2570_v44 = vpack.c.bf16 %v2506_v41, %v2506_v41  ;;  %v2439_v16 = vmax.f32 %v2009_v31, 0.0  ;;  %v2507_v38 = vmax.f32 %v2086_v48, 0.0  ;;  %v7357_v41 = vld [vmem:[#allocation9_spill] sm:$0xff] }
 0x226   : > { %2746 = vmatpush.bf16.msra.mxu2 %v2529_v13  ;;  %v2440_v25 = vmax.f32 %v2027_v61, 0.0  ;;  %v2474_v59 = vmax.f32 %v2065_v18, 0.0  ;;  %v2643_v49 = vsel %vm2614_vm1, %v2568_v2, 0  ;;  %v2646_v17 = vsel %vm2614_vm1, %v2569_v57, 0  ;;  %v7358_v61 = vld [vmem:[#allocation13_spill] sm:$0xff]  ;;  %v7362_v2 = vld [vmem:[#allocation8_spill] sm:$0xff] }
 0x227   : > { %2760 = vmatpush.bf16.msra.mxu3 %v2530_v62  ;;  %v2011_v62 = vadd.f32 %v5649_v34, %v5879_v28  ;;  %v2640_v36 = vsel %vm2614_vm1, %v2567_v0, 0  ;;  %v2649_v53 = vsel %vm2614_vm1, %v2570_v44, 0  ;;  %v2510_v8 = vmax.f32 %v2140_v32, 0.0  ;;  %v7360_v0 = vld [vmem:[#allocation11_spill] sm:$0xff] }
 0x228   : > { %2773 = vmatpush.bf16.msrb.mxu0 %v2628_v50  ;;  %v2593_v50 = vld [vmem:[%s7257_s4] sm:$0xff]  ;;  %v2117_v58 = vadd.f32 %v7356_v10, %v5881_v29  ;;  %v2081_v31 = vadd.f32 %v7357_v41, %v5881_v29  ;;  %v2119_v51 = vadd.f32 %v7360_v0, %v5879_v28  ;;  %v2101_v18 = vadd.f32 %v7361_v56, %v5879_v28 }
 0x229   : > { %2787 = vmatpush.bf16.msrb.mxu1 %v2631_v3  ;;  %v2471_v19 = vmax.f32 %v2011_v62, 0.0  ;;  %v2536_v3 = vpack.c.bf16 %v2472_v54, %v2440_v25  ;;  %2597 = vperm.xlu2 %4570, %v2593_v50   ;;  %v2083_v62 = vadd.f32 %v7358_v61, %v5879_v28  ;;  %v2571_v57 = vpack.c.bf16 %v2507_v38, %v2507_v38 }
 0x22a   : > { %2801 = vmatpush.bf16.msrb.mxu2 %v2634_v23  ;;  %v2537_v23 = vpack.c.bf16 %v2473_v52, %v2441_v45  ;;  %v2135_v44 = vadd.f32 %v7362_v2, %v5881_v29  ;;  %v7363_v45 = vld [vmem:[#allocation12_spill] sm:$0xff]  ;;  %v2574_v25 = vpack.c.bf16 %v2510_v8, %v2510_v8  ;;  %v2445_v52 = vmax.f32 %v2117_v58, 0.0  ;;  %v7368_v58 = vld [vmem:[#allocation19_spill] sm:$0xff] }
 0x22b   : > { %2815 = vmatpush.bf16.msrb.mxu3 %v2637_v39  ;;  %v2535_v11 = vpack.c.bf16 %v2471_v19, %v2439_v16  ;;  %v7353_v39 = vld [vmem:[#allocation18_spill] sm:$0xff]  ;;  %v2137_v16 = vadd.f32 %v7363_v45, %v5879_v28  ;;  %v2443_v54 = vmax.f32 %v2081_v31, 0.0  ;;  %v2194_v32 = vadd.f32 %v7366_v12, %v5861_v60  ;;  %v7369_v31 = vld [vmem:[#allocation20_spill] sm:$0xff] }
 0x22c   : > { %2774 = vmatpush.bf16.msrb.mxu0 %v2531_v21  ;;  %v5996_v13 = vpop.f32.mrf.mxu2  ;;  %v6000_v5 = vpop.f32.mrf.mxu0  ;;  %v2104_v21 = vadd.f32 %v7353_v39, %v5861_v60  ;;  %v2661_v48 = vsel %vm2614_vm1, %v2574_v25, 0  ;;  %v2153_v41 = vadd.f32 %v7368_v58, %v5881_v29  ;;  %v2171_v61 = vadd.f32 %v7369_v31, %v5881_v29 }
 0x22d   : > { %2788 = vmatpush.bf16.msrb.mxu1 %v2532_v6  ;;  %v5998_v4 = vpop.f32.mrf.mxu3  ;;  %v7354_v6 = vld [vmem:[#allocation15_spill] sm:$0xff]  ;;  %v2513_v8 = vmax.f32 %v2194_v32, 0.0  ;;  %v2243_v58 = vadd.f32 %v5970_v55, %v5881_v29  ;;  %v2245_v31 = vadd.f32 %v5984_v63, %v5879_v28 }
 0x22e   : > { %2802 = vmatpush.bf16.msrb.mxu2 %v2533_v33  ;;  %v2122_v33 = vadd.f32 %v7354_v6, %v5861_v60  ;;  %v2508_v7 = vmax.f32 %v2104_v21, 0.0 }
 0x22f   : > { %2816 = vmatpush.bf16.msrb.mxu3 %v2534_v24  ;;  %4447 = vmatmul.msk.bf16.gmra.mxu0 %vm1080_vm0, %v5100_v37  ;;  %v2538_v24 = vpack.c.bf16 %v2474_v59, %v2442_v47  ;;  %v2477_v47 = vmax.f32 %v2119_v51, 0.0  ;;  %v2476_v59 = vmax.f32 %v2101_v18, 0.0  ;;  %v7372_v51 = vld [vmem:[#allocation24_spill] sm:$0xff]  ;;  %v7373_v18 = vld [vmem:[#allocation25_spill] sm:$0xff]  ;;  %v2577_v25 = vpack.c.bf16 %v2513_v8, %v2513_v8 }
 0x230   : > { %4449 = vmatmul.msk.bf16.gmra.mxu1 %vm1080_vm0, %v5100_v37  ;;  %v2509_v1 = vmax.f32 %v2122_v33, 0.0  ;;  %v2572_v19 = vpack.c.bf16 %v2508_v7, %v2508_v7  ;;  %v7365_v33 = vld [vmem:[#allocation28_spill] sm:$0xff]  ;;  %v2173_v56 = vadd.f32 %v7372_v51, %v5879_v28  ;;  %v2452_v51 = vmax.f32 %v2243_v58, 0.0 }
 0x231   : > { %4451 = vmatmul.msk.bf16.gmra.mxu2 %vm1080_vm0, %v5100_v37  ;;  %v2541_v6 = vpack.c.bf16 %v2477_v47, %v2445_v52  ;;  %v2484_v63 = vmax.f32 %v2245_v31, 0.0 }
 0x232   : > { %4453 = vmatmul.msk.bf16.gmra.mxu3 %vm1080_vm0, %v5100_v37  ;;  %v6002_v37 = vpop.f32.mrf.mxu1  ;;  %v2655_v50 = vsel %vm2614_vm1, %v2572_v19, 0 }
 0x234   : > { %v6028_v34 = vpop.f32.mrf.mxu2  ;;  %v2231_v35 = vpop.f32.mrf.mxu0 }
 0x235   : > { %v6032_v30 = vpop.f32.mrf.mxu3  ;;  %v2573_v35 = vpack.c.bf16 %v2509_v1, %v2509_v1  ;;  %v2266_v12 = vadd.f32 %v6028_v34, %v5861_v60  ;;  %v2225_v34 = vadd.f32 %v5968_v14, %v5881_v29  ;;  %v2281_v14 = vadd.f32 %v5998_v4, %v5879_v28 }
 0x237   : > { %v2658_v42 = vsel %vm2614_vm1, %v2573_v35, 0 }
 0x23a   : > { %v2249_v20 = vpop.f32.mrf.mxu1 }
 0x23b   : > { %v2444_v20 = vmax.f32 %v2099_v40, 0.0  ;;  %v7371_v40 = vld [vmem:[#allocation21_spill] sm:$0xff] }
 0x23c   : > { %v2267_v27 = vpop.f32.mrf.mxu2  ;;  %v2189_v0 = vadd.f32 %v7371_v40, %v5881_v29 }
 0x23d   : > { %v2285_v9 = vpop.f32.mrf.mxu3  ;;  %v2540_v21 = vpack.c.bf16 %v2476_v59, %v2444_v20  ;;  %v2480_v59 = vmax.f32 %v2173_v56, 0.0 }
 0x23e   : > { %v7367_v9 = vld [vmem:[#allocation30_spill] sm:$0xff]  ;;  %v2449_v47 = vmax.f32 %v2189_v0, 0.0 }
 0x23f   : > { %4458 = vmatmul.msk.bf16.vlgmr.msra.gmra.mxu0 %vm2610_vm2, %v6018_v26  ;;  %v2212_v38 = vadd.f32 %v7367_v9, %v5861_v60 }
 0x240   : > { %4459 = vmatmul.msk.bf16.vlgmr.msra.gmra.mxu1 %vm2610_vm2, %v6018_v26  ;;  %2829 = vmatpush.bf16.msra.mxu0 %v2640_v36  ;;  %v2475_v36 = vmax.f32 %v2083_v62, 0.0  ;;  %v7370_v62 = vld [vmem:[#allocation23_spill] sm:$0xff] }
 0x241   : > { %4460 = vmatmul.msk.bf16.vlgmr.msra.gmra.mxu2 %vm2610_vm2, %v6018_v26  ;;  %2843 = vmatpush.bf16.msra.mxu1 %v2643_v49  ;;  %v2652_v49 = vsel %vm2614_vm1, %v2571_v57, 0  ;;  %v2514_v10 = vmax.f32 %v2212_v38, 0.0  ;;  %v2155_v46 = vadd.f32 %v7370_v62, %v5879_v28  ;;  %v2191_v57 = vadd.f32 %v7373_v18, %v5879_v28 }
 0x242   : > { %4461 = vmatmul.msk.bf16.vlgmr.msra.gmra.mxu3 %vm2610_vm2, %v6018_v26  ;;  %2857 = vmatpush.bf16.msra.mxu2 %v2646_v17  ;;  %v3224_v17 = vld [vmem:[%s7258_s5 + $0x8] sm:$0x3] }
 0x243   : > { %2871 = vmatpush.bf16.msra.mxu3 %v2649_v53  ;;  %v2446_v53 = vmax.f32 %v2135_v44, 0.0  ;;  %3232 = vperm.xlu2 %4570, %v3224_v17   ;;  %v7374_v44 = vld [vmem:[#allocation22_spill] sm:$0xff]  ;;  %v2578_v52 = vpack.c.bf16 %v2514_v10, %v2514_v10  ;;  %v2479_v20 = vmax.f32 %v2155_v46, 0.0  ;;  %v2279_v46 = vadd.f32 %v5976_v22, %v5881_v29 }
 0x244   : > { %2830 = vmatpush.bf16.msra.mxu0 %v2535_v11  ;;  %v2478_v11 = vmax.f32 %v2137_v16, 0.0  ;;  %v2207_v45 = vadd.f32 %v7374_v44, %v5881_v29  ;;  %v7375_v16 = vld [vmem:[#allocation26_spill] sm:$0xff] }
 0x245   : > { %2844 = vmatpush.bf16.msra.mxu1 %v2536_v3  ;;  %v2539_v3 = vpack.c.bf16 %v2475_v36, %v2443_v54  ;;  %v2209_v19 = vadd.f32 %v7375_v16, %v5879_v28  ;;  %v2447_v54 = vmax.f32 %v2153_v41, 0.0  ;;  %v2448_v36 = vmax.f32 %v2171_v61, 0.0 }
 0x246   : > { %2858 = vmatpush.bf16.msra.mxu2 %v2537_v23  ;;  %v7364_v23 = vld [vmem:[#allocation27_spill] sm:$0xff]  ;;  %v2542_v27 = vpack.c.bf16 %v2478_v11, %v2446_v53  ;;  %v2450_v53 = vmax.f32 %v2207_v45, 0.0  ;;  %v2261_v41 = vadd.f32 %v5972_v15, %v5881_v29  ;;  %v2263_v61 = vadd.f32 %v5996_v13, %v5879_v28 }
 0x247   : > { %2872 = vmatpush.bf16.msra.mxu3 %v2538_v24  ;;  %v2158_v39 = vadd.f32 %v7364_v23, %v5861_v60  ;;  %v2176_v24 = vadd.f32 %v7365_v33, %v5861_v60  ;;  %v2482_v11 = vmax.f32 %v2209_v19, 0.0  ;;  %v2454_v4 = vmax.f32 %v2279_v46, 0.0 }
 0x248   : > { %v2453_v15 = vmax.f32 %v2261_v41, 0.0  ;;  %v2485_v18 = vmax.f32 %v2263_v61, 0.0 }
 0x249   : > { %v2511_v7 = vmax.f32 %v2158_v39, 0.0  ;;  %v2512_v1 = vmax.f32 %v2176_v24, 0.0  ;;  %v2543_v39 = vpack.c.bf16 %v2479_v20, %v2447_v54  ;;  %v2248_v24 = vadd.f32 %v6002_v37, %v5861_v60 }
 0x24a   : > { %v2546_v32 = vpack.c.bf16 %v2482_v11, %v2450_v53  ;;  %v2548_v54 = vpack.c.bf16 %v2484_v63, %v2452_v51 }
 0x24b   : > { %v2575_v2 = vpack.c.bf16 %v2511_v7, %v2511_v7  ;;  %v2576_v35 = vpack.c.bf16 %v2512_v1, %v2512_v1  ;;  %v2517_v7 = vmax.f32 %v2266_v12, 0.0 }
 0x24d   : > { %v2664_v17 = vsel %vm2614_vm1, %v2575_v2, 0  ;;  %v2581_v40 = vpack.c.bf16 %v2517_v7, %v2517_v7 }
 0x24f   : > { %4462 = vmatmul.msk.bf16.vlgmr.msrb.gmra.mxu0 %vm2610_vm2, %v6018_v26  ;;  %v2682_v44 = vsel %vm2614_vm1, %v2581_v40, 0 }
 0x250   : > { %4463 = vmatmul.msk.bf16.vlgmr.msrb.gmra.mxu1 %vm2610_vm2, %v6018_v26  ;;  %2885 = vmatpush.bf16.msrb.mxu0 %v2652_v49  ;;  %v2481_v49 = vmax.f32 %v2191_v57, 0.0  ;;  %v2486_v57 = vmax.f32 %v2281_v14, 0.0 }
 0x251   : > { %4464 = vmatmul.msk.bf16.vlgmr.msrb.gmra.mxu2 %vm2610_vm2, %v6018_v26  ;;  %2899 = vmatpush.bf16.msrb.mxu1 %v2655_v50  ;;  %v2667_v50 = vsel %vm2614_vm1, %v2576_v35, 0 }
 0x252   : > { %4465 = vmatmul.msk.bf16.vlgmr.msrb.gmra.mxu3 %vm2610_vm2, %v6018_v26  ;;  %2913 = vmatpush.bf16.msrb.mxu2 %v2658_v42  ;;  %v2670_v42 = vsel %vm2614_vm1, %v2577_v25, 0  ;;  %v2545_v33 = vpack.c.bf16 %v2481_v49, %v2449_v47  ;;  %v2550_v47 = vpack.c.bf16 %v2486_v57, %v2454_v4 }
 0x253   : > { %2927 = vmatpush.bf16.msrb.mxu3 %v2661_v48 }
 0x254   : > { %2886 = vmatpush.bf16.msrb.mxu0 %v2539_v3  ;;  %v2673_v3 = vsel %vm2614_vm1, %v2578_v52, 0 }
 0x255   : > { %2900 = vmatpush.bf16.msrb.mxu1 %v2540_v21  ;;  %v2230_v21 = vadd.f32 %v6000_v5, %v5861_v60  ;;  %v2516_v5 = vmax.f32 %v2248_v24, 0.0 }
 0x256   : > { %2914 = vmatpush.bf16.msrb.mxu2 %v2541_v6  ;;  %v2544_v6 = vpack.c.bf16 %v2480_v59, %v2448_v36  ;;  %v2549_v36 = vpack.c.bf16 %v2485_v18, %v2453_v15 }
 0x257   : > { %2928 = vmatpush.bf16.msrb.mxu3 %v2542_v27  ;;  %v2284_v27 = vadd.f32 %v6032_v30, %v5861_v60  ;;  %v2515_v9 = vmax.f32 %v2230_v21, 0.0  ;;  %v2227_v30 = vadd.f32 %v5978_v43, %v5879_v28  ;;  %v2580_v55 = vpack.c.bf16 %v2516_v5, %v2516_v5 }
 0x258   : > { %v2451_v43 = vmax.f32 %v2225_v34, 0.0 }
 0x259   : > { %v2518_v37 = vmax.f32 %v2284_v27, 0.0  ;;  %v2579_v62 = vpack.c.bf16 %v2515_v9, %v2515_v9  ;;  %v2483_v56 = vmax.f32 %v2227_v30, 0.0  ;;  %v2679_v2 = vsel %vm2614_vm1, %v2580_v55, 0 }
 0x25b   : > { %v2582_v0 = vpack.c.bf16 %v2518_v37, %v2518_v37  ;;  %v2676_v22 = vsel %vm2614_vm1, %v2579_v62, 0  ;;  %v2547_v25 = vpack.c.bf16 %v2483_v56, %v2451_v43 }
 0x25c   : > { %v6121_v48 = vpop.f32.mrf.mxu0 }
 0x25d   : > { %v6124_v23 = vpop.f32.mrf.mxu1  ;;  %v2685_v19 = vsel %vm2614_vm1, %v2582_v0, 0 }
 0x25e   : > { %v2315_v7 = vadd.f32 %v6124_v23, %v5881_v29 }
 0x25f   : > { %4466 = vmatmul.msk.bf16.vlgmr.msra.gmra.mxu0 %vm2610_vm2, %v6018_v26 }
 0x260   : > { %4467 = vmatmul.msk.bf16.vlgmr.msra.gmra.mxu1 %vm2610_vm2, %v6018_v26  ;;  %2941 = vmatpush.bf16.msra.mxu0 %v2664_v17  ;;  %v2456_v46 = vmax.f32 %v2315_v7, 0.0 }
 0x261   : > { %4468 = vmatmul.msk.bf16.vlgmr.msra.gmra.mxu2 %vm2610_vm2, %v6018_v26  ;;  %2955 = vmatpush.bf16.msra.mxu1 %v2667_v50 }
 0x262   : > { %4469 = vmatmul.msk.bf16.vlgmr.msra.gmra.mxu3 %vm2610_vm2, %v6018_v26  ;;  %2969 = vmatpush.bf16.msra.mxu2 %v2670_v42 }
 0x263   : > { %2983 = vmatpush.bf16.msra.mxu3 %v2673_v3 }
 0x264   : > { %2942 = vmatpush.bf16.msra.mxu0 %v2543_v39  ;;  %v6134_v38 = vpop.f32.mrf.mxu2  ;;  %v2298_v8 = vpop.f32.mrf.mxu0 }
 0x265   : > { %2956 = vmatpush.bf16.msra.mxu1 %v2544_v6  ;;  %v6136_v1 = vpop.f32.mrf.mxu3  ;;  %v2316_v10 = vpop.f32.mrf.mxu1  ;;  %v2299_v39 = vadd.f32 %v2298_v8, %v5879_v28  ;;  %v2333_v8 = vadd.f32 %v6134_v38, %v5881_v29 }
 0x266   : > { %2970 = vmatpush.bf16.msra.mxu2 %v2545_v33  ;;  %v2317_v6 = vadd.f32 %v2316_v10, %v5879_v28  ;;  %v2351_v10 = vadd.f32 %v6136_v1, %v5881_v29 }
 0x267   : > { %2984 = vmatpush.bf16.msra.mxu3 %v2546_v32  ;;  %v2297_v32 = vadd.f32 %v6121_v48, %v5881_v29  ;;  %v2487_v34 = vmax.f32 %v2299_v39, 0.0  ;;  %v2457_v14 = vmax.f32 %v2333_v8, 0.0 }
 0x268   : > { %v2488_v58 = vmax.f32 %v2317_v6, 0.0  ;;  %v2458_v55 = vmax.f32 %v2351_v10, 0.0 }
 0x269   : > { %v2455_v1 = vmax.f32 %v2297_v32, 0.0 }
 0x26a   : > { %v2552_v0 = vpack.c.bf16 %v2488_v58, %v2456_v46  ;;  %v6235_v46 = vpop.permute.xlu1 %2602 }
 0x26b   : > { %v2551_v40 = vpack.c.bf16 %v2487_v34, %v2455_v1 }
 0x26c   : > { %v2334_v13 = vpop.f32.mrf.mxu2  ;;  %v2301_v16 = vpop.f32.mrf.mxu0 }
 0x26d   : > { %v2352_v45 = vpop.f32.mrf.mxu3  ;;  %v2319_v35 = vpop.f32.mrf.mxu1  ;;  %v2302_v52 = vadd.f32 %v2301_v16, %v5861_v60  ;;  %v2335_v33 = vadd.f32 %v2334_v13, %v5879_v28 }
 0x26e   : > { %v2320_v20 = vadd.f32 %v2319_v35, %v5861_v60  ;;  %v2353_v27 = vadd.f32 %v2352_v45, %v5879_v28 }
 0x26f   : > { %4470 = vmatmul.msk.bf16.vlgmr.msrb.gmra.mxu0 %vm2610_vm2, %v6018_v26  ;;  %v2519_v59 = vmax.f32 %v2302_v52, 0.0  ;;  %v2489_v30 = vmax.f32 %v2335_v33, 0.0 }
 0x270   : > { %4471 = vmatmul.msk.bf16.vlgmr.msrb.gmra.mxu1 %vm2610_vm2, %v6018_v26  ;;  %2997 = vmatpush.bf16.msrb.mxu0 %v2676_v22  ;;  %v2520_v17 = vmax.f32 %v2320_v20, 0.0  ;;  %v2490_v31 = vmax.f32 %v2353_v27, 0.0 }
 0x271   : > { %4472 = vmatmul.msk.bf16.vlgmr.msrb.gmra.mxu2 %vm2610_vm2, %v6018_v26  ;;  %3011 = vmatpush.bf16.msrb.mxu1 %v2679_v2  ;;  %v2583_v24 = vpack.c.bf16 %v2519_v59, %v2519_v59  ;;  %v2553_v43 = vpack.c.bf16 %v2489_v30, %v2457_v14 }
 0x272   : > { %4473 = vmatmul.msk.bf16.vlgmr.msrb.gmra.mxu3 %vm2610_vm2, %v6018_v26  ;;  %3025 = vmatpush.bf16.msrb.mxu2 %v2682_v44  ;;  %v2584_v9 = vpack.c.bf16 %v2520_v17, %v2520_v17  ;;  %v2554_v51 = vpack.c.bf16 %v2490_v31, %v2458_v55 }
 0x273   : > { %3039 = vmatpush.bf16.msrb.mxu3 %v2685_v19  ;;  %v2688_v23 = vsel %vm2614_vm1, %v2583_v24, 0 }
 0x274   : > { %2998 = vmatpush.bf16.msrb.mxu0 %v2547_v25  ;;  %v2337_v49 = vpop.f32.mrf.mxu2  ;;  %v2303_v50 = vpop.f32.mrf.mxu0  ;;  %v2691_v61 = vsel %vm2614_vm1, %v2584_v9, 0 }
 0x275   : > { %3012 = vmatpush.bf16.msrb.mxu1 %v2548_v54  ;;  %v2338_v53 = vadd.f32 %v2337_v49, %v5861_v60  ;;  %v2355_v11 = vpop.f32.mrf.mxu3  ;;  %v2321_v3 = vpop.f32.mrf.mxu1 }
 0x276   : > { %3026 = vmatpush.bf16.msrb.mxu2 %v2549_v36  ;;  %v2356_v42 = vadd.f32 %v2355_v11, %v5861_v60 }
 0x277   : > { %3040 = vmatpush.bf16.msrb.mxu3 %v2550_v47  ;;  %v2521_v21 = vmax.f32 %v2338_v53, 0.0 }
 0x278   : > { %v2522_v12 = vmax.f32 %v2356_v42, 0.0 }
 0x279   : > { %v2585_v5 = vpack.c.bf16 %v2521_v21, %v2521_v21 }
 0x27a   : > { %v2586_v37 = vpack.c.bf16 %v2522_v12, %v2522_v12 }
 0x27b   : > { %v2694_v48 = vsel %vm2614_vm1, %v2585_v5, 0 }
 0x27c   : > { %v2697_v38 = vsel %vm2614_vm1, %v2586_v37, 0  ;;  %v2339_v41 = vpop.f32.mrf.mxu2 }
 0x27d   : > { %v2357_v62 = vpop.f32.mrf.mxu3 }
 0x27f   : > { %4474 = vmatmul.msk.bf16.vlgmr.msra.gmra.mxu0 %vm2610_vm2, %v6018_v26 }
 0x280   : > { %4475 = vmatmul.msk.bf16.vlgmr.msra.gmra.mxu1 %vm2610_vm2, %v6018_v26  ;;  %3053 = vmatpush.bf16.msra.mxu0 %v2688_v23 }
 0x281   : > { %4476 = vmatmul.msk.bf16.vlgmr.msra.gmra.mxu2 %vm2610_vm2, %v6018_v26  ;;  %3067 = vmatpush.bf16.msra.mxu1 %v2691_v61 }
 0x282   : > { %4477 = vmatmul.msk.bf16.vlgmr.msra.gmra.mxu3 %vm2610_vm2, %v6018_v26  ;;  %3081 = vmatpush.bf16.msra.mxu2 %v2694_v48 }
 0x283   : > { %3095 = vmatpush.bf16.msra.mxu3 %v2697_v38  ;;  %v6230_v61 = vpop.permute.xlu2 %2597 }
 0x284   : > { %3054 = vmatpush.bf16.msra.mxu0 %v2551_v40 }
 0x285   : > { %3068 = vmatpush.bf16.msra.mxu1 %v2552_v0 }
 0x286   : > { %3082 = vmatpush.bf16.msra.mxu2 %v2553_v43 }
 0x287   : > { %3096 = vmatpush.bf16.msra.mxu3 %v2554_v51 }
 0x28f   : > { %4478 = vmatmul.msk.bf16.vlgmr.msrb.gmra.mxu0 %vm2610_vm2, %v6018_v26 }
 0x290   : > { %4479 = vmatmul.msk.bf16.vlgmr.msrb.gmra.mxu1 %vm2610_vm2, %v6018_v26 }
 0x291   : > { %4480 = vmatmul.msk.bf16.vlgmr.msrb.gmra.mxu2 %vm2610_vm2, %v6018_v26 }
 0x292   : > { %4481 = vmatmul.msk.bf16.vlgmr.msrb.gmra.mxu3 %vm2610_vm2, %v6018_v26 }
 0x29c   : > { %v2368_v56 = vpop.f32.mrf.mxu0 }
 0x29d   : > { %v2386_v15 = vpop.f32.mrf.mxu1  ;;  %v2369_v52 = vadd.f32 %v2368_v56, %v5881_v29 }
 0x29e   : > { %v2387_v36 = vadd.f32 %v2386_v15, %v5881_v29 }
 0x29f   : > { %4482 = vmatmul.msk.bf16.vlgmr.msra.gmra.mxu0 %vm2610_vm2, %v6018_v26  ;;  %v2459_v11 = vmax.f32 %v2369_v52, 0.0 }
 0x2a0   : > { %4483 = vmatmul.msk.bf16.vlgmr.msra.gmra.mxu1 %vm2610_vm2, %v6018_v26  ;;  %v2460_v21 = vmax.f32 %v2387_v36, 0.0 }
 0x2a1   : > { %4484 = vmatmul.msk.bf16.vlgmr.msra.gmra.mxu2 %vm2610_vm2, %v6018_v26 }
 0x2a2   : > { %4485 = vmatmul.msk.bf16.vlgmr.msra.gmra.mxu3 %vm2610_vm2, %v6018_v26 }
 0x2a4   : > { %v2404_v63 = vpop.f32.mrf.mxu2  ;;  %v2370_v22 = vpop.f32.mrf.mxu0 }
 0x2a5   : > { %v2422_v18 = vpop.f32.mrf.mxu3  ;;  %v2388_v13 = vpop.f32.mrf.mxu1  ;;  %v2371_v16 = vadd.f32 %v2370_v22, %v5879_v28  ;;  %v2405_v9 = vadd.f32 %v2404_v63, %v5881_v29 }
 0x2a6   : > { %v2389_v35 = vadd.f32 %v2388_v13, %v5879_v28  ;;  %v2423_v8 = vadd.f32 %v2422_v18, %v5881_v29  ;;  %v6242_v63 = vpop.permute.xlu2 %3232 }
 0x2a7   : > { %v2491_v47 = vmax.f32 %v2371_v16, 0.0  ;;  %v2461_v58 = vmax.f32 %v2405_v9, 0.0 }
 0x2a8   : > { %v2492_v49 = vmax.f32 %v2389_v35, 0.0  ;;  %v2462_v23 = vmax.f32 %v2423_v8, 0.0 }
 0x2a9   : > { %v2555_v12 = vpack.c.bf16 %v2491_v47, %v2459_v11 }
 0x2aa   : > { %v2556_v5 = vpack.c.bf16 %v2492_v49, %v2460_v21 }
 0x2ac   : > { %v2406_v4 = vpop.f32.mrf.mxu2  ;;  %v2373_v2 = vpop.f32.mrf.mxu0 }
 0x2ad   : > { %v2424_v57 = vpop.f32.mrf.mxu3  ;;  %v2374_v44 = vadd.f32 %v2373_v2, %v5861_v60  ;;  %v2391_v45 = vpop.f32.mrf.mxu1  ;;  %v2407_v6 = vadd.f32 %v2406_v4, %v5879_v28 }
 0x2ae   : > { %v2392_v19 = vadd.f32 %v2391_v45, %v5861_v60  ;;  %v2425_v32 = vadd.f32 %v2424_v57, %v5879_v28  ;;  %v6244_v4 = vpop.permute.xlu0 %3227 }
 0x2af   : > { %v2523_v25 = vmax.f32 %v2374_v44, 0.0  ;;  %v2493_v10 = vmax.f32 %v2407_v6, 0.0 }
 0x2b0   : > { %v2524_v54 = vmax.f32 %v2392_v19, 0.0  ;;  %v2494_v48 = vmax.f32 %v2425_v32, 0.0 }
 0x2b1   : > { %v2587_v20 = vpack.c.bf16 %v2523_v25, %v2523_v25  ;;  %v2557_v41 = vpack.c.bf16 %v2493_v10, %v2461_v58 }
 0x2b2   : > { %v2588_v59 = vpack.c.bf16 %v2524_v54, %v2524_v54  ;;  %v2558_v31 = vpack.c.bf16 %v2494_v48, %v2462_v23 }
 0x2b3   : > { %v2700_v53 = vsel %vm2614_vm1, %v2587_v20, 0 }
 0x2b4   : > { %v2409_v17 = vpop.f32.mrf.mxu2  ;;  %v2375_v3 = vpop.f32.mrf.mxu0  ;;  %3109 = vmatpush.bf16.msrb.mxu0 %v2700_v53  ;;  %v2703_v39 = vsel %vm2614_vm1, %v2588_v59, 0 }
 0x2b5   : > { %v2410_v50 = vadd.f32 %v2409_v17, %v5861_v60  ;;  %v2427_v42 = vpop.f32.mrf.mxu3  ;;  %v2393_v24 = vpop.f32.mrf.mxu1  ;;  %3123 = vmatpush.bf16.msrb.mxu1 %v2703_v39 }
 0x2b6   : > { %v2428_v33 = vadd.f32 %v2427_v42, %v5861_v60 }
 0x2b7   : > { %v2525_v27 = vmax.f32 %v2410_v50, 0.0 }
 0x2b8   : > { %v2526_v7 = vmax.f32 %v2428_v33, 0.0  ;;  %3110 = vmatpush.bf16.msrb.mxu0 %v2555_v12 }
 0x2b9   : > { %v2589_v37 = vpack.c.bf16 %v2525_v27, %v2525_v27  ;;  %3124 = vmatpush.bf16.msrb.mxu1 %v2556_v5 }
 0x2ba   : > { %v2590_v34 = vpack.c.bf16 %v2526_v7, %v2526_v7 }
 0x2bb   : > { %v2706_v60 = vsel %vm2614_vm1, %v2589_v37, 0  ;;  %4486 = vmatmul.msk.bf16.vlgmr.msrb.gmra.mxu0 %vm2610_vm2, %v6018_v26 }
 0x2bc   : > { %v2411_v30 = vpop.f32.mrf.mxu2  ;;  %3137 = vmatpush.bf16.msrb.mxu2 %v2706_v60  ;;  %v2709_v28 = vsel %vm2614_vm1, %v2590_v34, 0  ;;  %4487 = vmatmul.msk.bf16.vlgmr.msrb.gmra.mxu1 %vm2610_vm2, %v6018_v26  ;;  %v2720_v29 = vpop.f32.mrf.mxu0 }
 0x2bd   : > { %v2429_v38 = vpop.f32.mrf.mxu3  ;;  %3151 = vmatpush.bf16.msrb.mxu3 %v2709_v28  ;;  %v2734_v1 = vpop.f32.mrf.mxu1  ;;  %v2721_v62 = vadd.f32 %v2720_v29, %v6230_v61 }
 0x2be   : > { %v2735_v14 = vadd.f32 %v2734_v1, %v6230_v61  ;;  %v3559_v30 = vpop.permute.xlu1 %3558 }
 0x2bf   : > { %v3159_v56 = vmax.f32 %v2721_v62, 0.0 }
 0x2c0   : > { %3138 = vmatpush.bf16.msrb.mxu2 %v2557_v41  ;;  %v3160_v18 = vmax.f32 %v2735_v14, 0.0 }
 0x2c1   : > { %3152 = vmatpush.bf16.msrb.mxu3 %v2558_v31  ;;  %v3235_v2 = vmul.f32 %v6244_v4, %v3159_v56 }
 0x2c2   : > { %v3236_v16 = vmul.f32 %v6244_v4, %v3160_v18 }
 0x2c3   : > { %4488 = vmatmul.msk.bf16.vlgmr.msrb.gmra.mxu2 %vm2610_vm2, %v6018_v26 }
 0x2c4   : > { %4489 = vmatmul.msk.bf16.vlgmr.msrb.gmra.mxu3 %vm2610_vm2, %v6018_v26  ;;  %v2748_v55 = vpop.f32.mrf.mxu2  ;;  %v2722_v0 = vpop.f32.mrf.mxu0 }
 0x2c5   : > { %v2762_v40 = vpop.f32.mrf.mxu3  ;;  %v2723_v43 = vadd.f32 %v2722_v0, %v6235_v46  ;;  %v2736_v51 = vpop.f32.mrf.mxu1  ;;  %v2749_v57 = vadd.f32 %v2748_v55, %v6230_v61 }
 0x2c6   : > { %v2737_v15 = vadd.f32 %v2736_v51, %v6235_v46  ;;  %v2763_v44 = vadd.f32 %v2762_v40, %v6230_v61  ;;  %v6268_v51 = vperm.slane %v3559_v30, 0 }
 0x2c7   : > { %v3191_v22 = vmax.f32 %v2723_v43, 0.0  ;;  %v3161_v47 = vmax.f32 %v2749_v57, 0.0 }
 0x2c8   : > { %v3192_v13 = vmax.f32 %v2737_v15, 0.0  ;;  %v3162_v53 = vmax.f32 %v2763_v44, 0.0 }
 0x2c9   : > { %v3267_v26 = vmul.f32 %v6242_v63, %v3191_v22  ;;  %v3237_v6 = vmul.f32 %v6244_v4, %v3161_v47 }
 0x2ca   : > { %v3268_v45 = vmul.f32 %v6242_v63, %v3192_v13  ;;  %v3238_v32 = vmul.f32 %v6244_v4, %v3162_v53 }
 0x2cb   : > { %v3299_v35 = vsel %vm2614_vm1, %v3267_v26, 0.0 }
 0x2cc   : > { %v2750_v19 = vpop.f32.mrf.mxu2  ;;  %v2776_v54 = vpop.f32.mrf.mxu0  ;;  %v3300_v36 = vadd.f32 %v3299_v35, %v3235_v2  ;;  %v3307_v20 = vsel %vm2614_vm1, %v3268_v45, 0.0 }
 0x2cd   : > { %v2751_v25 = vadd.f32 %v2750_v19, %v6235_v46  ;;  %v2764_v52 = vpop.f32.mrf.mxu3  ;;  %v2790_v49 = vpop.f32.mrf.mxu1  ;;  %v3308_v17 = vadd.f32 %v3307_v20, %v3236_v16  ;;  %v2777_v24 = vadd.f32 %v2776_v54, %v6230_v61 }
 0x2ce   : > { %v2765_v59 = vadd.f32 %v2764_v52, %v6235_v46  ;;  %v3301_v50 = vrot.slane %v3300_v36, 4  ;;  %v2791_v9 = vadd.f32 %v2790_v49, %v6230_v61 }
 0x2cf   : > { %v3193_v11 = vmax.f32 %v2751_v25, 0.0  ;;  %v3309_v3 = vrot.slane %v3308_v17, 4  ;;  %v3163_v23 = vmax.f32 %v2777_v24, 0.0 }
 0x2d0   : > { %v3194_v42 = vmax.f32 %v2765_v59, 0.0  ;;  %v3302_v21 = vadd.f32 %v3301_v50, %v3300_v36  ;;  %v3164_v31 = vmax.f32 %v2791_v9, 0.0 }
 0x2d1   : > { %v3269_v39 = vmul.f32 %v6242_v63, %v3193_v11  ;;  %v3310_v12 = vadd.f32 %v3309_v3, %v3308_v17  ;;  %v3239_v22 = vmul.f32 %v6244_v4, %v3163_v23 }
 0x2d2   : > { %v3270_v33 = vmul.f32 %v6242_v63, %v3194_v42  ;;  %v3303_v5 = vrot.slane %v3302_v21, 2  ;;  %v3240_v2 = vmul.f32 %v6244_v4, %v3164_v31 }
 0x2d3   : > { %v3315_v27 = vsel %vm2614_vm1, %v3269_v39, 0.0  ;;  %v3311_v10 = vrot.slane %v3310_v12, 2 }
 0x2d4   : > { %v3316_v7 = vadd.f32 %v3315_v27, %v3237_v6  ;;  %v3323_v8 = vsel %vm2614_vm1, %v3270_v33, 0.0  ;;  %v2804_v37 = vpop.f32.mrf.mxu2  ;;  %v2778_v58 = vpop.f32.mrf.mxu0  ;;  %v3304_v41 = vadd.f32 %v3303_v5, %v3302_v21 }
 0x2d5   : > { %v3324_v34 = vadd.f32 %v3323_v8, %v3238_v32  ;;  %v2805_v48 = vadd.f32 %v2804_v37, %v6230_v61  ;;  %v2818_v60 = vpop.f32.mrf.mxu3  ;;  %v2779_v38 = vadd.f32 %v2778_v58, %v6235_v46  ;;  %v2792_v29 = vpop.f32.mrf.mxu1  ;;  %v3312_v43 = vadd.f32 %v3311_v10, %v3310_v12 }
 0x2d6   : > { %v3317_v28 = vrot.slane %v3316_v7, 4  ;;  %v2819_v62 = vadd.f32 %v2818_v60, %v6230_v61  ;;  %v2793_v14 = vadd.f32 %v2792_v29, %v6235_v46  ;;  %v3305_v57 = vrot.slane %v3304_v41, 1 }
 0x2d7   : > { %v3325_v1 = vrot.slane %v3324_v34, 4  ;;  %v3165_v40 = vmax.f32 %v2805_v48, 0.0  ;;  %v3195_v0 = vmax.f32 %v2779_v38, 0.0  ;;  %v3313_v52 = vrot.slane %v3312_v43, 1 }
 0x2d8   : > { %v3318_v55 = vadd.f32 %v3317_v28, %v3316_v7  ;;  %v3196_v15 = vmax.f32 %v2793_v14, 0.0  ;;  %v3166_v44 = vmax.f32 %v2819_v62, 0.0  ;;  %v3306_v42 = vadd.f32 %v3305_v57, %v3304_v41 }
 0x2d9   : > { %v3326_v56 = vadd.f32 %v3325_v1, %v3324_v34  ;;  %v3271_v13 = vmul.f32 %v6242_v63, %v3195_v0  ;;  %v3241_v19 = vmul.f32 %v6244_v4, %v3165_v40  ;;  %v6280_v32 = vadd.f32 %v3313_v52, %v3312_v43 }
 0x2da   : > { %v3319_v18 = vrot.slane %v3318_v55, 2  ;;  %v3272_v45 = vmul.f32 %v6242_v63, %v3196_v15  ;;  %v3242_v39 = vmul.f32 %v6244_v4, %v3166_v44  ;;  %v6290_v30 = vadd.f32 %v6268_v51, %v3306_v42 }
 0x2db   : > { %v3327_v26 = vrot.slane %v3326_v56, 2  ;;  %v3331_v35 = vsel %vm2614_vm1, %v3271_v13, 0.0 }
 0x2dc   : > { %v3320_v16 = vadd.f32 %v3319_v18, %v3318_v55  ;;  %v2806_v25 = vpop.f32.mrf.mxu2  ;;  %v3332_v36 = vadd.f32 %v3331_v35, %v3239_v22  ;;  %v3339_v20 = vsel %vm2614_vm1, %v3272_v45, 0.0  ;;  %v2832_v49 = vpop.f32.mrf.mxu0 }
 0x2dd   : > { %v3328_v54 = vadd.f32 %v3327_v26, %v3326_v56  ;;  %v2807_v47 = vadd.f32 %v2806_v25, %v6235_v46  ;;  %v2820_v59 = vpop.f32.mrf.mxu3  ;;  %v3340_v53 = vadd.f32 %v3339_v20, %v3240_v2  ;;  %v2846_v50 = vpop.f32.mrf.mxu1  ;;  %v2833_v7 = vadd.f32 %v2832_v49, %v6230_v61 }
 0x2de   : > { %v3321_v17 = vrot.slane %v3320_v16, 1  ;;  %v2821_v11 = vadd.f32 %v2820_v59, %v6235_v46  ;;  %v3333_v21 = vrot.slane %v3332_v36, 4  ;;  %v2847_v34 = vadd.f32 %v2846_v50, %v6230_v61 }
 0x2df   : > { %v3329_v3 = vrot.slane %v3328_v54, 1  ;;  %v3197_v6 = vmax.f32 %v2807_v47, 0.0  ;;  %v3341_v24 = vrot.slane %v3340_v53, 4  ;;  %v3167_v14 = vmax.f32 %v2833_v7, 0.0 }
 0x2e0   : > { %v3322_v33 = vadd.f32 %v3321_v17, %v3320_v16  ;;  %v3198_v12 = vmax.f32 %v2821_v11, 0.0  ;;  %v3334_v9 = vadd.f32 %v3333_v21, %v3332_v36  ;;  %v3168_v56 = vmax.f32 %v2847_v34, 0.0 }
 0x2e1   : > { %v3330_v27 = vadd.f32 %v3329_v3, %v3328_v54  ;;  %v3273_v5 = vmul.f32 %v6242_v63, %v3197_v6  ;;  %v3342_v37 = vadd.f32 %v3341_v24, %v3340_v53 }
 0x2e2   : > { %v3564_v8 = vadd.f32 %v6268_v51, %v3322_v33  ;;  %v3274_v10 = vmul.f32 %v6242_v63, %v3198_v12  ;;  %v3335_v60 = vrot.slane %v3334_v9, 2  ;;  %v3244_v54 = vmul.f32 %v6244_v4, %v3168_v56 }
 0x2e3   : > { %v3565_v48 = vadd.f32 %v6268_v51, %v3330_v27  ;;  %v3347_v58 = vsel %vm2614_vm1, %v3273_v5, 0.0  ;;  %v3343_v23 = vrot.slane %v3342_v37, 2 }
 0x2e4   : > { %v4492_v28 = vmul.f32 -1.442695, %v3564_v8  ;;  %v3348_v38 = vadd.f32 %v3347_v58, %v3241_v19  ;;  %v3355_v29 = vsel %vm2614_vm1, %v3274_v10, 0.0  ;;  %v2860_v41 = vpop.f32.mrf.mxu2  ;;  %v3336_v31 = vadd.f32 %v3335_v60, %v3334_v9  ;;  %v2834_v40 = vpop.f32.mrf.mxu0 }
 0x2e5   : > { %v4493_v1 = vmul.f32 -1.442695, %v3565_v48  ;;  %v3356_v62 = vadd.f32 %v3355_v29, %v3242_v39  ;;  %v2874_v55 = vpop.f32.mrf.mxu3  ;;  %v3344_v0 = vadd.f32 %v3343_v23, %v3342_v37  ;;  %v2848_v15 = vpop.f32.mrf.mxu1  ;;  %v2861_v13 = vadd.f32 %v2860_v41, %v6230_v61 }
 0x2e6   : > { %4571 = vpow2.f32 %v4492_v28  ;;  %v3349_v43 = vrot.slane %v3348_v38, 4  ;;  %v3337_v18 = vrot.slane %v3336_v31, 1  ;;  %v2875_v2 = vadd.f32 %v2874_v55, %v6230_v61 }
 0x2e7   : > { %4573 = vpow2.f32 %v4493_v1  ;;  %v3357_v22 = vrot.slane %v3356_v62, 4  ;;  %v3345_v57 = vrot.slane %v3344_v0, 1  ;;  %v2835_v44 = vadd.f32 %v2834_v40, %v6235_v46 }
 0x2e8   : > { %v3350_v26 = vadd.f32 %v3349_v43, %v3348_v38  ;;  %v3338_v45 = vadd.f32 %v3337_v18, %v3336_v31  ;;  %v3243_v19 = vmul.f32 %v6244_v4, %v3167_v14  ;;  %v2849_v35 = vadd.f32 %v2848_v15, %v6235_v46 }
 0x2e9   : > { %v3358_v16 = vadd.f32 %v3357_v22, %v3356_v62  ;;  %v3346_v25 = vadd.f32 %v3345_v57, %v3344_v0  ;;  %v3199_v36 = vmax.f32 %v2835_v44, 0.0  ;;  %v3169_v59 = vmax.f32 %v2861_v13, 0.0 }
 0x2ea   : > { %v3351_v52 = vrot.slane %v3350_v26, 2  ;;  %v3566_v20 = vadd.f32 %v6268_v51, %v3338_v45  ;;  %v3200_v49 = vmax.f32 %v2849_v35, 0.0  ;;  %v3170_v50 = vmax.f32 %v2875_v2, 0.0 }
 0x2eb   : > { %v3359_v47 = vrot.slane %v3358_v16, 2  ;;  %v3567_v53 = vadd.f32 %v6268_v51, %v3346_v25  ;;  %v3275_v42 = vmul.f32 %v6242_v63, %v3199_v36  ;;  %v6317_v55 = vadd.f32 %v6268_v51, %v6280_v32 }
 0x2ec   : > { %v4572_v17 = vpop.eup %4571  ;;  %v3352_v11 = vadd.f32 %v3351_v52, %v3350_v26  ;;  %v2862_v3 = vpop.f32.mrf.mxu2  ;;  %v4494_v6 = vmul.f32 -1.442695, %v3566_v20  ;;  %v3276_v24 = vmul.f32 %v6242_v63, %v3200_v49  ;;  %v3245_v0 = vmul.f32 %v6244_v4, %v3169_v59 }
 0x2ed   : > { %v4574_v39 = vpop.eup %4573  ;;  %v6302_v21 = vadd.f32 1.0, %v4572_v17  ;;  %v3360_v33 = vadd.f32 %v3359_v47, %v3358_v16  ;;  %v2876_v12 = vpop.f32.mrf.mxu3  ;;  %v4495_v9 = vmul.f32 -1.442695, %v3567_v53  ;;  %v3363_v7 = vsel %vm2614_vm1, %v3275_v42, 0.0 }
 0x2ee   : > { %v6305_v27 = vadd.f32 1.0, %v4574_v39  ;;  %v3353_v5 = vrot.slane %v3352_v11, 1  ;;  %v3364_v37 = vadd.f32 %v3363_v7, %v3243_v19  ;;  %v3371_v10 = vsel %vm2614_vm1, %v3276_v24, 0.0  ;;  %v2888_v58 = vpop.f32.mrf.mxu0  ;;  %v2902_v26 = vpop.f32.mrf.mxu1 }
 0x2ef   : > { %4575 = vrcp.f32 %v6302_v21  ;;  %v3361_v8 = vrot.slane %v3360_v33, 1  ;;  %v3372_v48 = vadd.f32 %v3371_v10, %v3244_v54  ;;  %v2863_v60 = vadd.f32 %v2862_v3, %v6235_v46 }
 0x2f0   : > { %4577 = vrcp.f32 %v6305_v27  ;;  %v3354_v34 = vadd.f32 %v3353_v5, %v3352_v11  ;;  %v3365_v23 = vrot.slane %v3364_v37, 4  ;;  %v2877_v38 = vadd.f32 %v2876_v12, %v6235_v46 }
 0x2f1   : > { %4579 = vpow2.f32 %v4494_v6  ;;  %v3362_v28 = vadd.f32 %v3361_v8, %v3360_v33  ;;  %v3373_v41 = vrot.slane %v3372_v48, 4  ;;  %v3201_v1 = vmax.f32 %v2863_v60, 0.0 }
 0x2f2   : > { %4581 = vpow2.f32 %v4495_v9  ;;  %v3568_v29 = vadd.f32 %v6268_v51, %v3354_v34  ;;  %v3366_v62 = vadd.f32 %v3365_v23, %v3364_v37  ;;  %v3202_v14 = vmax.f32 %v2877_v38, 0.0 }
 0x2f3   : > { %v3569_v31 = vadd.f32 %v6268_v51, %v3362_v28  ;;  %v3374_v43 = vadd.f32 %v3373_v41, %v3372_v48  ;;  %v3277_v56 = vmul.f32 %v6242_v63, %v3201_v1  ;;  %v3246_v22 = vmul.f32 %v6244_v4, %v3170_v50 }
 0x2f4   : > { %v4496_v40 = vmul.f32 -1.442695, %v3568_v29  ;;  %v3367_v13 = vrot.slane %v3366_v62, 2  ;;  %v3278_v57 = vmul.f32 %v6242_v63, %v3202_v14  ;;  %v2916_v2 = vpop.f32.mrf.mxu2  ;;  %v6329_v16 = vmul.f32 -1.442695, %v6290_v30 }
 0x2f5   : > { %v6321_v15 = vpop.eup %4575  ;;  %v4497_v18 = vmul.f32 -1.442695, %v3569_v31  ;;  %v3375_v32 = vrot.slane %v3374_v43, 2  ;;  %v3379_v45 = vsel %vm2614_vm1, %v3277_v56, 0.0  ;;  %v2889_v52 = vadd.f32 %v2888_v58, %v6230_v61  ;;  %v2930_v54 = vpop.f32.mrf.mxu3 }
 0x2f6   : > { %v6325_v44 = vpop.eup %4577  ;;  %4583 = vpow2.f32 %v4496_v40  ;;  %v3368_v35 = vadd.f32 %v3367_v13, %v3366_v62  ;;  %v3380_v25 = vadd.f32 %v3379_v45, %v3245_v0  ;;  %v3387_v59 = vsel %vm2614_vm1, %v3278_v57, 0.0  ;;  %v2890_v39 = vpop.f32.mrf.mxu0 }
 0x2f7   : > { %v4580_v19 = vpop.eup %4579  ;;  %4585 = vpow2.f32 %v4497_v18  ;;  %v3376_v47 = vadd.f32 %v3375_v32, %v3374_v43  ;;  %v2903_v49 = vadd.f32 %v2902_v26, %v6230_v61  ;;  %v6338_v17 = vmul.f32 %v6321_v15, %v6302_v21  ;;  %v2904_v62 = vpop.f32.mrf.mxu1 }
 0x2f8   : > { %v4582_v36 = vpop.eup %4581  ;;  %v6332_v20 = vadd.f32 1.0, %v4580_v19  ;;  %v3369_v53 = vrot.slane %v3368_v35, 1  ;;  %v3381_v11 = vrot.slane %v3380_v25, 4  ;;  %v6344_v50 = vmul.f32 %v6325_v44, %v6305_v27 }
 0x2f9   : > { %v6340_v30 = vadd.f32 1.0, %v4582_v36  ;;  %v3377_v42 = vrot.slane %v3376_v47, 1  ;;  %v3388_v3 = vadd.f32 %v3387_v59, %v3246_v22  ;;  %v3171_v24 = vmax.f32 %v2889_v52, 0.0 }
 0x2fa   : > { %4587 = vrcp.f32 %v6332_v20  ;;  %v3370_v6 = vadd.f32 %v3369_v53, %v3368_v35  ;;  %v3382_v33 = vadd.f32 %v3381_v11, %v3380_v25  ;;  %v3172_v7 = vmax.f32 %v2903_v49, 0.0 }
 0x2fb   : > { %4589 = vrcp.f32 %v6340_v30  ;;  %v3378_v9 = vadd.f32 %v3377_v42, %v3376_v47  ;;  %v3389_v5 = vrot.slane %v3388_v3, 4  ;;  %v2917_v8 = vadd.f32 %v2916_v2, %v6230_v61 }
 0x2fc   : > { %v4584_v12 = vpop.eup %4583  ;;  %v3570_v34 = vadd.f32 %v6268_v51, %v3370_v6  ;;  %v3383_v48 = vrot.slane %v3382_v33, 2  ;;  %v2931_v60 = vadd.f32 %v2930_v54, %v6230_v61  ;;  %v3247_v31 = vmul.f32 %v6244_v4, %v3171_v24  ;;  %v2918_v14 = vpop.f32.mrf.mxu2 }
 0x2fd   : > { %v4586_v37 = vpop.eup %4585  ;;  %v6349_v10 = vadd.f32 1.0, %v4584_v12  ;;  %v3571_v23 = vadd.f32 %v6268_v51, %v3378_v9  ;;  %v3390_v38 = vadd.f32 %v3389_v5, %v3388_v3  ;;  %v3173_v56 = vmax.f32 %v2917_v8, 0.0  ;;  %v2932_v26 = vpop.f32.mrf.mxu3 }
 0x2fe   : > { %v6356_v29 = vadd.f32 1.0, %v4586_v37  ;;  %v4498_v41 = vmul.f32 -1.442695, %v3570_v34  ;;  %v3384_v1 = vadd.f32 %v3383_v48, %v3382_v33  ;;  %v3248_v13 = vmul.f32 %v6244_v4, %v3172_v7  ;;  %v2944_v59 = vpop.f32.mrf.mxu0 }
 0x2ff   : > { %4591 = vrcp.f32 %v6349_v10  ;;  %v4499_v0 = vmul.f32 -1.442695, %v3571_v23  ;;  %v3391_v43 = vrot.slane %v3390_v38, 2  ;;  %v3174_v57 = vmax.f32 %v2931_v60, 0.0 }
 0x300   : > { %v6359_v40 = vpop.eup %4587  ;;  %4593 = vpow2.f32 %v4498_v41  ;;  %v3385_v22 = vrot.slane %v3384_v1, 1  ;;  %v2891_v45 = vadd.f32 %v2890_v39, %v6235_v46  ;;  %v2905_v35 = vadd.f32 %v2904_v62, %v6235_v46 }
 0x301   : > { %v6362_v18 = vpop.eup %4589  ;;  %v6367_v2 = vmul.f32 %v6359_v40, %v6332_v20  ;;  %4595 = vpow2.f32 %v4499_v0  ;;  %v3392_v32 = vadd.f32 %v3391_v43, %v3390_v38  ;;  %v2919_v25 = vadd.f32 %v2918_v14, %v6235_v46  ;;  %v2958_v14 = vpop.f32.mrf.mxu1 }
 0x302   : > { %4597 = vrcp.f32 %v6356_v29  ;;  %v3386_v19 = vadd.f32 %v3385_v22, %v3384_v1  ;;  %v3249_v54 = vmul.f32 %v6244_v4, %v3173_v56  ;;  %v3203_v36 = vmax.f32 %v2891_v45, 0.0 }
 0x303   : > { %v3393_v52 = vrot.slane %v3392_v32, 1  ;;  %v2933_v47 = vadd.f32 %v2932_v26, %v6235_v46  ;;  %v3250_v53 = vmul.f32 %v6244_v4, %v3174_v57  ;;  %v3204_v11 = vmax.f32 %v2905_v35, 0.0 }
 0x304   : > { %v3572_v49 = vadd.f32 %v6268_v51, %v3386_v19  ;;  %v3205_v42 = vmax.f32 %v2919_v25, 0.0  ;;  %v6382_v6 = vmul.f32 %v6362_v18, %v6340_v30  ;;  %v3279_v24 = vmul.f32 %v6242_v63, %v3203_v36  ;;  %v2972_v0 = vpop.f32.mrf.mxu2 }
 0x305   : > { %v6377_v3 = vpop.eup %4591  ;;  %v3394_v33 = vadd.f32 %v3393_v52, %v3392_v32  ;;  %v3280_v5 = vmul.f32 %v6242_v63, %v3204_v11  ;;  %v2945_v8 = vadd.f32 %v2944_v59, %v6230_v61  ;;  %v3206_v23 = vmax.f32 %v2933_v47, 0.0  ;;  %v2986_v45 = vpop.f32.mrf.mxu3 }
 0x306   : > { %v4594_v12 = vpop.eup %4593  ;;  %v4500_v9 = vmul.f32 -1.442695, %v3572_v49  ;;  %v3281_v7 = vmul.f32 %v6242_v63, %v3205_v42  ;;  %v3395_v60 = vsel %vm2614_vm1, %v3279_v24, 0.0  ;;  %v6396_v41 = vmul.f32 %v6377_v3, %v6349_v10 }
 0x307   : > { %v4596_v37 = vpop.eup %4595  ;;  %v6388_v34 = vadd.f32 1.0, %v4594_v12  ;;  %v3573_v48 = vadd.f32 %v6268_v51, %v3394_v33  ;;  %v3396_v62 = vadd.f32 %v3395_v60, %v3247_v31  ;;  %v3403_v56 = vsel %vm2614_vm1, %v3280_v5, 0.0 }
 0x308   : > { %v6392_v38 = vpop.eup %4597  ;;  %v6398_v1 = vadd.f32 1.0, %v4596_v37  ;;  %4599 = vpow2.f32 %v4500_v9  ;;  %v3411_v22 = vsel %vm2614_vm1, %v3281_v7, 0.0  ;;  %v3404_v26 = vadd.f32 %v3403_v56, %v3248_v13 }
 0x309   : > { %4601 = vrcp.f32 %v6388_v34  ;;  %v4501_v43 = vmul.f32 -1.442695, %v3573_v48  ;;  %v3397_v57 = vrot.slane %v3396_v62, 4  ;;  %v3412_v32 = vadd.f32 %v3411_v22, %v3249_v54 }
 0x30a   : > { %4603 = vrcp.f32 %v6398_v1  ;;  %v6406_v19 = vmul.f32 %v6392_v38, %v6356_v29  ;;  %v3282_v31 = vmul.f32 %v6242_v63, %v3206_v23  ;;  %v2959_v35 = vadd.f32 %v2958_v14, %v6230_v61 }
 0x30b   : > { %4605 = vpow2.f32 %v4501_v43  ;;  %v3398_v25 = vadd.f32 %v3397_v57, %v3396_v62  ;;  %v3405_v52 = vrot.slane %v3404_v26, 4  ;;  %v3413_v36 = vrot.slane %v3412_v32, 4 }
 0x30c   : > { %v2973_v47 = vadd.f32 %v2972_v0, %v6230_v61  ;;  %v3419_v59 = vsel %vm2614_vm1, %v3282_v31, 0.0  ;;  %v3175_v49 = vmax.f32 %v2945_v8, 0.0  ;;  %v3176_v13 = vmax.f32 %v2959_v35, 0.0  ;;  %v2946_v8 = vpop.f32.mrf.mxu0  ;;  %v2960_v31 = vpop.f32.mrf.mxu1 }
 0x30d   : > { %v6413_v54 = vadd.f32 %v2986_v45, %v6230_v61  ;;  %v3399_v42 = vrot.slane %v3398_v25, 2  ;;  %v3406_v33 = vadd.f32 %v3405_v52, %v3404_v26  ;;  %v3414_v24 = vadd.f32 %v3413_v36, %v3412_v32  ;;  %v2974_v35 = vpop.f32.mrf.mxu2 }
 0x30e   : > { %v4600_v11 = vpop.eup %4599  ;;  %v3420_v12 = vadd.f32 %v3419_v59, %v3250_v53  ;;  %v3177_v0 = vmax.f32 %v2973_v47, 0.0  ;;  %v3251_v53 = vmul.f32 %v6244_v4, %v3175_v49  ;;  %v3252_v22 = vmul.f32 %v6244_v4, %v3176_v13 }
 0x30f   : > { %v6415_v9 = vpop.eup %4601  ;;  %v6420_v48 = vadd.f32 1.0, %v4600_v11  ;;  %v3400_v23 = vadd.f32 %v3399_v42, %v3398_v25  ;;  %v3407_v62 = vrot.slane %v3406_v33, 2  ;;  %v3415_v14 = vrot.slane %v3414_v24, 2 }
 0x310   : > { %v6422_v60 = vpop.eup %4603  ;;  %v3421_v56 = vrot.slane %v3420_v12, 4  ;;  %v3178_v57 = vmax.f32 %v6413_v54, 0.0  ;;  %v6432_v25 = vmul.f32 %v6415_v9, %v6388_v34  ;;  %v3253_v13 = vmul.f32 %v6244_v4, %v3177_v0 }
 0x311   : > { %7376 = vst [vmem:[#allocation6_spill] sm:$0xff] %v6420_v48  ;;  %v4606_v43 = vpop.eup %4605  ;;  %4607 = vrcp.f32 %v6420_v48  ;;  %v3401_v32 = vrot.slane %v3400_v23, 1  ;;  %v3408_v45 = vadd.f32 %v3407_v62, %v3406_v33  ;;  %v6436_v52 = vmul.f32 %v6422_v60, %v6398_v1 }
 0x312   : > { %v6428_v26 = vadd.f32 1.0, %v4606_v43  ;;  %v3416_v36 = vadd.f32 %v3415_v14, %v3414_v24  ;;  %v3422_v47 = vadd.f32 %v3421_v56, %v3420_v12  ;;  %v2947_v54 = vadd.f32 %v2946_v8, %v6235_v46  ;;  %v2988_v43 = vpop.f32.mrf.mxu3 }
 0x313   : > { %v3402_v59 = vadd.f32 %v3401_v32, %v3400_v23  ;;  %v3409_v49 = vrot.slane %v3408_v45, 1  ;;  %v2961_v33 = vadd.f32 %v2960_v31, %v6235_v46  ;;  %v2975_v62 = vadd.f32 %v2974_v35, %v6235_v46 }
 0x314   : > { %7377 = vst [vmem:[#allocation17_spill] sm:$0xff] %v6428_v26  ;;  %v3417_v11 = vrot.slane %v3416_v36, 1  ;;  %v3423_v42 = vrot.slane %v3422_v47, 2  ;;  %4609 = vrcp.f32 %v6428_v26  ;;  %v3207_v24 = vmax.f32 %v2947_v54, 0.0 }
 0x315   : > { %v3574_v37 = vadd.f32 %v6268_v51, %v3402_v59  ;;  %v3410_v7 = vadd.f32 %v3409_v49, %v3408_v45  ;;  %v3208_v14 = vmax.f32 %v2961_v33, 0.0  ;;  %v3209_v56 = vmax.f32 %v2975_v62, 0.0 }
 0x316   : > { %v3418_v12 = vadd.f32 %v3417_v11, %v3416_v36  ;;  %v3424_v23 = vadd.f32 %v3423_v42, %v3422_v47  ;;  %v3283_v31 = vmul.f32 %v6242_v63, %v3207_v24  ;;  %v2989_v35 = vadd.f32 %v2988_v43, %v6235_v46  ;;  %v3000_v36 = vpop.f32.mrf.mxu0 }
 0x317   : > { %v6444_v0 = vpop.eup %4607  ;;  %v4502_v8 = vmul.f32 -1.442695, %v3574_v37  ;;  %v3575_v32 = vadd.f32 %v6268_v51, %v3410_v7  ;;  %v3284_v59 = vmul.f32 %v6242_v63, %v3208_v14  ;;  %v3285_v45 = vmul.f32 %v6242_v63, %v3209_v56 }
 0x318   : > { %7378 = vst [vmem:[#allocation18_spill] sm:$0xff] %v6444_v0  ;;  %v3576_v5 = vadd.f32 %v6268_v51, %v3418_v12  ;;  %v3425_v39 = vrot.slane %v3424_v23, 1  ;;  %v3427_v37 = vsel %vm2614_vm1, %v3283_v31, 0.0  ;;  %v6456_v7 = vmul.f32 %v6444_v0, %v6420_v48  ;;  %v3014_v12 = vpop.f32.mrf.mxu1 }
 0x319   : > { %4611 = vpow2.f32 %v4502_v8  ;;  %v4503_v49 = vmul.f32 -1.442695, %v3575_v32  ;;  %v3428_v42 = vadd.f32 %v3427_v37, %v3251_v53  ;;  %v3435_v62 = vsel %vm2614_vm1, %v3284_v59, 0.0 }
 0x31a   : > { %v4504_v54 = vmul.f32 -1.442695, %v3576_v5  ;;  %v3426_v11 = vadd.f32 %v3425_v39, %v3424_v23  ;;  %v6458_v33 = vpop.eup %4609  ;;  %v3443_v43 = vsel %vm2614_vm1, %v3285_v45, 0.0  ;;  %v3210_v24 = vmax.f32 %v2989_v35, 0.0  ;;  %v3028_v23 = vpop.f32.mrf.mxu2 }
 0x31b   : > { %7379 = vst [vmem:[#allocation15_spill] sm:$0xff] %v6458_v33  ;;  %4613 = vpow2.f32 %v4503_v49  ;;  %v3429_v8 = vrot.slane %v3428_v42, 4  ;;  %v3254_v32 = vmul.f32 %v6244_v4, %v3178_v57  ;;  %v3436_v5 = vadd.f32 %v3435_v62, %v3252_v22 }
 0x31c   : > { %4615 = vpow2.f32 %v4504_v54  ;;  %v3577_v56 = vadd.f32 %v6268_v51, %v3426_v11  ;;  %v3444_v39 = vadd.f32 %v3443_v43, %v3253_v13  ;;  %v3286_v53 = vmul.f32 %v6242_v63, %v3210_v24  ;;  %v3042_v24 = vpop.f32.mrf.mxu3 }
 0x31d   : > { %v3430_v49 = vadd.f32 %v3429_v8, %v3428_v42  ;;  %v3001_v35 = vadd.f32 %v3000_v36, %v6230_v61  ;;  %v3437_v37 = vrot.slane %v3436_v5, 4  ;;  %v3015_v11 = vadd.f32 %v3014_v12, %v6230_v61 }
 0x31e   : > { %v4505_v59 = vmul.f32 -1.442695, %v3577_v56  ;;  %v3445_v14 = vrot.slane %v3444_v39, 4  ;;  %v3451_v54 = vsel %vm2614_vm1, %v3286_v53, 0.0  ;;  %v6474_v62 = vmul.f32 %v6458_v33, %v6428_v26  ;;  %v3002_v31 = vpop.f32.mrf.mxu0 }
 0x31f   : > { %v4612_v45 = vpop.eup %4611  ;;  %v3431_v22 = vrot.slane %v3430_v49, 2  ;;  %v3452_v57 = vadd.f32 %v3451_v54, %v3254_v32  ;;  %v3438_v42 = vadd.f32 %v3437_v37, %v3436_v5  ;;  %v3029_v36 = vadd.f32 %v3028_v23, %v6230_v61 }
 0x320   : > { %v6470_v47 = vadd.f32 1.0, %v4612_v45  ;;  %4617 = vpow2.f32 %v4505_v59  ;;  %7381 = vst [vmem:[#allocation7_spill] sm:$0xff] %v6474_v62  ;;  %v3446_v43 = vadd.f32 %v3445_v14, %v3444_v39  ;;  %v3179_v45 = vmax.f32 %v3001_v35, 0.0 }
 0x321   : > { %v4614_v13 = vpop.eup %4613  ;;  %v3432_v53 = vadd.f32 %v3431_v22, %v3430_v49  ;;  %v3453_v12 = vrot.slane %v3452_v57, 4  ;;  %v3439_v59 = vrot.slane %v3438_v42, 2  ;;  %v3180_v39 = vmax.f32 %v3015_v11, 0.0  ;;  %v3016_v49 = vpop.f32.mrf.mxu1 }
 0x322   : > { %7380 = vst [vmem:[#allocation16_spill] sm:$0xff] %v6470_v47  ;;  %v4616_v56 = vpop.eup %4615  ;;  %v6477_v8 = vadd.f32 1.0, %v4614_v13  ;;  %4619 = vrcp.f32 %v6470_v47  ;;  %v3447_v54 = vrot.slane %v3446_v43, 2  ;;  %v3181_v13 = vmax.f32 %v3029_v36, 0.0  ;;  %v3030_v11 = vpop.f32.mrf.mxu2 }
 0x323   : > { %v6480_v32 = vadd.f32 1.0, %v4616_v56  ;;  %v3433_v5 = vrot.slane %v3432_v53, 1  ;;  %v3454_v14 = vadd.f32 %v3453_v12, %v3452_v57  ;;  %v3440_v23 = vadd.f32 %v3439_v59, %v3438_v42 }
 0x324   : > { %7382 = vst [vmem:[#allocation9_spill] sm:$0xff] %v6477_v8  ;;  %4621 = vrcp.f32 %v6477_v8  ;;  %v3448_v37 = vadd.f32 %v3447_v54, %v3446_v43  ;;  %v3003_v56 = vadd.f32 %v3002_v31, %v6235_v46  ;;  %v3043_v57 = vadd.f32 %v3042_v24, %v6230_v61 }
 0x325   : > { %7383 = vst [vmem:[#allocation13_spill] sm:$0xff] %v6480_v32  ;;  %4623 = vrcp.f32 %v6480_v32  ;;  %v3434_v28 = vadd.f32 %v3433_v5, %v3432_v53  ;;  %v3455_v58 = vrot.slane %v3454_v14, 2  ;;  %v3441_v33 = vrot.slane %v3440_v23, 1 }
 0x326   : > { %v4618_v22 = vpop.eup %4617  ;;  %v3449_v48 = vrot.slane %v3448_v37, 1  ;;  %v3255_v43 = vmul.f32 %v6244_v4, %v3179_v45  ;;  %v3211_v36 = vmax.f32 %v3003_v56, 0.0  ;;  %v3256_v5 = vmul.f32 %v6244_v4, %v3180_v39 }
 0x327   : > { %v6486_v26 = vadd.f32 1.0, %v4618_v22  ;;  %v3578_v12 = vadd.f32 %v6268_v51, %v3434_v28  ;;  %v3456_v42 = vadd.f32 %v3455_v58, %v3454_v14  ;;  %v3442_v54 = vadd.f32 %v3441_v33, %v3440_v23  ;;  %v3044_v14 = vpop.f32.mrf.mxu3 }
 0x328   : > { %v6491_v59 = vpop.eup %4619  ;;  %v3450_v53 = vadd.f32 %v3449_v48, %v3448_v37  ;;  %v3257_v31 = vmul.f32 %v6244_v4, %v3181_v13  ;;  %v3287_v24 = vmul.f32 %v6242_v63, %v3211_v36  ;;  %v3017_v28 = vadd.f32 %v3016_v49, %v6235_v46  ;;  %v3056_v13 = vpop.f32.mrf.mxu0 }
 0x329   : > { %7384 = vst [vmem:[#allocation10_spill] sm:$0xff] %v6486_v26  ;;  %v4506_v35 = vmul.f32 -1.442695, %v3578_v12  ;;  %v3457_v62 = vrot.slane %v3456_v42, 1  ;;  %4625 = vrcp.f32 %v6486_v26  ;;  %v3579_v45 = vadd.f32 %v6268_v51, %v3442_v54 }
 0x32a   : > { %7385 = vst [vmem:[#allocation11_spill] sm:$0xff] %v6491_v59  ;;  %v6495_v22 = vpop.eup %4621  ;;  %v3580_v48 = vadd.f32 %v6268_v51, %v3450_v53  ;;  %v3182_v33 = vmax.f32 %v3043_v57, 0.0  ;;  %v6506_v39 = vmul.f32 %v6491_v59, %v6470_v47  ;;  %v3459_v37 = vsel %vm2614_vm1, %v3287_v24, 0.0 }
 0x32b   : > { %7386 = vst [vmem:[#allocation14_spill] sm:$0xff] %v6495_v22  ;;  %v6499_v58 = vpop.eup %4623  ;;  %4627 = vpow2.f32 %v4506_v35  ;;  %v3458_v23 = vadd.f32 %v3457_v62, %v3456_v42  ;;  %v6511_v49 = vmul.f32 %v6495_v22, %v6477_v8  ;;  %v4507_v56 = vmul.f32 -1.442695, %v3579_v45  ;;  %v3070_v8 = vpop.f32.mrf.mxu1 }
 0x32c   : > { %7387 = vst [vmem:[#allocation8_spill] sm:$0xff] %v6499_v58  ;;  %v4508_v12 = vmul.f32 -1.442695, %v3580_v48  ;;  %v3460_v36 = vadd.f32 %v3459_v37, %v3255_v43  ;;  %v6515_v57 = vmul.f32 %v6499_v58, %v6480_v32  ;;  %v3212_v53 = vmax.f32 %v3017_v28, 0.0 }
 0x32d   : > { %7388 = vst [vmem:[#allocation12_spill] sm:$0xff] %v6506_v39  ;;  %v3581_v54 = vadd.f32 %v6268_v51, %v3458_v23  ;;  %v3031_v35 = vadd.f32 %v3030_v11, %v6235_v46  ;;  %4629 = vpow2.f32 %v4507_v56  ;;  %v3258_v62 = vmul.f32 %v6244_v4, %v3182_v33  ;;  %v3084_v56 = vpop.f32.mrf.mxu2 }
 0x32e   : > { %7389 = vst [vmem:[#allocation27_spill] sm:$0xff] %v6511_v49  ;;  %v3461_v42 = vrot.slane %v3460_v36, 4  ;;  %v3045_v24 = vadd.f32 %v3044_v14, %v6235_v46  ;;  %4631 = vpow2.f32 %v4508_v12  ;;  %v3288_v43 = vmul.f32 %v6242_v63, %v3212_v53 }
 0x32f   : > { %7390 = vst [vmem:[#allocation28_spill] sm:$0xff] %v6515_v57  ;;  %v4509_v45 = vmul.f32 -1.442695, %v3581_v54  ;;  %v3057_v48 = vadd.f32 %v3056_v13, %v6230_v61  ;;  %v6523_v37 = vpop.eup %4625  ;;  %v3213_v32 = vmax.f32 %v3031_v35, 0.0  ;;  %v3098_v23 = vpop.f32.mrf.mxu3  ;;  %vm3757_vm3 = vweird.f32 %v6302_v21 }
 0x330   : > { %7391 = vst [vmem:[#allocation29_spill] sm:$0xff] %v6523_v37  ;;  %v3462_v28 = vadd.f32 %v3461_v42, %v3460_v36  ;;  %v3214_v11 = vmax.f32 %v3045_v24, 0.0  ;;  %v3467_v12 = vsel %vm2614_vm1, %v3288_v43, 0.0  ;;  %v6534_v36 = vmul.f32 %v6523_v37, %v6486_v26 }
 0x331   : > { %v4628_v58 = vpop.eup %4627  ;;  %4633 = vpow2.f32 %v4509_v45  ;;  %v3468_v13 = vadd.f32 %v3467_v12, %v3256_v5  ;;  %v3289_v22 = vmul.f32 %v6242_v63, %v3213_v32  ;;  %v3183_v42 = vmax.f32 %v3057_v48, 0.0 }
 0x332   : > { %v6529_v54 = vadd.f32 1.0, %v4628_v58  ;;  %v3463_v53 = vrot.slane %v3462_v28, 2  ;;  %7393 = vst [vmem:[#allocation19_spill] sm:$0xff] %v6534_v36  ;;  %v3290_v35 = vmul.f32 %v6242_v63, %v3214_v11  ;;  %v3071_v24 = vadd.f32 %v3070_v8, %v6230_v61  ;;  %v3058_v11 = vpop.f32.mrf.mxu0 }
 0x333   : > { %v4630_v33 = vpop.eup %4629  ;;  %v3469_v45 = vrot.slane %v3468_v13, 4  ;;  %v3475_v43 = vsel %vm2614_vm1, %v3289_v22, 0.0  ;;  %v3085_v58 = vadd.f32 %v3084_v56, %v6230_v61  ;;  %v3099_v57 = vadd.f32 %v3098_v23, %v6230_v61 }
 0x334   : > { %7392 = vst [vmem:[#allocation30_spill] sm:$0xff] %v6529_v54  ;;  %v3464_v14 = vadd.f32 %v3463_v53, %v3462_v28  ;;  %v4632_v5 = vpop.eup %4631  ;;  %4635 = vrcp.f32 %v6529_v54  ;;  %v6541_v32 = vadd.f32 1.0, %v4630_v33  ;;  %v3476_v12 = vadd.f32 %v3475_v43, %v3257_v31 }
 0x335   : > { %v3483_v26 = vsel %vm2614_vm1, %v3290_v35, 0.0  ;;  %v6544_v48 = vadd.f32 1.0, %v4632_v5  ;;  %v3470_v37 = vadd.f32 %v3469_v45, %v3468_v13  ;;  %v3184_v56 = vmax.f32 %v3071_v24, 0.0  ;;  %v3072_v35 = vpop.f32.mrf.mxu1  ;;  %v3086_v23 = vpop.f32.mrf.mxu2 }
 0x336   : > { %7394 = vst [vmem:[#allocation20_spill] sm:$0xff] %v6541_v32  ;;  %v3465_v8 = vrot.slane %v3464_v14, 1  ;;  %v3484_v28 = vadd.f32 %v3483_v26, %v3258_v62  ;;  %4637 = vrcp.f32 %v6541_v32  ;;  %v3477_v22 = vrot.slane %v3476_v12, 4 }
 0x337   : > { %7395 = vst [vmem:[#allocation23_spill] sm:$0xff] %v6544_v48  ;;  %v4634_v53 = vpop.eup %4633  ;;  %4639 = vrcp.f32 %v6544_v48  ;;  %v3471_v33 = vrot.slane %v3470_v37, 2  ;;  %v3259_v26 = vmul.f32 %v6244_v4, %v3183_v42  ;;  %v3185_v45 = vmax.f32 %v3085_v58, 0.0 }
 0x338   : > { %v3466_v31 = vadd.f32 %v3465_v8, %v3464_v14  ;;  %v6550_v43 = vadd.f32 1.0, %v4634_v53  ;;  %v3478_v5 = vadd.f32 %v3477_v22, %v3476_v12  ;;  %v3485_v47 = vrot.slane %v3484_v28, 4 }
 0x339   : > { %v3472_v13 = vadd.f32 %v3471_v33, %v3470_v37  ;;  %v3059_v24 = vadd.f32 %v3058_v11, %v6235_v46  ;;  %v3260_v14 = vmul.f32 %v6244_v4, %v3184_v56  ;;  %v3186_v8 = vmax.f32 %v3099_v57, 0.0 }
 0x33a   : > { %7396 = vst [vmem:[#allocation21_spill] sm:$0xff] %v6550_v43  ;;  %v3582_v62 = vadd.f32 %v6268_v51, %v3466_v31  ;;  %v6555_v59 = vpop.eup %4635  ;;  %v3479_v49 = vrot.slane %v3478_v5, 2  ;;  %v3486_v36 = vadd.f32 %v3485_v47, %v3484_v28  ;;  %v3073_v22 = vadd.f32 %v3072_v35, %v6235_v46  ;;  %v3112_v31 = vpop.f32.mrf.mxu0 }
 0x33b   : > { %7397 = vst [vmem:[#allocation24_spill] sm:$0xff] %v6555_v59  ;;  %v3473_v39 = vrot.slane %v3472_v13, 1  ;;  %v3215_v12 = vmax.f32 %v3059_v24, 0.0  ;;  %4641 = vrcp.f32 %v6550_v43  ;;  %v3087_v11 = vadd.f32 %v3086_v23, %v6235_v46 }
 0x33c   : > { %v4510_v53 = vmul.f32 -1.442695, %v3582_v62  ;;  %v6559_v42 = vpop.eup %4637  ;;  %v3480_v37 = vadd.f32 %v3479_v49, %v3478_v5  ;;  %v3487_v58 = vrot.slane %v3486_v36, 2  ;;  %v3261_v57 = vmul.f32 %v6244_v4, %v3185_v45 }
 0x33d   : > { %7398 = vst [vmem:[#allocation25_spill] sm:$0xff] %v6559_v42  ;;  %v6563_v33 = vpop.eup %4639  ;;  %v3474_v47 = vadd.f32 %v3473_v39, %v3472_v13  ;;  %v3291_v28 = vmul.f32 %v6242_v63, %v3215_v12  ;;  %v6569_v56 = vmul.f32 %v6555_v59, %v6529_v54  ;;  %v3216_v24 = vmax.f32 %v3073_v22, 0.0  ;;  %v3126_v39 = vpop.f32.mrf.mxu1 }
 0x33e   : > { %7399 = vst [vmem:[#allocation22_spill] sm:$0xff] %v6563_v33  ;;  %4643 = vpow2.f32 %v4510_v53  ;;  %v3481_v35 = vrot.slane %v3480_v37, 1  ;;  %v3488_v62 = vadd.f32 %v3487_v58, %v3486_v36  ;;  %v3262_v5 = vmul.f32 %v6244_v4, %v3186_v8  ;;  %v3100_v53 = vpop.f32.mrf.mxu3 }
 0x33f   : > { %7400 = vst [vmem:[#allocation26_spill] sm:$0xff] %v6569_v56  ;;  %v3583_v49 = vadd.f32 %v6268_v51, %v3474_v47  ;;  %v3491_v23 = vsel %vm2614_vm1, %v3291_v28, 0.0  ;;  %v3217_v0 = vmax.f32 %v3087_v11, 0.0  ;;  %v6576_v13 = vmul.f32 %v6559_v42, %v6541_v32 }
 0x340   : > { %v6580_v45 = vmul.f32 %v6563_v33, %v6544_v48  ;;  %v3482_v12 = vadd.f32 %v3481_v35, %v3480_v37  ;;  %v3489_v36 = vrot.slane %v3488_v62, 1  ;;  %v3492_v58 = vadd.f32 %v3491_v23, %v3259_v26 }
 0x341   : > { %v4511_v22 = vmul.f32 -1.442695, %v3583_v49  ;;  %v3292_v47 = vmul.f32 %v6242_v63, %v3216_v24  ;;  %v3293_v8 = vmul.f32 %v6242_v63, %v3217_v0  ;;  %v6584_v28 = vpop.eup %4641  ;;  %v3101_v42 = vadd.f32 %v3100_v53, %v6235_v46 }
 0x342   : > { %7401 = vst [vmem:[#allocation31_spill] sm:$0xff] %v6580_v45  ;;  %v3584_v54 = vadd.f32 %v6268_v51, %v3482_v12  ;;  %v3490_v32 = vadd.f32 %v3489_v36, %v3488_v62  ;;  %v3493_v48 = vrot.slane %v3492_v58, 4  ;;  %v3113_v33 = vadd.f32 %v3112_v31, %v6230_v61 }
 0x343   : > { %7402 = vst [vmem:[#allocation32_spill] sm:$0xff] %v6584_v28  ;;  %4645 = vpow2.f32 %v4511_v22  ;;  %v3499_v37 = vsel %vm2614_vm1, %v3292_v47, 0.0  ;;  %v3507_v26 = vsel %vm2614_vm1, %v3293_v8, 0.0  ;;  %v3218_v62 = vmax.f32 %v3101_v42, 0.0  ;;  %v3114_v47 = vpop.f32.mrf.mxu0 }
 0x344   : > { %v4644_v59 = vpop.eup %4643  ;;  %v4512_v24 = vmul.f32 -1.442695, %v3584_v54  ;;  %v3585_v0 = vadd.f32 %v6268_v51, %v3490_v32  ;;  %v3500_v49 = vadd.f32 %v3499_v37, %v3260_v14  ;;  %v3494_v11 = vadd.f32 %v3493_v48, %v3492_v58 }
 0x345   : > { %v3508_v12 = vadd.f32 %v3507_v26, %v3261_v57  ;;  %v6594_v36 = vadd.f32 1.0, %v4644_v59  ;;  %v3294_v54 = vmul.f32 %v6242_v63, %v3218_v62  ;;  %v6600_v32 = vmul.f32 %v6584_v28, %v6550_v43  ;;  %v3128_v37 = vpop.f32.mrf.mxu1 }
 0x346   : > { %v4513_v53 = vmul.f32 -1.442695, %v3585_v0  ;;  %v3501_v22 = vrot.slane %v3500_v49, 4  ;;  %4647 = vpow2.f32 %v4512_v24  ;;  %v3495_v8 = vrot.slane %v3494_v11, 2 }
 0x347   : > { %v3509_v56 = vrot.slane %v3508_v12, 4  ;;  %v3127_v14 = vadd.f32 %v3126_v39, %v6230_v61  ;;  %v3515_v58 = vsel %vm2614_vm1, %v3294_v54, 0.0  ;;  %v3115_v31 = vadd.f32 %v3114_v47, %v6235_v46 }
 0x348   : > { %4649 = vpow2.f32 %v4513_v53  ;;  %v3502_v48 = vadd.f32 %v3501_v22, %v3500_v49  ;;  %v3496_v42 = vadd.f32 %v3495_v8, %v3494_v11  ;;  %v3516_v0 = vadd.f32 %v3515_v58, %v3262_v5  ;;  %v3140_v22 = vpop.f32.mrf.mxu2 }
 0x349   : > { %v4646_v59 = vpop.eup %4645  ;;  %v3510_v57 = vadd.f32 %v3509_v56, %v3508_v12  ;;  %4651 = vrcp.f32 %v6594_v36  ;;  %v3187_v53 = vmax.f32 %v3113_v33, 0.0  ;;  %v3219_v49 = vmax.f32 %v3115_v31, 0.0  ;;  %v3154_v12 = vpop.f32.mrf.mxu3 }
 0x34a   : > { %v6606_v26 = vadd.f32 1.0, %v4646_v59  ;;  %v3503_v24 = vrot.slane %v3502_v48, 2  ;;  %v3497_v62 = vrot.slane %v3496_v42, 1  ;;  %v3517_v56 = vrot.slane %v3516_v0, 4 }
 0x34b   : > { %v3511_v23 = vrot.slane %v3510_v57, 2  ;;  %v3129_v11 = vadd.f32 %v3128_v37, %v6235_v46  ;;  %v3188_v35 = vmax.f32 %v3127_v14, 0.0  ;;  %v3295_v59 = vmul.f32 %v6242_v63, %v3219_v49 }
 0x34c   : > { %7403 = vst [vmem:[#allocation33_spill] sm:$0xff] %v6606_v26  ;;  %4653 = vrcp.f32 %v6606_v26  ;;  %v3504_v39 = vadd.f32 %v3503_v24, %v3502_v48  ;;  %v4648_v47 = vpop.eup %4647  ;;  %v3498_v8 = vadd.f32 %v3497_v62, %v3496_v42  ;;  %v3518_v33 = vadd.f32 %v3517_v56, %v3516_v0 }
 0x34d   : > { %v3512_v54 = vadd.f32 %v3511_v23, %v3510_v57  ;;  %v6611_v5 = vadd.f32 1.0, %v4648_v47  ;;  %v3220_v31 = vmax.f32 %v3129_v11, 0.0  ;;  %v3263_v37 = vmul.f32 %v6244_v4, %v3187_v53 }
 0x34e   : > { %v4650_v43 = vpop.eup %4649  ;;  %v3505_v58 = vrot.slane %v3504_v39, 1  ;;  %v3586_v48 = vadd.f32 %v6268_v51, %v3498_v8  ;;  %v3519_v14 = vrot.slane %v3518_v33, 2  ;;  %v3523_v42 = vsel %vm2614_vm1, %v3295_v59, 0.0 }
 0x34f   : > { %v6613_v28 = vadd.f32 1.0, %v4650_v43  ;;  %v3513_v24 = vrot.slane %v3512_v54, 1  ;;  %v6617_v45 = vpop.eup %4651  ;;  %4655 = vrcp.f32 %v6611_v5  ;;  %v3524_v62 = vadd.f32 %v3523_v42, %v3263_v37 }
 0x350   : > { %v3506_v23 = vadd.f32 %v3505_v58, %v3504_v39  ;;  %v4514_v57 = vmul.f32 -1.442695, %v3586_v48  ;;  %v3520_v56 = vadd.f32 %v3519_v14, %v3518_v33  ;;  %v3296_v53 = vmul.f32 %v6242_v63, %v3220_v31  ;;  %v3142_v37 = vpop.f32.mrf.mxu2 }
 0x351   : > { %4657 = vrcp.f32 %v6613_v28  ;;  %v3514_v0 = vadd.f32 %v3513_v24, %v3512_v54  ;;  %v3141_v11 = vadd.f32 %v3140_v22, %v6230_v61  ;;  %v3264_v47 = vmul.f32 %v6244_v4, %v3188_v35 }
 0x352   : > { %v6622_v43 = vpop.eup %4653  ;;  %v3587_v49 = vadd.f32 %v6268_v51, %v3506_v23  ;;  %4659 = vpow2.f32 %v4514_v57  ;;  %v3525_v8 = vrot.slane %v3524_v62, 4  ;;  %v6631_v59 = vmul.f32 %v6617_v45, %v6594_v36  ;;  %v3156_v57 = vpop.f32.mrf.mxu3 }
 0x353   : > { %7404 = vst [vmem:[#allocation34_spill] sm:$0xff] %v6622_v43  ;;  %v3588_v39 = vadd.f32 %v6268_v51, %v3514_v0  ;;  %v3521_v58 = vrot.slane %v3520_v56, 1  ;;  %v3531_v48 = vsel %vm2614_vm1, %v3296_v53, 0.0  ;;  %v6636_v33 = vmul.f32 %v6622_v43, %v6606_v26 }
 0x354   : > { %v4515_v54 = vmul.f32 -1.442695, %v3587_v49  ;;  %v3526_v22 = vadd.f32 %v3525_v8, %v3524_v62  ;;  %v3532_v24 = vadd.f32 %v3531_v48, %v3264_v47  ;;  %v3189_v14 = vmax.f32 %v3141_v11, 0.0 }
 0x355   : > { %v4516_v31 = vmul.f32 -1.442695, %v3588_v39  ;;  %v6638_v23 = vpop.eup %4655  ;;  %v3522_v35 = vadd.f32 %v3521_v58, %v3520_v56  ;;  %v3155_v42 = vadd.f32 %v3154_v12, %v6230_v61  ;;  %v3143_v8 = vadd.f32 %v3142_v37, %v6235_v46 }
 0x356   : > { %4661 = vpow2.f32 %v4515_v54  ;;  %v3527_v53 = vrot.slane %v3526_v22, 2  ;;  %v3533_v26 = vrot.slane %v3532_v24, 4  ;;  %v3157_v12 = vadd.f32 %v3156_v57, %v6235_v46 }
 0x357   : > { %v6641_v0 = vpop.eup %4657  ;;  %4663 = vpow2.f32 %v4516_v31  ;;  %v3589_v62 = vadd.f32 %v6268_v51, %v3522_v35  ;;  %v3190_v47 = vmax.f32 %v3155_v42, 0.0  ;;  %v6651_v58 = vmul.f32 %v6638_v23, %v6611_v5 }
 0x358   : > { %v4660_v54 = vpop.eup %4659  ;;  %v3528_v11 = vadd.f32 %v3527_v53, %v3526_v22  ;;  %v3534_v61 = vadd.f32 %v3533_v26, %v3532_v24  ;;  %v3265_v39 = vmul.f32 %v6244_v4, %v3189_v14  ;;  %v3221_v49 = vmax.f32 %v3143_v8, 0.0 }
 0x359   : > { %v6653_v48 = vadd.f32 1.0, %v4660_v54  ;;  %v4517_v31 = vmul.f32 -1.442695, %v3589_v62  ;;  %v3222_v37 = vmax.f32 %v3157_v12, 0.0  ;;  %v6658_v22 = vmul.f32 %v6641_v0, %v6613_v28 }
 0x35a   : > { %v3529_v35 = vrot.slane %v3528_v11, 1  ;;  %v3535_v42 = vrot.slane %v3534_v61, 2  ;;  %v3266_v46 = vmul.f32 %v6244_v4, %v3190_v47  ;;  %v4491_v26 = vmul.f32 -1.442695, %v6317_v55 }
 0x35b   : > { %4665 = vrcp.f32 %v6653_v48  ;;  %v3297_v8 = vmul.f32 %v6242_v63, %v3221_v49  ;;  %v3298_v54 = vmul.f32 %v6242_v63, %v3222_v37  ;;  %v7407_v55 = vsub.f32 1.0, %v6338_v17 }
 0x35c   : > { %v4662_v43 = vpop.eup %4661  ;;  %4667 = vpow2.f32 %v4517_v31  ;;  %v3530_v14 = vadd.f32 %v3529_v35, %v3528_v11  ;;  %v3536_v53 = vadd.f32 %v3535_v42, %v3534_v61  ;;  %vm3758_vm4 = vweird.f32 %v6321_v15 }
 0x35d   : > { %v4664_v24 = vpop.eup %4663  ;;  %v6663_v57 = vadd.f32 1.0, %v4662_v43  ;;  %4669 = vpow2.f32 %v6329_v16  ;;  %v3755_v43 = vmul.f32 %v6321_v15, %v7407_v55  ;;  %v3539_v61 = vsel %vm2614_vm1, %v3297_v8, 0.0  ;;  %vm6702_vm5 = vmor %vm3757_vm3, %vm3758_vm4 }
 0x35e   : > { %v6665_v62 = vadd.f32 1.0, %v4664_v24  ;;  %v3590_v4 = vadd.f32 %v6268_v51, %v3530_v14  ;;  %v3537_v47 = vrot.slane %v3536_v53, 1  ;;  %v3547_v49 = vsel %vm2614_vm1, %v3298_v54, 0.0 }
 0x35f   : > { %7405 = vst [vmem:[#allocation35_spill] sm:$0xff] %v6663_v57  ;;  %4671 = vrcp.f32 %v6663_v57  ;;  %v3540_v16 = vadd.f32 %v3539_v61, %v3265_v39  ;;  %v3548_v31 = vadd.f32 %v3547_v49, %v3266_v46  ;;  %v3756_v42 = vadd.f32 %v6321_v15, %v3755_v43 }
 0x360   : > { %7406 = vst [vmem:[#allocation36_spill] sm:$0xff] %v6665_v62  ;;  %4673 = vrcp.f32 %v6665_v62  ;;  %v4518_v63 = vmul.f32 -1.442695, %v3590_v4  ;;  %v3538_v12 = vadd.f32 %v3537_v47, %v3536_v53  ;;  %v3763_v14 = vand.u32 2147483648, %v6302_v21 }
 0x361   : > { %v6679_v35 = vpop.eup %4665  ;;  %4675 = vpow2.f32 %v4491_v26  ;;  %v3541_v24 = vrot.slane %v3540_v16, 4  ;;  %v3549_v26 = vrot.slane %v3548_v31, 4  ;;  %v3761_v53 = vand.u32 2147483647, %v6302_v21 }
 0x362   : > { %v4668_v17 = vpop.eup %4667  ;;  %4677 = vpow2.f32 %v4518_v63  ;;  %v3591_v37 = vadd.f32 %v6268_v51, %v3538_v12  ;;  %v6688_v39 = vmul.f32 %v6679_v35, %v6653_v48  ;;  %v7414_v56 = vsub.f32 1.0, %v6344_v50 }
 0x363   : > { %v4670_v8 = vpop.eup %4669  ;;  %v6690_v46 = vadd.f32 1.0, %v4668_v17  ;;  %v3542_v55 = vadd.f32 %v3541_v24, %v3540_v16  ;;  %v3550_v12 = vadd.f32 %v3549_v26, %v3548_v31  ;;  %v3760_v16 = vsel %vm6702_vm5, %v6321_v15, %v3756_v42 }
 0x364   : > { %v4519_v47 = vmul.f32 -1.442695, %v3591_v37  ;;  %v6696_v43 = vadd.f32 1.0, %v4670_v8  ;;  %v3764_v37 = vor.u32 1.1754944e-38, %v3763_v14  ;;  %vm3762_vm6 = vcmp.eq.f32.partialorder %v3761_v53, 8.507059e+37 }
 0x365   : > { %7408 = vst [vmem:[#allocation37_spill] sm:$0xff] %v6690_v46  ;;  %v6693_v54 = vpop.eup %4671  ;;  %4679 = vrcp.f32 %v6690_v46  ;;  %v3543_v17 = vrot.slane %v3542_v55, 2  ;;  %v3551_v4 = vrot.slane %v3550_v12, 2  ;;  %v3770_v8 = vmul.f32 %v6325_v44, %v7414_v56 }
 0x366   : > { %v6706_v49 = vpop.eup %4673  ;;  %v6710_v63 = vmul.f32 %v6693_v54, %v6663_v57  ;;  %4681 = vpow2.f32 %v4519_v47  ;;  %v3733_v15 = vand.u32 2147483648, %v6696_v43  ;;  %v6725_v42 = vsel %vm3762_vm6, %v3764_v37, %v3760_v16 }
 0x367   : > { %7411 = vst [vmem:[#allocation38_spill] sm:$0xff] %v6706_v49  ;;  %v6718_v21 = vmul.f32 %v6706_v49, %v6665_v62  ;;  %v4676_v24 = vpop.eup %4675  ;;  %4683 = vrcp.f32 %v6696_v43  ;;  %v3544_v31 = vadd.f32 %v3543_v17, %v3542_v55  ;;  %v3552_v14 = vadd.f32 %v3551_v4, %v3550_v12 }
 0x368   : > { %v4678_v11 = vpop.eup %4677  ;;  %v6722_v26 = vadd.f32 1.0, %v4676_v24  ;;  %7413 = vst [vmem:[#allocation40_spill] sm:$0xff] %v6725_v42  ;;  %v3731_v55 = vand.u32 2147483647, %v6696_v43  ;;  %vm3727_vm7 = vweird.f32 %v6696_v43  ;;  %v3771_v24 = vadd.f32 %v6325_v44, %v3770_v8 }
 0x369   : > { %7412 = vst [vmem:[#allocation39_spill] sm:$0xff] %v6718_v21  ;;  %v6728_v47 = vadd.f32 1.0, %v4678_v11  ;;  %v3545_v53 = vrot.slane %v3544_v31, 1  ;;  %v3553_v16 = vrot.slane %v3552_v14, 1  ;;  %v3734_v11 = vor.u32 1.1754944e-38, %v3733_v15 }
 0x36a   : > { %4685 = vrcp.f32 %v6722_v26  ;;  %v3748_v4 = vand.u32 2147483648, %v6722_v26  ;;  %v3746_v37 = vand.u32 2147483647, %v6722_v26  ;;  %vm3772_vm8 = vweird.f32 %v6305_v27 }
 0x36b   : > { %v6736_v17 = vpop.eup %4679  ;;  %4687 = vrcp.f32 %v6728_v47  ;;  %v3546_v12 = vadd.f32 %v3545_v53, %v3544_v31  ;;  %v3554_v42 = vadd.f32 %v3553_v16, %v3552_v14  ;;  %vm6755_vm10 = vcmp.eq.f32.partialorder %v3731_v55, 8.507059e+37 }
 0x36c   : > { %7415 = vst [vmem:[#allocation41_spill] sm:$0xff] %v6736_v17  ;;  %v4682_v50 = vpop.eup %4681  ;;  %v6743_v56 = vmul.f32 %v6736_v17, %v6690_v46  ;;  %v6749_v49 = vor.u32 1.1754944e-38, %v3748_v4  ;;  %vm3742_vm11 = vweird.f32 %v6722_v26  ;;  %vm3773_vm12 = vweird.f32 %v6325_v44 }
 0x36d   : > { %v4684_v62 = vpop.eup %4683  ;;  %v6747_v61 = vadd.f32 1.0, %v4682_v50  ;;  %v3592_v21 = vadd.f32 %v6268_v51, %v3546_v12  ;;  %v3593_v8 = vadd.f32 %v6268_v51, %v3554_v42  ;;  %v3776_v14 = vand.u32 2147483647, %v6305_v27  ;;  %vm6764_vm13 = vmor %vm3772_vm8, %vm3773_vm12 }
 0x36e   : > { %7416 = vst [vmem:[#allocation42_spill] sm:$0xff] %v6743_v56  ;;  %v3723_v46 = vmul.f32 %v4684_v62, %v6696_v43  ;;  %vm3728_vm9 = vweird.f32 %v4684_v62  ;;  %v3778_v55 = vand.u32 2147483648, %v6305_v27  ;;  %v7421_v12 = vsub.f32 1.0, %v6367_v2 }
 0x36f   : > { %4689 = vrcp.f32 %v6747_v61  ;;  %v4520_v16 = vmul.f32 -1.442695, %v3592_v21  ;;  %v4521_v42 = vmul.f32 -1.442695, %v3593_v8  ;;  %vm6775_vm15 = vcmp.eq.f32.partialorder %v3746_v37, 8.507059e+37  ;;  %vm3729_vm2 = vmor %vm3727_vm7, %vm3728_vm9 }
 0x370   : > { %v4686_v53 = vpop.eup %4685  ;;  %v3724_v4 = vsub.f32 1.0, %v3723_v46  ;;  %v3785_v15 = vmul.f32 %v6359_v40, %v7421_v12  ;;  %v3775_v46 = vsel %vm6764_vm13, %v6325_v44, %v3771_v24  ;;  %vm3777_vm0 = vcmp.eq.f32.partialorder %v3776_v14, 8.507059e+37 }
 0x371   : > { %v6772_v51 = vpop.eup %4687  ;;  %v3738_v17 = vmul.f32 %v4686_v53, %v6722_v26  ;;  %vm3743_vm14 = vweird.f32 %v4686_v53  ;;  %4691 = vpow2.f32 %v4520_v16  ;;  %v3779_v8 = vor.u32 1.1754944e-38, %v3778_v55 }
 0x372   : > { %v6784_v27 = vmul.f32 %v6772_v51, %v6728_v47  ;;  %v3725_v2 = vmul.f32 %v4684_v62, %v3724_v4  ;;  %4693 = vpow2.f32 %v4521_v42  ;;  %v3786_v12 = vadd.f32 %v6359_v40, %v3785_v15  ;;  %vm3744_vm7 = vmor %vm3742_vm11, %vm3743_vm14 }
 0x373   : > { %v3739_v21 = vsub.f32 1.0, %v3738_v17  ;;  %vm3787_vm3 = vweird.f32 %v6332_v20  ;;  %vm3788_vm4 = vweird.f32 %v6359_v40  ;;  %v6795_v14 = vsel %vm3777_vm0, %v3779_v8, %v3775_v46 }
 0x374   : > { %v4144_v37 = vsub.f32 1.0, %v6784_v27  ;;  %v3726_v57 = vadd.f32 %v4684_v62, %v3725_v2  ;;  %vm6797_vm5 = vmor %vm3787_vm3, %vm3788_vm4  ;;  %v3791_v15 = vand.u32 2147483647, %v6332_v20  ;;  %v3793_v16 = vand.u32 2147483648, %v6332_v20 }
 0x375   : > { %v6793_v44 = vpop.eup %4689  ;;  %v3740_v24 = vmul.f32 %v4686_v53, %v3739_v21  ;;  %v3790_v50 = vsel %vm6797_vm5, %v6359_v40, %v3786_v12  ;;  %v7426_v55 = vsub.f32 1.0, %v6382_v6  ;;  %vm3802_vm8 = vweird.f32 %v6340_v30 }
 0x376   : > { %v6805_v43 = vmul.f32 %v6793_v44, %v6747_v61  ;;  %v3730_v4 = vsel %vm3729_vm2, %v4684_v62, %v3726_v57  ;;  %vm3792_vm6 = vcmp.eq.f32.partialorder %v3791_v15, 8.507059e+37  ;;  %v3794_v20 = vor.u32 1.1754944e-38, %v3793_v16 }
 0x377   : > { %v3800_v42 = vmul.f32 %v6362_v18, %v7426_v55  ;;  %v6815_v46 = vsel %vm6755_vm10, %v3734_v11, %v3730_v4  ;;  %v3741_v2 = vadd.f32 %v4686_v53, %v3740_v24  ;;  %v4692_v21 = vpop.eup %4691  ;;  %vm3803_vm9 = vweird.f32 %v6362_v18 }
 0x378   : > { %v4159_v8 = vsub.f32 1.0, %v6805_v43  ;;  %v4694_v6 = vpop.eup %4693  ;;  %v6824_v57 = vadd.f32 1.0, %v4692_v21  ;;  %v6826_v11 = vsel %vm3792_vm6, %v3794_v20, %v3790_v50  ;;  %vm6828_vm10 = vmor %vm3802_vm8, %vm3803_vm9  ;;  %v3806_v12 = vand.u32 2147483647, %v6340_v30 }
 0x379   : > { %v3801_v40 = vadd.f32 %v6362_v18, %v3800_v42  ;;  %v3745_v62 = vsel %vm3744_vm7, %v4686_v53, %v3741_v2  ;;  %v6833_v26 = vadd.f32 1.0, %v4694_v6  ;;  %v3808_v53 = vand.u32 2147483648, %v6340_v30 }
 0x37a   : > { %v6838_v24 = vsel %vm6775_vm15, %v6749_v49, %v3745_v62  ;;  %4695 = vrcp.f32 %v6824_v57  ;;  %vm3807_vm11 = vcmp.eq.f32.partialorder %v3806_v12, 8.507059e+37  ;;  %v7429_v15 = vsub.f32 1.0, %v6396_v41 }
 0x37b   : > { %v3805_v17 = vsel %vm6828_vm10, %v6362_v18, %v3801_v40  ;;  %vm3817_vm12 = vweird.f32 %v6349_v10  ;;  %4697 = vrcp.f32 %v6833_v26  ;;  %v3809_v56 = vor.u32 1.1754944e-38, %v3808_v53 }
 0x37c   : > { %v3815_v16 = vmul.f32 %v6377_v3, %v7429_v15  ;;  %vm3818_vm13 = vweird.f32 %v6377_v3  ;;  %v3821_v49 = vand.u32 2147483647, %v6349_v10  ;;  %v3823_v30 = vand.u32 2147483648, %v6349_v10 }
 0x37d   : > { %v7430_v4 = vsub.f32 1.0, %v6406_v19  ;;  %vm3832_vm14 = vweird.f32 %v6356_v29  ;;  %v6858_v41 = vsel %vm3807_vm11, %v3809_v56, %v3805_v17  ;;  %vm3819_vm15 = vmor %vm3817_vm12, %vm3818_vm13  ;;  %vm3833_vm2 = vweird.f32 %v6392_v38 }
 0x37e   : > { %v3816_v18 = vadd.f32 %v6377_v3, %v3815_v16  ;;  %vm3822_vm0 = vcmp.eq.f32.partialorder %v3821_v49, 8.507059e+37  ;;  %v3836_v55 = vand.u32 2147483647, %v6356_v29  ;;  %v3824_v2 = vor.u32 1.1754944e-38, %v3823_v30  ;;  %vm6865_vm3 = vmor %vm3832_vm14, %vm3833_vm2 }
 0x37f   : > { %v3830_v50 = vmul.f32 %v6392_v38, %v7430_v4  ;;  %v3838_v10 = vand.u32 2147483648, %v6356_v29  ;;  %v7433_v21 = vsub.f32 1.0, %v6432_v25  ;;  %vm3847_vm5 = vweird.f32 %v6388_v34 }
 0x380   : > { %v3820_v42 = vsel %vm3819_vm15, %v6377_v3, %v3816_v18  ;;  %vm3837_vm4 = vcmp.eq.f32.partialorder %v3836_v55, 8.507059e+37  ;;  %vm3848_vm6 = vweird.f32 %v6415_v9  ;;  %v6874_v6 = vpop.eup %4695  ;;  %v3851_v31 = vand.u32 2147483647, %v6388_v34 }
 0x381   : > { %v3831_v20 = vadd.f32 %v6392_v38, %v3830_v50  ;;  %v3845_v40 = vmul.f32 %v6415_v9, %v7433_v21  ;;  %v6876_v3 = vsel %vm3822_vm0, %v3824_v2, %v3820_v42  ;;  %v3839_v62 = vor.u32 1.1754944e-38, %v3838_v10  ;;  %v6882_v12 = vpop.eup %4697  ;;  %vm3849_vm7 = vmor %vm3847_vm5, %vm3848_vm6  ;;  %v7436_v2 = vld [vmem:[#allocation18_spill] sm:$0xff] }
 0x382   : > { %v6886_v25 = vmul.f32 %v6874_v6, %v6824_v57  ;;  %v3853_v53 = vand.u32 2147483648, %v6388_v34  ;;  %v7434_v15 = vsub.f32 1.0, %v6436_v52  ;;  %vm3852_vm8 = vcmp.eq.f32.partialorder %v3851_v31, 8.507059e+37  ;;  %v7437_v10 = vld [vmem:[#allocation6_spill] sm:$0xff]  ;;  %v7440_v31 = vld [vmem:[#allocation15_spill] sm:$0xff] }
 0x383   : > { %v3835_v29 = vsel %vm6865_vm3, %v6392_v38, %v3831_v20  ;;  %v3846_v17 = vadd.f32 %v6415_v9, %v3845_v40  ;;  %v6895_v38 = vmul.f32 %v6882_v12, %v6833_v26  ;;  %vm3862_vm9 = vweird.f32 %v6398_v1 }
 0x384   : > { %v3860_v16 = vmul.f32 %v6422_v60, %v7434_v15  ;;  %v6897_v56 = vsel %vm3837_vm4, %v3839_v62, %v3835_v29  ;;  %v3854_v30 = vor.u32 1.1754944e-38, %v3853_v53  ;;  %vm3863_vm10 = vweird.f32 %v6422_v60  ;;  %v7438_v29 = vld [vmem:[#allocation7_spill] sm:$0xff] }
 0x385   : > { %v3850_v18 = vsel %vm3849_vm7, %v6415_v9, %v3846_v17  ;;  %v3866_v4 = vand.u32 2147483647, %v6398_v1  ;;  %v3868_v50 = vand.u32 2147483648, %v6398_v1  ;;  %vm3864_vm11 = vmor %vm3862_vm9, %vm3863_vm10  ;;  %v7435_v42 = vsub.f32 1.0, %v6456_v7  ;;  %v7441_v17 = vld [vmem:[#allocation17_spill] sm:$0xff] }
 0x386   : > { %v3861_v34 = vadd.f32 %v6422_v60, %v3860_v16  ;;  %v6907_v55 = vsel %vm3852_vm8, %v3854_v30, %v3850_v18  ;;  %vm3877_vm12 = vweird.f32 %v7437_v10  ;;  %vm3878_vm13 = vweird.f32 %v7436_v2 }
 0x387   : > { %v3875_v20 = vmul.f32 %v7436_v2, %v7435_v42  ;;  %vm3867_vm14 = vcmp.eq.f32.partialorder %v3866_v4, 8.507059e+37  ;;  %v3869_v19 = vor.u32 1.1754944e-38, %v3868_v50  ;;  %v3881_v21 = vand.u32 2147483647, %v7437_v10  ;;  %vm3879_vm0 = vmor %vm3877_vm12, %vm3878_vm13  ;;  %v7444_v50 = vld [vmem:[#allocation11_spill] sm:$0xff] }
 0x388   : > { %v3865_v9 = vsel %vm3864_vm11, %v6422_v60, %v3861_v34  ;;  %v3883_v1 = vand.u32 2147483648, %v7437_v10  ;;  %v7439_v62 = vsub.f32 1.0, %v7438_v29  ;;  %vm3892_vm15 = vweird.f32 %v7441_v17  ;;  %v7442_v34 = vld [vmem:[#allocation12_spill] sm:$0xff] }
 0x389   : > { %v3876_v40 = vadd.f32 %v7436_v2, %v3875_v20  ;;  %v6922_v53 = vsel %vm3867_vm14, %v3869_v19, %v3865_v9  ;;  %vm3882_vm2 = vcmp.eq.f32.partialorder %v3881_v21, 8.507059e+37  ;;  %vm3893_vm3 = vweird.f32 %v7440_v31  ;;  %v7445_v20 = vld [vmem:[#allocation16_spill] sm:$0xff] }
 0x38a   : > { %v3890_v7 = vmul.f32 %v7440_v31, %v7439_v62  ;;  %v3896_v60 = vand.u32 2147483647, %v7441_v17  ;;  %v3884_v16 = vor.u32 1.1754944e-38, %v3883_v1  ;;  %v3898_v30 = vand.u32 2147483648, %v7441_v17  ;;  %vm3894_vm4 = vmor %vm3892_vm15, %vm3893_vm3  ;;  %v7446_v1 = vld [vmem:[#allocation27_spill] sm:$0xff]  ;;  %v7448_v62 = vld [vmem:[#allocation14_spill] sm:$0xff] }
 0x38b   : > { %v3880_v15 = vsel %vm3879_vm0, %v7436_v2, %v3876_v40  ;;  %v7443_v4 = vsub.f32 1.0, %v7442_v34  ;;  %vm3907_vm6 = vweird.f32 %v7445_v20  ;;  %vm3908_vm7 = vweird.f32 %v7444_v50  ;;  %v7449_v17 = vld [vmem:[#allocation9_spill] sm:$0xff]  ;;  %v7450_v34 = vld [vmem:[#allocation28_spill] sm:$0xff] }
 0x38c   : > { %v3891_v18 = vadd.f32 %v7440_v31, %v3890_v7  ;;  %vm3897_vm5 = vcmp.eq.f32.partialorder %v3896_v60, 8.507059e+37  ;;  %v6934_v10 = vsel %vm3882_vm2, %v3884_v16, %v3880_v15  ;;  %v3899_v2 = vor.u32 1.1754944e-38, %v3898_v30  ;;  %vm3909_vm9 = vmor %vm3907_vm6, %vm3908_vm7 }
 0x38d   : > { %v3905_v42 = vmul.f32 %v7444_v50, %v7443_v4  ;;  %v3911_v19 = vand.u32 2147483647, %v7445_v20  ;;  %v3913_v40 = vand.u32 2147483648, %v7445_v20  ;;  %v7447_v29 = vsub.f32 1.0, %v7446_v1 }
 0x38e   : > { %v3895_v9 = vsel %vm3894_vm4, %v7440_v31, %v3891_v18  ;;  %vm3922_vm8 = vweird.f32 %v7449_v17  ;;  %vm3923_vm11 = vweird.f32 %v7448_v62  ;;  %v3926_v31 = vand.u32 2147483647, %v7449_v17 }
 0x38f   : > { %v3906_v21 = vadd.f32 %v7444_v50, %v3905_v42  ;;  %v3920_v7 = vmul.f32 %v7448_v62, %v7447_v29  ;;  %v6944_v60 = vsel %vm3897_vm5, %v3899_v2, %v3895_v9  ;;  %vm3912_vm10 = vcmp.eq.f32.partialorder %v3911_v19, 8.507059e+37  ;;  %vm3924_vm12 = vmor %vm3922_vm8, %vm3923_vm11  ;;  %v7452_v42 = vld [vmem:[#allocation8_spill] sm:$0xff]  ;;  %v7453_v9 = vld [vmem:[#allocation13_spill] sm:$0xff] }
 0x390   : > { %v3914_v16 = vor.u32 1.1754944e-38, %v3913_v40  ;;  %v3928_v30 = vand.u32 2147483648, %v7449_v17  ;;  %vm3927_vm13 = vcmp.eq.f32.partialorder %v3926_v31, 8.507059e+37  ;;  %v7451_v4 = vsub.f32 1.0, %v7450_v34  ;;  %v7454_v29 = vld [vmem:[#allocation19_spill] sm:$0xff]  ;;  %v7456_v17 = vld [vmem:[#allocation29_spill] sm:$0xff] }
 0x391   : > { %v3910_v15 = vsel %vm3909_vm9, %v7444_v50, %v3906_v21  ;;  %v3921_v18 = vadd.f32 %v7448_v62, %v3920_v7  ;;  %vm3937_vm14 = vweird.f32 %v7453_v9  ;;  %vm3938_vm15 = vweird.f32 %v7452_v42  ;;  %v7457_v34 = vld [vmem:[#allocation10_spill] sm:$0xff] }
 0x392   : > { %v3935_v20 = vmul.f32 %v7452_v42, %v7451_v4  ;;  %v6956_v2 = vsel %vm3912_vm10, %v3914_v16, %v3910_v15  ;;  %v3929_v50 = vor.u32 1.1754944e-38, %v3928_v30  ;;  %v3941_v21 = vand.u32 2147483647, %v7453_v9  ;;  %vm3939_vm2 = vmor %vm3937_vm14, %vm3938_vm15 }
 0x393   : > { %v3925_v19 = vsel %vm3924_vm12, %v7448_v62, %v3921_v18  ;;  %v3943_v1 = vand.u32 2147483648, %v7453_v9  ;;  %v7455_v7 = vsub.f32 1.0, %v7454_v29  ;;  %vm3952_vm0 = vweird.f32 %v7457_v34  ;;  %v7460_v29 = vld [vmem:[#allocation24_spill] sm:$0xff] }
 0x394   : > { %v3936_v40 = vadd.f32 %v7452_v42, %v3935_v20  ;;  %v6966_v4 = vsel %vm3927_vm13, %v3929_v50, %v3925_v19  ;;  %vm3942_vm3 = vcmp.eq.f32.partialorder %v3941_v21, 8.507059e+37  ;;  %vm3953_vm4 = vweird.f32 %v7456_v17  ;;  %v7458_v20 = vld [vmem:[#allocation26_spill] sm:$0xff] }
 0x395   : > { %v3950_v31 = vmul.f32 %v7456_v17, %v7455_v7  ;;  %v3956_v62 = vand.u32 2147483647, %v7457_v34  ;;  %v3944_v16 = vor.u32 1.1754944e-38, %v3943_v1  ;;  %v3958_v30 = vand.u32 2147483648, %v7457_v34  ;;  %vm3954_vm5 = vmor %vm3952_vm0, %vm3953_vm4  ;;  %v7461_v50 = vld [vmem:[#allocation30_spill] sm:$0xff] }
 0x396   : > { %v3940_v15 = vsel %vm3939_vm2, %v7452_v42, %v3936_v40  ;;  %v7459_v9 = vsub.f32 1.0, %v7458_v20  ;;  %vm3967_vm7 = vweird.f32 %v7461_v50  ;;  %vm3968_vm8 = vweird.f32 %v7460_v29 }
 0x397   : > { %v3951_v18 = vadd.f32 %v7456_v17, %v3950_v31  ;;  %vm3957_vm6 = vcmp.eq.f32.partialorder %v3956_v62, 8.507059e+37  ;;  %v6978_v21 = vsel %vm3942_vm3, %v3944_v16, %v3940_v15  ;;  %v3959_v42 = vor.u32 1.1754944e-38, %v3958_v30  ;;  %v7463_v62 = vld [vmem:[#allocation25_spill] sm:$0xff]  ;;  %vm3969_vm10 = vmor %vm3967_vm7, %vm3968_vm8 }
 0x398   : > { %v3965_v19 = vmul.f32 %v7460_v29, %v7459_v9  ;;  %v3971_v40 = vand.u32 2147483647, %v7461_v50  ;;  %v3973_v31 = vand.u32 2147483648, %v7461_v50  ;;  %v7462_v34 = vsub.f32 1.0, %v6576_v13  ;;  %v7464_v9 = vld [vmem:[#allocation20_spill] sm:$0xff]  ;;  %v7465_v13 = vld [vmem:[#allocation31_spill] sm:$0xff] }
 0x399   : > { %v3955_v7 = vsel %vm3954_vm5, %v7456_v17, %v3951_v18  ;;  %vm3982_vm9 = vweird.f32 %v7464_v9  ;;  %vm3983_vm12 = vweird.f32 %v7463_v62  ;;  %v3986_v17 = vand.u32 2147483647, %v7464_v9  ;;  %v7467_v50 = vld [vmem:[#allocation22_spill] sm:$0xff] }
 0x39a   : > { %v3966_v1 = vadd.f32 %v7460_v29, %v3965_v19  ;;  %v3980_v20 = vmul.f32 %v7463_v62, %v7462_v34  ;;  %v6988_v52 = vsel %vm3957_vm6, %v3959_v42, %v3955_v7  ;;  %vm3972_vm11 = vcmp.eq.f32.partialorder %v3971_v40, 8.507059e+37  ;;  %vm3984_vm13 = vmor %vm3982_vm9, %vm3983_vm12  ;;  %v7468_v42 = vld [vmem:[#allocation23_spill] sm:$0xff] }
 0x39b   : > { %v3974_v16 = vor.u32 1.1754944e-38, %v3973_v31  ;;  %v3988_v30 = vand.u32 2147483648, %v7464_v9  ;;  %vm3987_vm14 = vcmp.eq.f32.partialorder %v3986_v17, 8.507059e+37  ;;  %v7466_v19 = vsub.f32 1.0, %v7465_v13  ;;  %v7470_v17 = vld [vmem:[#allocation32_spill] sm:$0xff] }
 0x39c   : > { %v3970_v15 = vsel %vm3969_vm10, %v7460_v29, %v3966_v1  ;;  %v3981_v18 = vadd.f32 %v7463_v62, %v3980_v20  ;;  %vm3997_vm15 = vweird.f32 %v7468_v42  ;;  %vm3998_vm0 = vweird.f32 %v7467_v50 }
 0x39d   : > { %v3995_v7 = vmul.f32 %v7467_v50, %v7466_v19  ;;  %v7000_v40 = vsel %vm3972_vm11, %v3974_v16, %v3970_v15  ;;  %v3989_v29 = vor.u32 1.1754944e-38, %v3988_v30  ;;  %v4001_v1 = vand.u32 2147483647, %v7468_v42  ;;  %v7471_v19 = vld [vmem:[#allocation21_spill] sm:$0xff]  ;;  %vm3999_vm3 = vmor %vm3997_vm15, %vm3998_vm0 }
 0x39e   : > { %v3985_v34 = vsel %vm3984_vm13, %v7463_v62, %v3981_v18  ;;  %v4003_v20 = vand.u32 2147483648, %v7468_v42  ;;  %v7469_v9 = vsub.f32 1.0, %v6600_v32  ;;  %vm4012_vm2 = vweird.f32 %v7471_v19 }
 0x39f   : > { %v3996_v31 = vadd.f32 %v7467_v50, %v3995_v7  ;;  %v7010_v49 = vsel %vm3987_vm14, %v3989_v29, %v3985_v34  ;;  %vm4002_vm4 = vcmp.eq.f32.partialorder %v4001_v1, 8.507059e+37  ;;  %vm4013_vm5 = vweird.f32 %v7470_v17 }
 0x3a0   : > { %v4010_v13 = vmul.f32 %v7470_v17, %v7469_v9  ;;  %v4016_v62 = vand.u32 2147483647, %v7471_v19  ;;  %v4004_v16 = vor.u32 1.1754944e-38, %v4003_v20  ;;  %v4018_v30 = vand.u32 2147483648, %v7471_v19  ;;  %vm4014_vm6 = vmor %vm4012_vm2, %vm4013_vm5 }
 0x3a1   : > { %v4000_v15 = vsel %vm3999_vm3, %v7467_v50, %v3996_v31  ;;  %v7472_v32 = vsub.f32 1.0, %v6631_v59  ;;  %vm4027_vm8 = vweird.f32 %v6594_v36  ;;  %vm4028_vm9 = vweird.f32 %v6617_v45  ;;  %v7474_v59 = vld [vmem:[#allocation34_spill] sm:$0xff] }
 0x3a2   : > { %v4011_v18 = vadd.f32 %v7470_v17, %v4010_v13  ;;  %vm4017_vm7 = vcmp.eq.f32.partialorder %v4016_v62, 8.507059e+37  ;;  %v7022_v42 = vsel %vm4002_vm4, %v4004_v16, %v4000_v15  ;;  %v4019_v50 = vor.u32 1.1754944e-38, %v4018_v30  ;;  %v7475_v13 = vld [vmem:[#allocation33_spill] sm:$0xff]  ;;  %vm4029_vm11 = vmor %vm4027_vm8, %vm4028_vm9 }
 0x3a3   : > { %v4025_v7 = vmul.f32 %v6617_v45, %v7472_v32  ;;  %v4031_v29 = vand.u32 2147483647, %v6594_v36  ;;  %v4033_v31 = vand.u32 2147483648, %v6594_v36  ;;  %v7473_v20 = vsub.f32 1.0, %v6636_v33 }
 0x3a4   : > { %v4015_v34 = vsel %vm4014_vm6, %v7470_v17, %v4011_v18  ;;  %vm4042_vm10 = vweird.f32 %v7475_v13  ;;  %vm4043_vm13 = vweird.f32 %v7474_v59  ;;  %v4046_v17 = vand.u32 2147483647, %v7475_v13 }
 0x3a5   : > { %v4026_v1 = vadd.f32 %v6617_v45, %v4025_v7  ;;  %v4040_v9 = vmul.f32 %v7474_v59, %v7473_v20  ;;  %v7032_v19 = vsel %vm4017_vm7, %v4019_v50, %v4015_v34  ;;  %vm4032_vm12 = vcmp.eq.f32.partialorder %v4031_v29, 8.507059e+37  ;;  %vm4044_vm14 = vmor %vm4042_vm10, %vm4043_vm13 }
 0x3a6   : > { %v4034_v15 = vor.u32 1.1754944e-38, %v4033_v31  ;;  %v4048_v36 = vand.u32 2147483648, %v7475_v13  ;;  %vm4047_vm15 = vcmp.eq.f32.partialorder %v4046_v17, 8.507059e+37  ;;  %v7476_v33 = vsub.f32 1.0, %v6651_v58 }
 0x3a7   : > { %v4030_v62 = vsel %vm4029_vm11, %v6617_v45, %v4026_v1  ;;  %v4041_v16 = vadd.f32 %v7474_v59, %v4040_v9  ;;  %vm4057_vm0 = vweird.f32 %v6611_v5  ;;  %vm4058_vm2 = vweird.f32 %v6638_v23 }
 0x3a8   : > { %v4055_v18 = vmul.f32 %v6638_v23, %v7476_v33  ;;  %v7044_v30 = vsel %vm4032_vm12, %v4034_v15, %v4030_v62  ;;  %v4049_v45 = vor.u32 1.1754944e-38, %v4048_v36  ;;  %v4061_v7 = vand.u32 2147483647, %v6611_v5  ;;  %vm4059_vm4 = vmor %vm4057_vm0, %vm4058_vm2  ;;  %v7480_v33 = vld [vmem:[#allocation35_spill] sm:$0xff] }
 0x3a9   : > { %v4045_v32 = vsel %vm4044_vm14, %v7474_v59, %v4041_v16  ;;  %v4063_v50 = vand.u32 2147483648, %v6611_v5  ;;  %v7477_v29 = vsub.f32 1.0, %v6658_v22  ;;  %vm4072_vm3 = vweird.f32 %v6613_v28 }
 0x3aa   : > { %v4056_v34 = vadd.f32 %v6638_v23, %v4055_v18  ;;  %v7054_v1 = vsel %vm4047_vm15, %v4049_v45, %v4045_v32  ;;  %vm4062_vm5 = vcmp.eq.f32.partialorder %v4061_v7, 8.507059e+37  ;;  %vm4073_vm6 = vweird.f32 %v6641_v0 }
 0x3ab   : > { %v4070_v58 = vmul.f32 %v6641_v0, %v7477_v29  ;;  %v4076_v31 = vand.u32 2147483647, %v6613_v28  ;;  %v4064_v59 = vor.u32 1.1754944e-38, %v4063_v50  ;;  %v4078_v5 = vand.u32 2147483648, %v6613_v28  ;;  %vm4074_vm7 = vmor %vm4072_vm3, %vm4073_vm6  ;;  %v7483_v50 = vld [vmem:[#allocation38_spill] sm:$0xff] }
 0x3ac   : > { %v4060_v20 = vsel %vm4059_vm4, %v6638_v23, %v4056_v34  ;;  %v7478_v22 = vsub.f32 1.0, %v6688_v39  ;;  %vm4087_vm9 = vweird.f32 %v6653_v48  ;;  %vm4088_vm10 = vweird.f32 %v6679_v35 }
 0x3ad   : > { %v4071_v9 = vadd.f32 %v6641_v0, %v4070_v58  ;;  %vm4077_vm8 = vcmp.eq.f32.partialorder %v4076_v31, 8.507059e+37  ;;  %v7066_v17 = vsel %vm4062_vm5, %v4064_v59, %v4060_v20  ;;  %v4079_v23 = vor.u32 1.1754944e-38, %v4078_v5  ;;  %vm4089_vm12 = vmor %vm4087_vm9, %vm4088_vm10  ;;  %v7484_v58 = vld [vmem:[#allocation36_spill] sm:$0xff] }
 0x3ae   : > { %v4085_v13 = vmul.f32 %v6679_v35, %v7478_v22  ;;  %v4091_v15 = vand.u32 2147483647, %v6653_v48  ;;  %v4093_v28 = vand.u32 2147483648, %v6653_v48  ;;  %v7479_v36 = vsub.f32 1.0, %v6710_v63  ;;  %v7481_v63 = vld [vmem:[#allocation39_spill] sm:$0xff]  ;;  %v7485_v22 = vld [vmem:[#allocation42_spill] sm:$0xff] }
 0x3af   : > { %v4075_v62 = vsel %vm4074_vm7, %v6641_v0, %v4071_v9  ;;  %vm4102_vm11 = vweird.f32 %v7480_v33  ;;  %vm4103_vm14 = vweird.f32 %v6693_v54  ;;  %v4106_v0 = vand.u32 2147483647, %v7480_v33 }
 0x3b0   : > { %v4086_v16 = vadd.f32 %v6679_v35, %v4085_v13  ;;  %v4100_v39 = vmul.f32 %v6693_v54, %v7479_v36  ;;  %v7076_v18 = vsel %vm4077_vm8, %v4079_v23, %v4075_v62  ;;  %vm4092_vm13 = vcmp.eq.f32.partialorder %v4091_v15, 8.507059e+37  ;;  %vm4104_vm15 = vmor %vm4102_vm11, %vm4103_vm14  ;;  %v7487_v62 = vld [vmem:[#allocation41_spill] sm:$0xff] }
 0x3b1   : > { %v4094_v45 = vor.u32 1.1754944e-38, %v4093_v28  ;;  %v4108_v48 = vand.u32 2147483648, %v7480_v33  ;;  %vm4107_vm0 = vcmp.eq.f32.partialorder %v4106_v0, 8.507059e+37  ;;  %v7482_v34 = vsub.f32 1.0, %v7481_v63  ;;  %v7488_v15 = vld [vmem:[#allocation37_spill] sm:$0xff] }
 0x3b2   : > { %v4090_v32 = vsel %vm4089_vm12, %v6679_v35, %v4086_v16  ;;  %v4101_v7 = vadd.f32 %v6693_v54, %v4100_v39  ;;  %vm4117_vm2 = vweird.f32 %v7484_v58  ;;  %vm4118_vm3 = vweird.f32 %v7483_v50 }
 0x3b3   : > { %v4115_v29 = vmul.f32 %v7483_v50, %v7482_v34  ;;  %v7088_v31 = vsel %vm4092_vm13, %v4094_v45, %v4090_v32  ;;  %v4109_v35 = vor.u32 1.1754944e-38, %v4108_v48  ;;  %v4121_v59 = vand.u32 2147483647, %v7484_v58  ;;  %vm4119_vm5 = vmor %vm4117_vm2, %vm4118_vm3 }
 0x3b4   : > { %v4105_v20 = vsel %vm4104_vm15, %v6693_v54, %v4101_v7  ;;  %v4123_v5 = vand.u32 2147483648, %v7484_v58  ;;  %v7486_v13 = vsub.f32 1.0, %v7485_v22  ;;  %vm4132_vm4 = vweird.f32 %v7488_v15 }
 0x3b5   : > { %v4116_v9 = vadd.f32 %v7483_v50, %v4115_v29  ;;  %v7098_v16 = vsel %vm4107_vm0, %v4109_v35, %v4105_v20  ;;  %vm4122_vm6 = vcmp.eq.f32.partialorder %v4121_v59, 8.507059e+37  ;;  %vm4133_vm7 = vweird.f32 %v7487_v62 }
 0x3b6   : > { %v4130_v23 = vmul.f32 %v7487_v62, %v7486_v13  ;;  %v4136_v54 = vand.u32 2147483647, %v7488_v15  ;;  %v4124_v36 = vor.u32 1.1754944e-38, %v4123_v5  ;;  %v4138_v33 = vand.u32 2147483648, %v7488_v15  ;;  %vm4134_vm8 = vmor %vm4132_vm4, %vm4133_vm7 }
 0x3b7   : > { %v4120_v28 = vsel %vm4119_vm5, %v7483_v50, %v4116_v9  ;;  %v4145_v0 = vmul.f32 %v6772_v51, %v4144_v37  ;;  %vm4147_vm10 = vweird.f32 %v6728_v47  ;;  %vm4148_vm11 = vweird.f32 %v6772_v51 }
 0x3b8   : > { %v4131_v39 = vadd.f32 %v7487_v62, %v4130_v23  ;;  %vm4137_vm9 = vcmp.eq.f32.partialorder %v4136_v54, 8.507059e+37  ;;  %v7110_v32 = vsel %vm4122_vm6, %v4124_v36, %v4120_v28  ;;  %v4139_v7 = vor.u32 1.1754944e-38, %v4138_v33  ;;  %vm4149_vm13 = vmor %vm4147_vm10, %vm4148_vm11  ;;  %v7491_v54 = vld [vmem:[#allocation40_spill] sm:$0xff] }
 0x3b9   : > { %v4151_v48 = vand.u32 2147483647, %v6728_v47  ;;  %v4146_v63 = vadd.f32 %v6772_v51, %v4145_v0  ;;  %v4153_v34 = vand.u32 2147483648, %v6728_v47  ;;  %v4160_v27 = vmul.f32 %v6793_v44, %v4159_v8 }
 0x3ba   : > { %v4135_v45 = vsel %vm4134_vm8, %v7487_v62, %v4131_v39  ;;  %vm4162_vm12 = vweird.f32 %v6747_v61  ;;  %vm4163_vm15 = vweird.f32 %v6793_v44  ;;  %v4166_v50 = vand.u32 2147483647, %v6747_v61 }
 0x3bb   : > { %v7120_v37 = vsel %vm4137_vm9, %v4139_v7, %v4135_v45  ;;  %vm4152_vm14 = vcmp.eq.f32.partialorder %v4151_v48, 8.507059e+37  ;;  %v4150_v29 = vsel %vm4149_vm13, %v6772_v51, %v4146_v63  ;;  %v4154_v58 = vor.u32 1.1754944e-38, %v4153_v34  ;;  %vm4164_vm0 = vmor %vm4162_vm12, %vm4163_vm15 }
 0x3bc   : > { %v4161_v20 = vadd.f32 %v6793_v44, %v4160_v27  ;;  %v4168_v47 = vand.u32 2147483648, %v6747_v61  ;;  %vm4167_vm2 = vcmp.eq.f32.partialorder %v4166_v50, 8.507059e+37  ;;  %v7489_v43 = vsub.f32 1.0, %v6886_v25 }
 0x3bd   : > { %vm4177_vm3 = vweird.f32 %v6824_v57  ;;  %vm4178_vm4 = vweird.f32 %v6874_v6  ;;  %v7132_v35 = vsel %vm4152_vm14, %v4154_v58, %v4150_v29  ;;  %v4181_v9 = vand.u32 2147483647, %v6824_v57 }
 0x3be   : > { %v4175_v8 = vmul.f32 %v6874_v6, %v7489_v43  ;;  %v4165_v59 = vsel %vm4164_vm0, %v6793_v44, %v4161_v20  ;;  %v4169_v51 = vor.u32 1.1754944e-38, %v4168_v47  ;;  %v4183_v61 = vand.u32 2147483648, %v6824_v57  ;;  %vm4179_vm6 = vmor %vm4177_vm3, %vm4178_vm4 }
 0x3bf   : > { %v7490_v22 = vsub.f32 1.0, %v6895_v38  ;;  %vm4192_vm5 = vweird.f32 %v6833_v26  ;;  %vm4182_vm7 = vcmp.eq.f32.partialorder %v4181_v9, 8.507059e+37  ;;  %vm4193_vm8 = vweird.f32 %v6882_v12 }
 0x3c0   : > { %v4176_v5 = vadd.f32 %v6874_v6, %v4175_v8  ;;  %v7142_v13 = vsel %vm4167_vm2, %v4169_v51, %v4165_v59  ;;  %v4196_v44 = vand.u32 2147483647, %v6833_v26  ;;  %v4184_v23 = vor.u32 1.1754944e-38, %v4183_v61  ;;  %vm4194_vm9 = vmor %vm4192_vm5, %vm4193_vm8 }
 0x3c1   : > { %v4190_v25 = vmul.f32 %v6882_v12, %v7490_v22  ;;  %v4198_v57 = vand.u32 2147483648, %v6833_v26  ;;  %v4234_v38 = vrot.slane %v6838_v24, 7  ;;  %v4235_v28 = vrot.slane %v7491_v54, 6 }
 0x3c2   : > { %v4180_v62 = vsel %vm4179_vm6, %v6874_v6, %v4176_v5  ;;  %vm4197_vm10 = vcmp.eq.f32.partialorder %v4196_v44, 8.507059e+37  ;;  %v4236_v36 = vrot.slane %v6795_v14, 5  ;;  %v4237_v6 = vrot.slane %v6826_v11, 4 }
 0x3c3   : > { %v4191_v15 = vadd.f32 %v6882_v12, %v4190_v25  ;;  %v7152_v39 = vsel %vm4182_vm7, %v4184_v23, %v4180_v62  ;;  %v4199_v0 = vor.u32 1.1754944e-38, %v4198_v57  ;;  %v4238_v45 = vrot.slane %v6858_v41, 3 }
 0x3c4   : > { %v4239_v26 = vrot.slane %v6876_v3, 2  ;;  %v4240_v7 = vrot.slane %v6897_v56, 1  ;;  %v4241_v48 = vrot.slane %v6922_v53, 7  ;;  %v4242_v63 = vrot.slane %v6934_v10, 6 }
 0x3c5   : > { %v4195_v33 = vsel %vm4194_vm9, %v6882_v12, %v4191_v15  ;;  %v4243_v14 = vrot.slane %v6944_v60, 5  ;;  %v4244_v34 = vrot.slane %v6956_v2, 4  ;;  %v4245_v12 = vrot.slane %v6966_v4, 3 }
 0x3c6   : > { %v4200_v24 = vsel %vm4197_vm10, %v4199_v0, %v4195_v33  ;;  %v4246_v11 = vrot.slane %v6978_v21, 2  ;;  %v4247_v41 = vrot.slane %v6988_v52, 1  ;;  %v4248_v3 = vrot.slane %v7010_v49, 7 }
 0x3c7   : > { %v4249_v56 = vrot.slane %v7022_v42, 6  ;;  %v4250_v53 = vrot.slane %v7032_v19, 5  ;;  %v4251_v10 = vrot.slane %v7044_v30, 4  ;;  %v4252_v60 = vrot.slane %v7054_v1, 3 }
 0x3c8   : > { %v4253_v2 = vrot.slane %v7066_v17, 2  ;;  %v4254_v27 = vrot.slane %v7076_v18, 1  ;;  %v4255_v4 = vrot.slane %v7098_v16, 7  ;;  %v4256_v21 = vrot.slane %v7110_v32, 6 }
 0x3c9   : > { %v4257_v49 = vrot.slane %v7120_v37, 5  ;;  %v4258_v52 = vrot.slane %v7132_v35, 4  ;;  %v4259_v42 = vrot.slane %v7142_v13, 3  ;;  %v4260_v19 = vrot.slane %v7152_v39, 2 }
 0x3ca   : > { %v4261_v30 = vrot.slane %v4200_v24, 1  ;;  %vm4262_vm11 = vcmask 1040384   ;;  %vm4264_vm12 = vcmask 1042434   ;;  %vm4267_vm13 = vcmask 1044484  }
 0x3cb   : > { %v4263_v1 = vsel %vm4262_vm11, %v6815_v46, %v4234_v38  ;;  %v4265_v17 = vsel %vm4264_vm12, %v4235_v28, %v4236_v36  ;;  %v4268_v18 = vsel %vm4267_vm13, %v4237_v6, %v4238_v45  ;;  %vm4269_vm14 = vcmask 1046534  }
 0x3cc   : > { %v4266_v16 = vsel %vm2614_vm1, %v4263_v1, %v4265_v17  ;;  %v4270_v32 = vsel %vm4269_vm14, %v4239_v26, %v4240_v7  ;;  %vm4271_vm15 = vcmask 1045508   ;;  %vm4273_vm0 = vcmask 1043456  }
 0x3cd   : > { %v4272_v46 = vsel %vm4271_vm15, %v4268_v18, %v4270_v32  ;;  %v4275_v37 = vsel %vm4262_vm11, %v6907_v55, %v4241_v48  ;;  %v4276_v50 = vsel %vm4264_vm12, %v4242_v63, %v4243_v14  ;;  %v4278_v29 = vsel %vm4267_vm13, %v4244_v34, %v4245_v12 }
 0x3ce   : > { %v4274_v58 = vsel %vm4273_vm0, %v4266_v16, %v4272_v46  ;;  %v4277_v20 = vsel %vm2614_vm1, %v4275_v37, %v4276_v50  ;;  %v4279_v47 = vsel %vm4269_vm14, %v4246_v11, %v4247_v41  ;;  %v4282_v43 = vsel %vm4262_vm11, %v7000_v40, %v4248_v3 }
 0x3cf   : > { %v4280_v8 = vsel %vm4271_vm15, %v4278_v29, %v4279_v47  ;;  %v4283_v35 = vsel %vm4264_vm12, %v4249_v56, %v4250_v53  ;;  %v4285_v59 = vsel %vm4267_vm13, %v4251_v10, %v4252_v60  ;;  %v4286_v55 = vsel %vm4269_vm14, %v4253_v2, %v4254_v27  ;;  %4300 = vst [vmem:[%s274_s18] sm:$0xff] %v4274_v58 }
 0x3d0   : > { %v4281_v51 = vsel %vm4273_vm0, %v4277_v20, %v4280_v8  ;;  %v4284_v9 = vsel %vm2614_vm1, %v4282_v43, %v4283_v35  ;;  %v4287_v5 = vsel %vm4271_vm15, %v4285_v59, %v4286_v55  ;;  %v4289_v40 = vsel %vm4262_vm11, %v7088_v31, %v4255_v4 }
 0x3d1   : > { %v4288_v61 = vsel %vm4273_vm0, %v4284_v9, %v4287_v5  ;;  %v4290_v22 = vsel %vm4264_vm12, %v4256_v21, %v4257_v49  ;;  %v4292_v25 = vsel %vm4267_vm13, %v4258_v52, %v4259_v42  ;;  %v4293_v13 = vsel %vm4269_vm14, %v4260_v19, %v4261_v30  ;;  %4301 = vst [vmem:[%s274_s18 + $0x8] sm:$0xff] %v4281_v51 }
 0x3d2   : > { %v4291_v44 = vsel %vm2614_vm1, %v4289_v40, %v4290_v22  ;;  %v4294_v62 = vsel %vm4271_vm15, %v4292_v25, %v4293_v13  ;;  %4302 = vst [vmem:[%s274_s18 + $0x10] sm:$0xff] %v4288_v61 }
 0x3d3   : > { %v4295_v23 = vsel %vm4273_vm0, %v4291_v44, %v4294_v62 }
 0x3d4   : > { %4303 = vst [vmem:[%s274_s18 + $0x18] sm:$0xff] %v4295_v23 }
 0x3d5   : > { %4728 = shalt.err (!%p4725_p3)
}
 0x3d6   : > { %4528 = dma.vmem_to_hbm [thread:$0]  (%p4847_p5), %s4318_s21, 512, %s4320_s22, %s4305_s23  }
 0x3d7 PF: > { %p4534_p4 = scmp.ge.s32.totalorder %s4763_s29, 2  ;;  %s4331_s15 = sand.u32 1, %s4751_s26  }
 0x3d8   : > { %s4332_s17 = scalar_lea.sflag [#allocation4], %s4331_s15 }
 0x3d9   : > { %p4531_p7 = pnand %p4534_p4, %p4851_p6 }
 0x3db   : > { %p4532_p8 = pneg %p4531_p7 }
 0x3dd   : > { %4746 = dma.done.wait (%p4532_p8), %s4332_s17, 512  }
 0x3de   : > { %4748 = vsyncadd (%p4532_p8), %s4332_s17, 4294966784  ;;  %p19_p9 = scmp.ge.s32.totalorder %s4834_s8, 6   ;;  %s7492_s26 = smov %s4755_s27 }
 0x3df   : > { %s7493_s27 = smov %s4759_s28  ;;  %s7494_s28 = smov %s4845_s11 }
 0x3e0   : > { %s7495_s29 = smov %s4834_s8  ;;  %21 = sbr.rel (!%p19_p9) target bundleno = 6 (0x6), region = 83 }
 0x3e5   :  { %4338 = vsyncpa [#allocation4], 1 }
 0x3e6   :  { %4340 = vsyncpa [#allocation4 + $0x1], 1 }

</bundles_post_ra>
